<compile_context>
chip_gen: v6e
topology: v6e:2x2x1
jax: 0.10.0
libtpu: 0.0.40
codegen_flags: <defaults>
</compile_context>

<pallas_src>
import jax
import jax.numpy as jnp
from jax import lax
from jax.experimental import pallas as pl
from jax.experimental.pallas import tpu as pltpu

# ---------------- model dims ----------------
V = 25            # vocab size
E = 1280          # embedding dim
H = 1280          # LSTM hidden dim (output[0]+output[1] -> 1280 channels = Decoder in_size)
G4 = 4 * H        # fused gate width
C1 = 32           # decoder conv hidden channels
KSZ = 7           # decoder conv kernel size
PAD = KSZ // 2
NUM_CLASSES = 8   # DSSP-8 states

F32 = jnp.float32
BF16 = jnp.bfloat16


def _vmem_limit_bytes():
    """Generation-aware VMEM cap (v5e/v6e: 128 MiB physical, v7x: 64 MiB)."""
    try:
        cap = int(pltpu.get_tpu_info().vmem_capacity_bytes)
    except Exception:
        cap = 64 * 1024 * 1024          # conservative fallback (v7x-sized)
    return max(32 * 1024 * 1024, min(100 * 1024 * 1024, cap - 8 * 1024 * 1024))


# ================= input projection (MXU, time-parallel) =================

def _proj_kernel(x_ref, w_ref, b_ref, o_ref):
    # x: (tm, K) bf16   w: (K, tn) bf16   b: (1, tn) f32   o: (tm, tn) f32
    o_ref[...] = (
        jnp.dot(x_ref[...], w_ref[...], preferred_element_type=jnp.float32)
        + b_ref[...]
    )


def linear_proj(x2d_bf16, w_t_bf16, b_row, *, tm=256, tn=1280):
    """(M, K) @ (K, N) + b, tiled over M and N; both grid axes parallel."""
    M, K = x2d_bf16.shape
    N = w_t_bf16.shape[1]
    assert N % tn == 0
    if M < tm:
        tm = ((M + 7) // 8) * 8
    Mp = pl.cdiv(M, tm) * tm
    x_p = x2d_bf16 if Mp == M else jnp.pad(x2d_bf16, ((0, Mp - M), (0, 0)))
    out = pl.pallas_call(
        _proj_kernel,
        out_shape=jax.ShapeDtypeStruct((Mp, N), F32),
        grid=(Mp // tm, N // tn),
        in_specs=[
            pl.BlockSpec((tm, K), lambda i, j: (i, 0)),
            pl.BlockSpec((K, tn), lambda i, j: (0, j)),
            pl.BlockSpec((1, tn), lambda i, j: (0, j)),
        ],
        out_specs=pl.BlockSpec((tm, tn), lambda i, j: (i, j)),
        compiler_params=pltpu.CompilerParams(
            dimension_semantics=("parallel", "parallel"),
            vmem_limit_bytes=_vmem_limit_bytes(),
        ),
    )(x_p, w_t_bf16, b_row)
    return out if Mp == M else out[:M]


# ================= fused 2-layer LSTM recurrence (streamed over T) =================

def _enc_lstm_kernel(xw0_ref, whh0_ref, wih1_ref, whh1_ref, b1_ref, out_ref,
                     h0_scr, c0_scr, h1_scr, c1_scr):
    # xw0 : (tc, B, 4H) f32   layer-0 gates precomputed: x @ W_ih0^T + b_ih0 + b_hh0
    # whh0/wih1/whh1 : (H, 4H) bf16, whole-array resident in VMEM across the grid
    # b1  : (1, 4H) f32       b_ih1 + b_hh1
    # out : (tc, B, H) f32    layer0_h + layer1_h  (== output[0] + output[1])
    TCn, Bn, _ = xw0_ref.shape
    Hh = out_ref.shape[2]

    @pl.when(pl.program_id(0) == 0)
    def _init():
        zeros = jnp.zeros((Bn, Hh), F32)
        h0_scr[...] = zeros
        c0_scr[...] = zeros
        h1_scr[...] = zeros
        c1_scr[...] = zeros

    def cell(gates, c_prev):
        # PyTorch gate order: i, f, g, o; gate math kept in f32 (v5e has no bf16 VPU/EUP)
        i = jax.nn.sigmoid(gates[:, 0 * Hh:1 * Hh])
        f = jax.nn.sigmoid(gates[:, 1 * Hh:2 * Hh])
        g = jnp.tanh(gates[:, 2 * Hh:3 * Hh])
        o = jax.nn.sigmoid(gates[:, 3 * Hh:4 * Hh])
        c = f * c_prev + i * g
        h = o * jnp.tanh(c)
        return h, c

    def step(t, carry):
        # ---- layer 0 ----
        g0 = xw0_ref[t] + jnp.dot(h0_scr[...].astype(BF16), whh0_ref[...],
                                  preferred_element_type=jnp.float32)
        h0, c0 = cell(g0, c0_scr[...])
        h0_scr[...] = h0
        c0_scr[...] = c0
        # ---- layer 1 (input = layer-0 hidden; input projection fused here) ----
        g1 = (b1_ref[...]
              + jnp.dot(h0.astype(BF16), wih1_ref[...],
                        preferred_element_type=jnp.float32)
              + jnp.dot(h1_scr[...].astype(BF16), whh1_ref[...],
                        preferred_element_type=jnp.float32))
        h1, c1 = cell(g1, c1_scr[...])
        h1_scr[...] = h1
        c1_scr[...] = c1
        # model output = layer 0 + layer 1
        out_ref[t] = h0 + h1
        return carry

    lax.fori_loop(0, TCn, step, 0, unroll=2)


def encoder_lstm(xw0, whh0_t, wih1_t, whh1_t, b1):
    """Fused 2-layer recurrence; xw/out streamed over T, W_hh/W_ih1 resident (bf16)."""
    T, B, _ = xw0.shape
    tc = next((c for c in (32, 16, 8) if T % c == 0), T)   # time chunk
    vmem = pltpu.MemorySpace.VMEM
    return pl.pallas_call(
        _enc_lstm_kernel,
        out_shape=jax.ShapeDtypeStruct((T, B, H), F32),
        grid=(T // tc,),
        in_specs=[
            pl.BlockSpec((tc, B, G4), lambda t: (t, 0, 0)),   # streamed, double-buffered
            pl.BlockSpec(memory_space=vmem),                  # W_hh0^T (bf16)
            pl.BlockSpec(memory_space=vmem),                  # W_ih1^T (bf16)
            pl.BlockSpec(memory_space=vmem),                  # W_hh1^T (bf16)
            pl.BlockSpec(memory_space=vmem),                  # b1
        ],
        out_specs=pl.BlockSpec((tc, B, H), lambda t: (t, 0, 0)),
        scratch_shapes=[pltpu.VMEM((B, H), F32) for _ in range(4)],  # h0,c0,h1,c1
        compiler_params=pltpu.CompilerParams(
            dimension_semantics=("arbitrary",),               # state carried across chunks
            vmem_limit_bytes=_vmem_limit_bytes(),
        ),
    )(xw0, whh0_t, wih1_t, whh1_t, b1)


# ================= decoder CNN head =================

def _decoder_kernel(xp_ref, w1_ref, b1_ref, w2_ref, b2_ref, out_ref):
    # xp : (1, T + 2*PAD, Cin) f32   time-padded input, one batch element
    # w1 : (KSZ, Cin, C1) bf16       conv1 taps (tap-major)
    # b1 : (1, C1) f32
    # w2 : (C1, NUM_CLASSES) bf16    1x1 conv
    # b2 : (1, NUM_CLASSES) f32
    # out: (1, NUM_CLASSES, T) f32   lane-dense along T
    Tn = out_ref.shape[2]
    x = xp_ref[0].astype(BF16)                                        # (Tp, Cin)
    # per-tap full-row matmuls (M = Tp), then cheap shifted sums on narrow (Tp, C1)
    acc = jnp.dot(x, w1_ref[0], preferred_element_type=jnp.float32)[0:Tn, :]
    for k in range(1, KSZ):                                           # static unroll
        yk = jnp.dot(x, w1_ref[k], preferred_element_type=jnp.float32)
        acc = acc + yk[k:k + Tn, :]
    h = jnp.maximum(acc + b1_ref[...], 0.0)                           # (T, C1) ReLU
    logits = (jnp.dot(h.astype(BF16), w2_ref[...],
                      preferred_element_type=jnp.float32)
              + b2_ref[...])                                          # (T, NUM_CLASSES)
    out_ref[0] = jnp.transpose(logits, (1, 0))                        # (NUM_CLASSES, T)


def decoder_conv(x_btc, w1_t, b1, w2_t, b2):
    """Conv1d(1280->32,k=7,pad=3) + ReLU + Conv1d(32->NUM_CLASSES,k=1); NCW output."""
    B, T, Cin = x_btc.shape
    # TODO(synk): 'same' zero padding done as one small glue pad along T; for very long
    #             sequences this kernel should additionally tile over T.
    xp = jnp.pad(x_btc, ((0, 0), (PAD, PAD), (0, 0)))
    Tp = T + 2 * PAD
    return pl.pallas_call(
        _decoder_kernel,
        out_shape=jax.ShapeDtypeStruct((B, NUM_CLASSES, T), F32),
        grid=(B,),
        in_specs=[
            pl.BlockSpec((1, Tp, Cin), lambda b: (b, 0, 0)),
            pl.BlockSpec((KSZ, Cin, C1), lambda b: (0, 0, 0)),
            pl.BlockSpec((1, C1), lambda b: (0, 0)),
            pl.BlockSpec((C1, NUM_CLASSES), lambda b: (0, 0)),
            pl.BlockSpec((1, NUM_CLASSES), lambda b: (0, 0)),
        ],
        out_specs=pl.BlockSpec((1, NUM_CLASSES, T), lambda b: (b, 0, 0)),
        compiler_params=pltpu.CompilerParams(
            dimension_semantics=("parallel",),
            vmem_limit_bytes=_vmem_limit_bytes(),
        ),
    )(xp, w1_t, b1, w2_t, b2)


# ================= parameter init (deterministic, synthetic) =================

def init_params(key):
    keys = jax.random.split(key, 12)
    params = {"embedding": 0.02 * jax.random.normal(keys[0], (V, E), F32)}
    bound = 1.0 / jnp.sqrt(jnp.float32(H))

    def lstm_weights(k_ih, k_hh, k_bih, k_bhh, in_dim):
        w_ih = jax.random.uniform(k_ih, (4 * H, in_dim), F32, -bound, bound)
        w_hh = jax.random.uniform(k_hh, (4 * H, H), F32, -bound, bound)
        b_ih = jax.random.uniform(k_bih, (4 * H,), F32, -bound, bound)
        b_hh = jax.random.uniform(k_bhh, (4 * H,), F32, -bound, bound)
        return (jnp.transpose(w_ih).astype(BF16),        # (in_dim, 4H) bf16 MXU operand
                jnp.transpose(w_hh).astype(BF16),        # (H, 4H)     bf16 MXU operand
                (b_ih + b_hh).reshape(1, 4 * H))         # (1, 4H) f32

    params["w_ih0_t"], params["w_hh0_t"], params["b0"] = lstm_weights(
        keys[1], keys[2], keys[3], keys[4], E)
    params["w_ih1_t"], params["w_hh1_t"], params["b1"] = lstm_weights(
        keys[5], keys[6], keys[7], keys[8], H)

    cb1 = 1.0 / jnp.sqrt(jnp.float32(E * KSZ))
    cb2 = 1.0 / jnp.sqrt(jnp.float32(C1))
    w1 = jax.random.uniform(keys[9], (C1, E, KSZ), F32, -cb1, cb1)   # torch Conv1d layout
    params["dec_w1_t"] = jnp.transpose(w1, (2, 1, 0)).astype(BF16)   # (KSZ, E, C1)
    params["dec_b1"] = jax.random.uniform(keys[10], (1, C1), F32, -cb1, cb1)
    w2 = jax.random.uniform(keys[11], (NUM_CLASSES, C1), F32, -cb2, cb2)
    params["dec_w2_t"] = jnp.transpose(w2).astype(BF16)              # (C1, NUM_CLASSES)
    params["dec_b2"] = jnp.zeros((1, NUM_CLASSES), F32)
    return params


# ================= forward pass =================

def model_forward(params, tokens, seq_len):
    # tokens: (T, B) int32  (== inp.long() in the reference, sequence-first)
    del seq_len  # TODO(synk): packing/masking by sequence length not implemented
    T, B = tokens.shape

    # --- Encoder ---
    x = jnp.take(params["embedding"], tokens, axis=0)                # (T, B, E)
    x2d = x.reshape(T * B, E).astype(BF16)
    # layer-0 input projection on the MXU (time-parallel, gates pre-biased)
    xw0 = linear_proj(x2d, params["w_ih0_t"], params["b0"]).reshape(T, B, G4)
    # fused 2-layer recurrence; emits output[0] + output[1] directly
    enc_sum = encoder_lstm(xw0, params["w_hh0_t"], params["w_ih1_t"],
                           params["w_hh1_t"], params["b1"])          # (T, B, H)

    # output.permute(1, 2, 0) -> (B, C, T): the decoder kernel consumes the cheap
    # batch-major (B, T, C) form directly and writes NCW itself (no channel permute).
    dec_in = jnp.transpose(enc_sum, (1, 0, 2))                       # (B, T, C)

    # --- Decoder ---
    logits = decoder_conv(dec_in, params["dec_w1_t"], params["dec_b1"],
                          params["dec_w2_t"], params["dec_b2"])      # (B, NUM_CLASSES, T)
    return logits


# ================= main =================

if __name__ == "__main__":
    key = jax.random.PRNGKey(0)
    pkey, tkey = jax.random.split(key)
    params = init_params(pkey)

    T, B = 8, 2                                                      # small demo shapes
    tokens = jax.random.randint(tkey, (T, B), 0, V, dtype=jnp.int32)
    seq_len = jnp.full((B,), T, dtype=jnp.int32)

    out = jax.block_until_ready(model_forward(params, tokens, seq_len))
    assert out.shape == (B, NUM_CLASSES, T), out.shape
    assert bool(jnp.all(jnp.isfinite(out)))
    print("KERNEL_OK")
</pallas_src>

<mosaic_0001>
module attributes {stable_mosaic.version = 11 : i64} {
  func.func @_proj_kernel(%arg0: i32, %arg1: i32, %arg2: memref<16x1280xbf16, #tpu.memory_space<vmem>>, %arg3: memref<1280x1280xbf16, #tpu.memory_space<vmem>>, %arg4: memref<1x1280xf32, #tpu.memory_space<vmem>>, %arg5: memref<16x1280xf32, #tpu.memory_space<vmem>>) attributes {dimension_semantics = [#tpu.dimension_semantics<parallel>, #tpu.dimension_semantics<parallel>], iteration_bounds = array<i64: 1, 4>, scalar_prefetch = 0 : i64, scratch_operands = 0 : i64, tpu.core_type = #tpu.core_type<tc>, window_params = [{transform_indices = @transform_0, window_bounds = array<i64: 16, 1280>}, {transform_indices = @transform_1, window_bounds = array<i64: 1280, 1280>}, {transform_indices = @transform_2, window_bounds = array<i64: 1, 1280>}, {transform_indices = @transform_3, window_bounds = array<i64: 16, 1280>}]} {
    %c0 = arith.constant 0 : index
    %c0_0 = arith.constant 0 : index
    %0 = vector.load %arg2[%c0, %c0_0] : memref<16x1280xbf16, #tpu.memory_space<vmem>>, vector<16x1280xbf16>
    %c0_1 = arith.constant 0 : index
    %c0_2 = arith.constant 0 : index
    %1 = vector.load %arg3[%c0_1, %c0_2] : memref<1280x1280xbf16, #tpu.memory_space<vmem>>, vector<1280x1280xbf16>
    %cst = arith.constant dense<0.000000e+00> : vector<16x1280xf32>
    %2 = tpu.matmul %0, %1, %cst {dimension_numbers = #tpu.dot_dimension_numbers<[1], [0], [0], [1], [0, 0, 1, 1], [], []>} : vector<16x1280xbf16>, vector<1280x1280xbf16>, vector<16x1280xf32> -> vector<16x1280xf32>
    %c0_3 = arith.constant 0 : index
    %c0_4 = arith.constant 0 : index
    %3 = vector.load %arg4[%c0_3, %c0_4] : memref<1x1280xf32, #tpu.memory_space<vmem>>, vector<1x1280xf32>
    %4 = vector.broadcast %3 : vector<1x1280xf32> to vector<16x1280xf32>
    %5 = arith.addf %2, %4 : vector<16x1280xf32>
    %c0_5 = arith.constant 0 : index
    %c0_6 = arith.constant 0 : index
    %6 = vector.load %arg5[%c0_5, %c0_6] : memref<16x1280xf32, #tpu.memory_space<vmem>>, vector<16x1280xf32>
    tpu.vector_store %arg5[%c0_5, %c0_6], %5 {strides = array<i32>} : memref<16x1280xf32, #tpu.memory_space<vmem>>, vector<16x1280xf32>,
    return
  }
  func.func @transform_0(%arg0: i32, %arg1: i32) -> (i32, i32) {
    %c0_i32 = arith.constant 0 : i32
    %c0_i32_0 = arith.constant 0 : i32
    return %arg0, %c0_i32 : i32, i32
  }
  func.func @transform_1(%arg0: i32, %arg1: i32) -> (i32, i32) {
    %c0_i32 = arith.constant 0 : i32
    %c0_i32_0 = arith.constant 0 : i32
    return %c0_i32, %arg1 : i32, i32
  }
  func.func @transform_2(%arg0: i32, %arg1: i32) -> (i32, i32) {
    %c0_i32 = arith.constant 0 : i32
    %c0_i32_0 = arith.constant 0 : i32
    return %c0_i32, %arg1 : i32, i32
  }
  func.func @transform_3(%arg0: i32, %arg1: i32) -> (i32, i32) {
    %c0_i32 = arith.constant 0 : i32
    return %arg0, %arg1 : i32, i32
  }
}

</mosaic_0001>

<bundles_post_ra>
// kernel: tpu_custom_call.1
= control target key start
LH: loop header
LB: loop body
LE: loop exit
PB: predicated region body
PF: predicated region fallthrough
CT: control target
= control target key end

     0   :  { %8 = vsyncpa [#allocation3], 0  ;;  %s9881_s0 = inlined_call_operand.hbm [shape: bf16[16,1280], index: 0, kind: input, shape index: {}]   ;;  %s9882_s1 = inlined_call_operand.hbm [shape: bf16[1280,5120], index: 1, kind: input, shape index: {}]   ;;  %s9883_s2 = inlined_call_operand.hbm [shape: f32[1,5120], index: 2, kind: input, shape index: {}]   ;;  %s9884_s3 = inlined_call_operand.hbm [shape: f32[16,5120], index: 3, kind: output, shape index: {}]  }
   0x1   :  { %9 = vsyncpa [#allocation6], 0 }
   0x2   :  { %11 = vsyncpa [#allocation6 + $0x1], 0 }
   0x3   :  { %12 = vsyncpa [#allocation4], 0 }
   0x4   :  { %14 = vsyncpa [#allocation4 + $0x1], 0  ;;  %s8763_s12 = smov 0   ;;  %s8765_s13 = smov 0  }
   0x5   :  { %s8767_s14 = smov 0   ;;  %s8769_s15 = smov 0  }
   0x6   :  { %s8771_s16 = smov 0   ;;  %s8773_s17 = smov 0  }
   0x7 LB: > { %s29_s18 = sadd.s32 1, %s8727_s16  ;;  %s65_s19 = sadd.s32 1, %s8719_s14  ;;  %s8731_s17 = sphi %s8773_s17, %s20_s17   ;;  %s8727_s16 = sphi %s8771_s16, %s9904_s16   ;;  %s8723_s15 = sphi %s8769_s15, %s9903_s15   ;;  %s8719_s14 = sphi %s8767_s14, %s9902_s14   ;;  %s8715_s13 = sphi %s8765_s13, %s9901_s13   ;;  %s8711_s12 = sphi %s8763_s12, %s9900_s12  }
   0x8   : > { %p30_p0 = scmp.ge.s32.totalorder %s29_s18, 4  ;;  %p72_p1 = scmp.ne.s32.totalorder %s8719_s14, %s8715_s13 }
   0x9   : > { %p73_p2 = scmp.eq.s32.totalorder %s8731_s17, 0  ;;  %p7267_p5 = scmp.lt.s32.totalorder %s8731_s17, 4 }
   0xa   : > { %s9906_s18 = smov (%p30_p0, %s29_s18), 0  ;;  %s173_s21 = sand.u32 1, %s8731_s17  }
   0xb   : > { %p74_p3 = por %p73_p2, %p72_p1  ;;  %s62_s20 = ssub.s32 %s8727_s16, %s9906_s18 }
   0xc   : > { %p63_p4 = scmp.eq.s32.totalorder %s62_s20, 0  ;;  %s175_s22 = sand.u32 1, %s8719_s14  }
   0xd   : > { %s7236_s24 = smul.u32 6400, %s175_s22  ;;  %p8814_p6 = pnand %p7267_p5, %p74_p3 }
   0xe   : > { %s8809_s23 = scalar_select %p63_p4, %s8719_s14, %s65_s19  }
   0xf   : > { %s7233_s25 = smul.u32 640, %s8727_s16  ;;  %s177_s30 = scalar_lea.vmem [#allocation5], %s7236_s24 }
  0x10   : > { %s184_s4 = sshll.u32 %s177_s30, 4  ;;  %s8821_s5 = scalar_lea.sflag [#allocation6], %s173_s21  ;;  %s185_s4 = int_to_ptr.vmem [resolvable:$true] %s184_s4 }
  0x11   : > { %s183_s29 = scalar_lea.hbm %s9882_s1, %s7233_s25  ;;  %p9885_p7 = pneg %p8814_p6 }
  0x12   : > { %s8578_s6 = scalar_lea.vmem %s185_s4, 102400  ;;  %s8733_s7 = smov [#allocation5]  }
  0x13   : > { %p8579_p8 = scmp.ne.s32.totalorder %s185_s4, %s8578_s6  ;;  %s8583_s8 = sshll.u32 %s8733_s7, 4  ;;  %s8584_s8 = int_to_ptr.vmem [resolvable:$false] %s8583_s8 }
  0x14   : > { %s8585_s9 = scalar_lea.vmem %s8584_s8, 204800  ;;  %p8586_p11 = scmp.lt.s32.totalorder %s185_s4, %s8584_s8 }
  0x15   : > { %p8581_p9 = pnand %p8579_p8, %p9885_p7  ;;  %p8587_p12 = scmp.lt.s32.totalorder %s8585_s9, %s8578_s6 }
  0x17   : > { %p8582_p10 = pneg %p8581_p9  ;;  %p8588_p13 = por %p8587_p12, %p8586_p11 }
  0x19   : > { %p8589_p0 = pnand %p8588_p13, %p8582_p10 }
  0x1b   : > { %8592 = shalt.err (!%p8589_p0)
}
  0x1c   : > { %s8734_s10 = smov 2560   ;;  %s8735_s11 = smov 640  }
  0x1d   : > { %s8736_s19 = smov 40   ;;  %s8834_s20 = sadd.s32 4294967295, %s8731_s17  }
  0x1e   : > { %7258 = dma.hbm_to_vmem [thread:$0]  (!%p8814_p6), %s183_s29, 102400, %s185_s4, %s8821_s5, %s8734_s10, %s8735_s11, %s8736_s19  }
  0x1f   : > { %s6412_s21 = sadd.s32 4294967294, %s8731_s17   ;;  %p78_p2 = scmp.ne.s32.totalorder %s8715_s13, %s8711_s12 }
  0x20   : > { %p9887_p3 = scmp.eq.s32.totalorder %s8834_s20, 0  ;;  %p130_p4 = scmp.eq.s32.totalorder %s8834_s20, 3 }
  0x21   : > { %p136_p5 = scmp.eq.s32.totalorder %s6412_s21, 3  ;;  %p6413_p9 = scmp.ge.s32.totalorder %s8731_s17, 1 }
  0x22   : > { %p8843_p8 = por %p9887_p3, %p78_p2  ;;  %p8851_p10 = por %p130_p4, %p72_p1 }
  0x23   : > { %p8855_p11 = por %p136_p5, %p78_p2  ;;  %p143_p12 = scmp.lt.s32.totalorder %s8731_s17, 5 }
  0x24   : > { %s9890_s24 = scalar_select %p8843_p8, 1, 0 }
  0x25   : > { %s9891_s25 = scalar_select %p8851_p10, 1, 0 }
  0x26   : > { %s9892_s27 = scalar_select %p8855_p11, 1, 0 }
  0x27   : > { %s7237_s28 = smul.u32 10, %s175_s22  ;;  %p8862_p13 = pnand %p6413_p9, %p143_p12 }
  0x28   : > { %s8737_s30 = smov [#allocation2]   ;;  %s7234_s6 = smul.u32 160, %s8727_s16 }
  0x29   : > { %s159_s4 = sshll.u32 %s8737_s30, 4  ;;  %p7251_p0 = pneg %p8862_p13  ;;  %s160_s4 = int_to_ptr.vmem [resolvable:$true] %s159_s4 }
  0x2a   : > { %s198_s7 = scalar_lea.vmem [#allocation7], %s7237_s28  ;;  %s204_s21 = scalar_lea.hbm %s9883_s2, %s7234_s6 }
  0x2b   : > { %s206_s8 = sshll.u32 %s198_s7, 4  ;;  %p7252_p1 = pnand %p7251_p0, %p9887_p3  ;;  %s207_s8 = int_to_ptr.vmem [resolvable:$true] %s206_s8 }
  0x2c   : > { %s8604_s22 = scalar_lea.vmem %s160_s4, 1280  ;;  %p8612_p12 = scmp.lt.s32.totalorder %s160_s4, %s160_s4 }
  0x2d   : > { %p8595_p2 = pneg %p7252_p1  ;;  %p8605_p4 = scmp.ne.s32.totalorder %s160_s4, %s8604_s22 }
  0x2e   : > { %p8613_p7 = scmp.lt.s32.totalorder %s8604_s22, %s8604_s22 }
  0x2f   : > { %p8607_p5 = pnand %p8605_p4, %p8595_p2 }
  0x30   : > { %p8614_p11 = por %p8613_p7, %p8612_p12 }
  0x31   : > { %p8608_p9 = pneg %p8607_p5 }
  0x33   : > { %p8615_p10 = pnand %p8614_p11, %p8608_p9 }
  0x35   : > { %8618 = shalt.err (!%p8615_p10)
}
  0x36   : > { %7254 = dma.hbm_to_vmem [thread:$0]  (!%p7252_p1), %s9881_s0, 1280, %s160_s4, [#allocation3], %s8735_s11, %s8735_s11, %s8736_s19  }
  0x37   : > { %s8632_s6 = scalar_lea.vmem %s207_s8, 160  ;;  %p9894_p3 = pneg %p8814_p6 }
  0x38   : > { %p8633_p0 = scmp.ne.s32.totalorder %s207_s8, %s8632_s6  ;;  %s8738_s7 = smov [#allocation7]  }
  0x39   : > { %s8637_s9 = sshll.u32 %s8738_s7, 4  ;;  %s8638_s9 = int_to_ptr.vmem [resolvable:$false] %s8637_s9 }
  0x3a   : > { %p8635_p8 = pnand %p8633_p0, %p9894_p3  ;;  %s8639_s10 = scalar_lea.vmem %s8638_s9, 320 }
  0x3b   : > { %p8640_p7 = scmp.lt.s32.totalorder %s207_s8, %s8638_s9  ;;  %p8641_p10 = scmp.lt.s32.totalorder %s8639_s10, %s8632_s6 }
  0x3c   : > { %p8636_p2 = pneg %p8635_p8 }
  0x3d   : > { %p8642_p11 = por %p8641_p10, %p8640_p7 }
  0x3f   : > { %p8643_p4 = pnand %p8642_p11, %p8636_p2 }
  0x41   : > { %8646 = shalt.err (!%p8643_p4)
}
  0x42   : > { %7261 = dma.hbm_to_vmem [thread:$0]  (!%p8814_p6), %s204_s21, 160, %s207_s8, %s8821_s5  }
  0x43   : > { %215 = sbr.rel (%p8862_p13) target bundleno = 1127 (0x467), region = 32  ;;  %p9895_p1 = scmp.eq.s32.totalorder (!%p8862_p13), %s8834_s20, 0 }
  0x48   : > { %8698 = dma.done.wait (%p9895_p1), [#allocation3], 1280   ;;  %p9896_p3 = pmov %p9895_p1 }
  0x49   : > { %s221_s11 = sand.u32 1, %s8834_s20   ;;  %s8894_s19 = sand.u32 1, %s8715_s13  }
  0x4a   : > { %8700 = vsyncadd (%p9896_p3), [#allocation3], 4294966016  ;;  %s7238_s4 = smul.u32 6400, %s8894_s19  ;;  %s222_s26 = scalar_lea.sflag [#allocation6], %s221_s11 }
  0x4b   : > { %p9897_p6 = scmp.ne.s32.totalorder %s9890_s24, 0 }
  0x4c   : > { %s8897_s22 = scalar_lea.vmem [#allocation5], %s7238_s4 }
  0x4d   : > { %8702 = dma.done.wait (%p9897_p6), %s222_s26, 102560  }
  0x4e   : > { %8704 = vsyncadd (%p9897_p6), %s222_s26, 4294864736  ;;  %v7325_v0 = vld [vmem:[%s8897_s22 + $0x234] ss:$40 sps:$4 sm:$0xff]   ;;  %v7327_v1 = vld [vmem:[%s8897_s22 + $0x230] ss:$40 sps:$4 sm:$0xff]   ;;  %s7239_s5 = smul.u32 10, %s8894_s19 }
  0x4f   : > { %5181 = vmatprep.subr.bf16.mxu0 %v7325_v0  ;;  %v7328_v2 = vld [vmem:[%s8897_s22 + $0x734] ss:$40 sps:$4 sm:$0xff]   ;;  %v7330_v3 = vld [vmem:[%s8897_s22 + $0x730] ss:$40 sps:$4 sm:$0xff]   ;;  %v7331_v4 = vld [vmem:[%s8897_s22 + $0x1e4] ss:$40 sps:$4 sm:$0xff]  }
  0x50   : > { %5182 = vmatpush1.bf16.msra.mxu0 %v7327_v1  ;;  %v7333_v5 = vld [vmem:[%s8897_s22 + $0x1e0] ss:$40 sps:$4 sm:$0xff]   ;;  %5224 = vmatprep.subr.bf16.mxu1 %v7328_v2  ;;  %v7334_v6 = vld [vmem:[%s8897_s22 + $0x6e4] ss:$40 sps:$4 sm:$0xff]   ;;  %v7337_v8 = vld [vmem:[%s8897_s22 + $0x194] ss:$40 sps:$4 sm:$0xff]  }
  0x51   : > { %5225 = vmatpush1.bf16.msra.mxu1 %v7330_v3  ;;  %5183 = vmatprep.subr.bf16.mxu0 %v7331_v4  ;;  %v7336_v7 = vld [vmem:[%s8897_s22 + $0x6e0] ss:$40 sps:$4 sm:$0xff]   ;;  %v7339_v9 = vld [vmem:[%s8897_s22 + $0x190] ss:$40 sps:$4 sm:$0xff]   ;;  %v7340_v10 = vld [vmem:[%s8897_s22 + $0x694] ss:$40 sps:$4 sm:$0xff]  }
  0x52   : > { %5226 = vmatprep.subr.bf16.mxu1 %v7334_v6  ;;  %v7343_v11 = vld [vmem:[%s8897_s22 + $0x144] ss:$40 sps:$4 sm:$0xff]   ;;  %v7342_v12 = vld [vmem:[%s8897_s22 + $0x690] ss:$40 sps:$4 sm:$0xff]   ;;  %v7345_v14 = vld [vmem:[%s8897_s22 + $0x140] ss:$40 sps:$4 sm:$0xff]  }
  0x53   : > { %v7346_v13 = vld [vmem:[%s8897_s22 + $0x644] ss:$40 sps:$4 sm:$0xff]   ;;  %v7349_v15 = vld [vmem:[%s8897_s22 + $0xf4] ss:$40 sps:$4 sm:$0xff]   ;;  %v7348_v16 = vld [vmem:[%s8897_s22 + $0x640] ss:$40 sps:$4 sm:$0xff]  }
  0x54   : > { %5184 = vmatpush1.bf16.msra.mxu0 %v7333_v5  ;;  %v7352_v17 = vld [vmem:[%s8897_s22 + $0x5f4] ss:$40 sps:$4 sm:$0xff]   ;;  %v7351_v18 = vld [vmem:[%s8897_s22 + $0xf0] ss:$40 sps:$4 sm:$0xff]   ;;  %v7355_v19 = vld [vmem:[%s8897_s22 + $0xa4] ss:$40 sps:$4 sm:$0xff]  }
  0x55   : > { %5185 = vmatprep.subr.bf16.mxu0 %v7337_v8  ;;  %5227 = vmatpush1.bf16.msra.mxu1 %v7336_v7  ;;  %v7354_v20 = vld [vmem:[%s8897_s22 + $0x5f0] ss:$40 sps:$4 sm:$0xff]   ;;  %v7358_v21 = vld [vmem:[%s8897_s22 + $0x5a4] ss:$40 sps:$4 sm:$0xff]   ;;  %v7357_v22 = vld [vmem:[%s8897_s22 + $0xa0] ss:$40 sps:$4 sm:$0xff]  }
  0x56   : > { %5228 = vmatprep.subr.bf16.mxu1 %v7340_v10  ;;  %v7361_v23 = vld [vmem:[%s8897_s22 + $0x54] ss:$40 sps:$4 sm:$0xff]   ;;  %v7360_v24 = vld [vmem:[%s8897_s22 + $0x5a0] ss:$40 sps:$4 sm:$0xff]   ;;  %v7363_v26 = vld [vmem:[%s8897_s22 + $0x50] ss:$40 sps:$4 sm:$0xff]  }
  0x57   : > { %v7364_v25 = vld [vmem:[%s8897_s22 + $0x554] ss:$40 sps:$4 sm:$0xff]   ;;  %v7367_v27 = vld [vmem:[%s8897_s22 + $0x4] ss:$40 sps:$4 sm:$0xff]   ;;  %v7366_v28 = vld [vmem:[%s8897_s22 + $0x550] ss:$40 sps:$4 sm:$0xff]  }
  0x58   : > { %5186 = vmatpush1.bf16.msra.mxu0 %v7339_v9  ;;  %v7370_v29 = vld [vmem:[%s8897_s22 + $0x504] ss:$40 sps:$4 sm:$0xff]   ;;  %v7369_v30 = vld [vmem:[%s8897_s22] ss:$40 sps:$4 sm:$0xff]   ;;  %v7373_v31 = vld [vmem:[%s8897_s22 + $0x4b4] ss:$40 sps:$4 sm:$0xff]  }
  0x59   : > { %5187 = vmatprep.subr.bf16.mxu0 %v7343_v11  ;;  %5229 = vmatpush1.bf16.msra.mxu1 %v7342_v12  ;;  %v7372_v32 = vld [vmem:[%s8897_s22 + $0x500] ss:$40 sps:$4 sm:$0xff]   ;;  %v7376_v33 = vld [vmem:[%s8897_s22 + $0x9b4] ss:$40 sps:$4 sm:$0xff]   ;;  %v7375_v34 = vld [vmem:[%s8897_s22 + $0x4b0] ss:$40 sps:$4 sm:$0xff]  }
  0x5a   : > { %5230 = vmatprep.subr.bf16.mxu1 %v7346_v13  ;;  %v7379_v35 = vld [vmem:[%s8897_s22 + $0x464] ss:$40 sps:$4 sm:$0xff]   ;;  %v7378_v36 = vld [vmem:[%s8897_s22 + $0x9b0] ss:$40 sps:$4 sm:$0xff]   ;;  %v7381_v38 = vld [vmem:[%s8897_s22 + $0x460] ss:$40 sps:$4 sm:$0xff]  }
  0x5b   : > { %v7382_v37 = vld [vmem:[%s8897_s22 + $0x964] ss:$40 sps:$4 sm:$0xff]   ;;  %v7385_v39 = vld [vmem:[%s8897_s22 + $0x414] ss:$40 sps:$4 sm:$0xff]   ;;  %v7384_v40 = vld [vmem:[%s8897_s22 + $0x960] ss:$40 sps:$4 sm:$0xff]  }
  0x5c   : > { %5188 = vmatpush1.bf16.msra.mxu0 %v7345_v14  ;;  %v7388_v41 = vld [vmem:[%s8897_s22 + $0x914] ss:$40 sps:$4 sm:$0xff]   ;;  %v7387_v42 = vld [vmem:[%s8897_s22 + $0x410] ss:$40 sps:$4 sm:$0xff]   ;;  %v7391_v43 = vld [vmem:[%s8897_s22 + $0x3c4] ss:$40 sps:$4 sm:$0xff]  }
  0x5d   : > { %5189 = vmatprep.subr.bf16.mxu0 %v7349_v15  ;;  %5231 = vmatpush1.bf16.msra.mxu1 %v7348_v16  ;;  %v7390_v44 = vld [vmem:[%s8897_s22 + $0x910] ss:$40 sps:$4 sm:$0xff]   ;;  %v7394_v45 = vld [vmem:[%s8897_s22 + $0x8c4] ss:$40 sps:$4 sm:$0xff]   ;;  %v7393_v46 = vld [vmem:[%s8897_s22 + $0x3c0] ss:$40 sps:$4 sm:$0xff]  }
  0x5e   : > { %5232 = vmatprep.subr.bf16.mxu1 %v7352_v17  ;;  %v8950_v47 = vld [vmem:[#allocation2 + $0x4] ss:$40 sps:$4 sm:$0xff]   ;;  %v7396_v49 = vld [vmem:[%s8897_s22 + $0x8c0] ss:$40 sps:$4 sm:$0xff]   ;;  %v7399_v52 = vld [vmem:[%s8897_s22 + $0x370] ss:$40 sps:$4 sm:$0xff]  }
  0x5f   : > { %v7397_v48 = vld [vmem:[%s8897_s22 + $0x374] ss:$40 sps:$4 sm:$0xff]   ;;  %5213 = vmatprep.mubr.bf16.mxu0 %v8950_v47  ;;  %v7403_v53 = vld [vmem:[%s8897_s22 + $0x324] ss:$40 sps:$4 sm:$0xff]   ;;  %v7402_v54 = vld [vmem:[%s8897_s22 + $0x870] ss:$40 sps:$4 sm:$0xff]  }
  0x60   : > { %5190 = vmatpush1.bf16.msra.mxu0 %v7351_v18  ;;  %v7400_v50 = vld [vmem:[%s8897_s22 + $0x874] ss:$40 sps:$4 sm:$0xff]   ;;  %v7406_v55 = vld [vmem:[%s8897_s22 + $0x824] ss:$40 sps:$4 sm:$0xff]   ;;  %v7405_v56 = vld [vmem:[%s8897_s22 + $0x320] ss:$40 sps:$4 sm:$0xff]  }
  0x61   : > { %5191 = vmatprep.subr.bf16.mxu0 %v7355_v19  ;;  %5233 = vmatpush1.bf16.msra.mxu1 %v7354_v20  ;;  %v7427_v51 = vld [vmem:[#allocation2 + $0xc] ss:$40 sps:$4 sm:$0xff]   ;;  %v7408_v58 = vld [vmem:[%s8897_s22 + $0x820] ss:$40 sps:$4 sm:$0xff]   ;;  %v7411_v60 = vld [vmem:[%s8897_s22 + $0x2d0] ss:$40 sps:$4 sm:$0xff]  }
  0x62   : > { %5234 = vmatprep.subr.bf16.mxu1 %v7358_v21  ;;  %5256 = vmatprep.mubr.bf16.mxu1 %v7427_v51  ;;  %v7409_v57 = vld [vmem:[%s8897_s22 + $0x2d4] ss:$40 sps:$4 sm:$0xff]   ;;  %v7415_v61 = vld [vmem:[%s8897_s22 + $0x284] ss:$40 sps:$4 sm:$0xff]   ;;  %v7414_v62 = vld [vmem:[%s8897_s22 + $0x7d0] ss:$40 sps:$4 sm:$0xff]  }
  0x63   : > { %v7412_v59 = vld [vmem:[%s8897_s22 + $0x7d4] ss:$40 sps:$4 sm:$0xff]   ;;  %v7418_v63 = vld [vmem:[%s8897_s22 + $0x784] ss:$40 sps:$4 sm:$0xff]   ;;  %v7417_v0 = vld [vmem:[%s8897_s22 + $0x280] ss:$40 sps:$4 sm:$0xff]  }
  0x64   : > { %5192 = vmatpush1.bf16.msra.mxu0 %v7357_v22  ;;  %v7426_v1 = vld [vmem:[%s8897_s22 + $0xc34] ss:$40 sps:$4 sm:$0xff]   ;;  %v7422_v2 = vld [vmem:[%s8897_s22 + $0x780] ss:$40 sps:$4 sm:$0xff]   ;;  %v8971_v3 = vld [vmem:[#allocation2] ss:$40 sps:$4 sm:$0xff]  }
  0x65   : > { %5193 = vmatprep.subr.bf16.mxu0 %v7361_v23  ;;  %5235 = vmatpush1.bf16.msra.mxu1 %v7360_v24  ;;  %v7432_v4 = vld [vmem:[%s8897_s22 + $0x1134] ss:$40 sps:$4 sm:$0xff]   ;;  %v7424_v5 = vld [vmem:[%s8897_s22 + $0xc30] ss:$40 sps:$4 sm:$0xff]   ;;  %v7435_v7 = vld [vmem:[%s8897_s22 + $0xbe4] ss:$40 sps:$4 sm:$0xff]  }
  0x66   : > { %5236 = vmatprep.subr.bf16.mxu1 %v7364_v25  ;;  %v7429_v6 = vld [vmem:[#allocation2 + $0x8] ss:$40 sps:$4 sm:$0xff]   ;;  %v7438_v9 = vld [vmem:[%s8897_s22 + $0x10e4] ss:$40 sps:$4 sm:$0xff]   ;;  %v7441_v11 = vld [vmem:[%s8897_s22 + $0xb94] ss:$40 sps:$4 sm:$0xff]  }
  0x67   : > { %v7430_v8 = vld [vmem:[%s8897_s22 + $0x1130] ss:$40 sps:$4 sm:$0xff]   ;;  %v7433_v10 = vld [vmem:[%s8897_s22 + $0xbe0] ss:$40 sps:$4 sm:$0xff]   ;;  %v7444_v13 = vld [vmem:[%s8897_s22 + $0x1094] ss:$40 sps:$4 sm:$0xff]  }
  0x68   : > { %5194 = vmatpush1.bf16.msra.mxu0 %v7363_v26  ;;  %v7436_v12 = vld [vmem:[%s8897_s22 + $0x10e0] ss:$40 sps:$4 sm:$0xff]   ;;  %v7439_v14 = vld [vmem:[%s8897_s22 + $0xb90] ss:$40 sps:$4 sm:$0xff]   ;;  %v7447_v15 = vld [vmem:[%s8897_s22 + $0xb44] ss:$40 sps:$4 sm:$0xff]  }
  0x69   : > { %5195 = vmatprep.subr.bf16.mxu0 %v7367_v27  ;;  %5237 = vmatpush1.bf16.msra.mxu1 %v7366_v28  ;;  %v7442_v16 = vld [vmem:[%s8897_s22 + $0x1090] ss:$40 sps:$4 sm:$0xff]   ;;  %v7450_v17 = vld [vmem:[%s8897_s22 + $0x1044] ss:$40 sps:$4 sm:$0xff]   ;;  %v7445_v18 = vld [vmem:[%s8897_s22 + $0xb40] ss:$40 sps:$4 sm:$0xff]  }
  0x6a   : > { %5238 = vmatprep.subr.bf16.mxu1 %v7370_v29  ;;  %v7453_v19 = vld [vmem:[%s8897_s22 + $0xaf4] ss:$40 sps:$4 sm:$0xff]   ;;  %v7448_v20 = vld [vmem:[%s8897_s22 + $0x1040] ss:$40 sps:$4 sm:$0xff]   ;;  %v7451_v22 = vld [vmem:[%s8897_s22 + $0xaf0] ss:$40 sps:$4 sm:$0xff]  }
  0x6b   : > { %v7456_v21 = vld [vmem:[%s8897_s22 + $0xff4] ss:$40 sps:$4 sm:$0xff]   ;;  %v7459_v23 = vld [vmem:[%s8897_s22 + $0xaa4] ss:$40 sps:$4 sm:$0xff]   ;;  %v7454_v24 = vld [vmem:[%s8897_s22 + $0xff0] ss:$40 sps:$4 sm:$0xff]  }
  0x6c   : > { %5196 = vmatpush1.bf16.msra.mxu0 %v7369_v30  ;;  %v7462_v25 = vld [vmem:[%s8897_s22 + $0xfa4] ss:$40 sps:$4 sm:$0xff]   ;;  %v7457_v26 = vld [vmem:[%s8897_s22 + $0xaa0] ss:$40 sps:$4 sm:$0xff]   ;;  %v7465_v27 = vld [vmem:[%s8897_s22 + $0xa54] ss:$40 sps:$4 sm:$0xff]  }
  0x6d   : > { %5197 = vmatprep.subr.bf16.mxu0 %v7373_v31  ;;  %5239 = vmatpush1.bf16.msra.mxu1 %v7372_v32  ;;  %v7460_v28 = vld [vmem:[%s8897_s22 + $0xfa0] ss:$40 sps:$4 sm:$0xff]   ;;  %v7468_v29 = vld [vmem:[%s8897_s22 + $0xf54] ss:$40 sps:$4 sm:$0xff]   ;;  %v7463_v30 = vld [vmem:[%s8897_s22 + $0xa50] ss:$40 sps:$4 sm:$0xff]  }
  0x6e   : > { %5240 = vmatprep.subr.bf16.mxu1 %v7376_v33  ;;  %v7471_v31 = vld [vmem:[%s8897_s22 + $0xa04] ss:$40 sps:$4 sm:$0xff]   ;;  %v7466_v33 = vld [vmem:[%s8897_s22 + $0xf50] ss:$40 sps:$4 sm:$0xff]   ;;  %s9303_s20 = scalar_lea.vmem [#allocation7], %s7239_s5  ;;  %s7240_s24 = smul.u32 160, %s8894_s19 }
  0x6f   : > { %v9001_v32 = vld [vmem:[#allocation2 + $0x14] ss:$40 sps:$4 sm:$0xff]   ;;  %v7490_v51 = vld [vmem:[%s8897_s22 + $0x1310] ss:$40 sps:$4 sm:$0xff]   ;;  %s7235_s8 = smul.u32 1280, %s8723_s15  ;;  %s6277_s15 = scalar_lea.sflag [#allocation4], %s8894_s19 }
  0x70   : > { %5198 = vmatpush2.bf16.msra.mxu0 %v7375_v34  ;;  %v7474_v34 = vld [vmem:[%s8897_s22 + $0xf04] ss:$40 sps:$4 sm:$0xff]   ;;  %s9344_s29 = scalar_lea.vmem [#allocation8], %s7240_s24  ;;  %p9898_p13 = scmp.ne.s32.totalorder %s9891_s25, 0 }
  0x71   : > { %5199 = vmatprep.subr.bf16.mxu0 %v7379_v35  ;;  %5241 = vmatpush2.bf16.msra.mxu1 %v7378_v36  ;;  %v7469_v35 = vld [vmem:[%s8897_s22 + $0xa00] ss:$40 sps:$4 sm:$0xff]   ;;  %v7529_v36 = vld [vmem:[#allocation2 + $0x1c] ss:$40 sps:$4 sm:$0xff]   ;;  %s6293_s21 = sshll.u32 %s9344_s29, 4  ;;  %s9830_s6 = scalar_lea.hbm %s9884_s3, %s7235_s8  ;;  %s9832_s21 = int_to_ptr.vmem [resolvable:$true] %s6293_s21 }
  0x72   : > { %5242 = vmatprep.subr.bf16.mxu1 %v7382_v37  ;;  %v7477_v37 = vld [vmem:[%s8897_s22 + $0xeb4] ss:$40 sps:$4 sm:$0xff]   ;;  %s8647_s7 = scalar_lea.vmem %s9832_s21, 2560  ;;  %s8739_s9 = smov [#allocation8]  }
  0x73   : > { %p8648_p8 = scmp.ne.s32.totalorder %s9832_s21, %s8647_s7  ;;  %s8651_s10 = sshll.u32 %s8739_s9, 4  ;;  %s8652_s10 = int_to_ptr.vmem [resolvable:$false] %s8651_s10 }
  0x74   : > { %5200 = vmatpush2.bf16.msra.mxu0 %v7381_v38  ;;  %v7472_v38 = vld [vmem:[%s8897_s22 + $0xf00] ss:$40 sps:$4 sm:$0xff]   ;;  %s8653_s11 = scalar_lea.vmem %s8652_s10, 5120  ;;  %p8654_p12 = scmp.lt.s32.totalorder %s9832_s21, %s8652_s10 }
  0x75   : > { %5201 = vmatprep.subr.bf16.mxu0 %v7385_v39  ;;  %5243 = vmatpush2.bf16.msra.mxu1 %v7384_v40  ;;  %v7480_v39 = vld [vmem:[%s8897_s22 + $0x13b4] ss:$40 sps:$4 sm:$0xff]   ;;  %v7475_v40 = vld [vmem:[%s8897_s22 + $0xeb0] ss:$40 sps:$4 sm:$0xff]   ;;  %p8649_p5 = pnand %p8648_p8, %p9898_p13  ;;  %p8655_p0 = scmp.lt.s32.totalorder %s8653_s11, %s8647_s7 }
  0x76   : > { %5244 = vmatprep.subr.bf16.mxu1 %v7388_v41  ;;  %v7483_v41 = vld [vmem:[%s8897_s22 + $0xe64] ss:$40 sps:$4 sm:$0xff]  }
  0x77   : > { %p8650_p9 = pneg %p8649_p5  ;;  %p8656_p2 = por %p8655_p0, %p8654_p12 }
  0x78   : > { %5202 = vmatpush2.bf16.msra.mxu0 %v7387_v42  ;;  %v7478_v42 = vld [vmem:[%s8897_s22 + $0x13b0] ss:$40 sps:$4 sm:$0xff]  }
  0x79   : > { %5203 = vmatprep.subr.bf16.mxu0 %v7391_v43  ;;  %5245 = vmatpush2.bf16.msra.mxu1 %v7390_v44  ;;  %v7486_v43 = vld [vmem:[%s8897_s22 + $0x1364] ss:$40 sps:$4 sm:$0xff]   ;;  %v7481_v44 = vld [vmem:[%s8897_s22 + $0xe60] ss:$40 sps:$4 sm:$0xff]   ;;  %p8657_p7 = pnand %p8656_p2, %p8650_p9 }
  0x7a   : > { %5246 = vmatprep.subr.bf16.mxu1 %v7394_v45  ;;  %v7489_v45 = vld [vmem:[%s8897_s22 + $0xe14] ss:$40 sps:$4 sm:$0xff]  }
  0x7c   : > { %5204 = vmatpush2.bf16.msra.mxu0 %v7393_v46  ;;  %v7484_v46 = vld [vmem:[%s8897_s22 + $0x1360] ss:$40 sps:$4 sm:$0xff]  }
  0x7d   : > { %5205 = vmatprep.subr.bf16.mxu0 %v7397_v48  ;;  %5247 = vmatpush2.bf16.msra.mxu1 %v7396_v49  ;;  %v7492_v48 = vld [vmem:[%s8897_s22 + $0x1314] ss:$40 sps:$4 sm:$0xff]   ;;  %v7487_v49 = vld [vmem:[%s8897_s22 + $0xe10] ss:$40 sps:$4 sm:$0xff]  }
  0x7e   : > { %5248 = vmatprep.subr.bf16.mxu1 %v7400_v50  ;;  %v7495_v50 = vld [vmem:[%s8897_s22 + $0xdc4] ss:$40 sps:$4 sm:$0xff]  }
  0x80   : > { %5206 = vmatpush2.bf16.msra.mxu0 %v7399_v52  ;;  %v7498_v52 = vld [vmem:[%s8897_s22 + $0x12c4] ss:$40 sps:$4 sm:$0xff]  }
  0x81   : > { %5207 = vmatprep.subr.bf16.mxu0 %v7403_v53  ;;  %5249 = vmatpush2.bf16.msra.mxu1 %v7402_v54  ;;  %v7493_v53 = vld [vmem:[%s8897_s22 + $0xdc0] ss:$40 sps:$4 sm:$0xff]   ;;  %v7501_v54 = vld [vmem:[%s8897_s22 + $0xd74] ss:$40 sps:$4 sm:$0xff]  }
  0x82   : > { %5250 = vmatprep.subr.bf16.mxu1 %v7406_v55  ;;  %v7496_v55 = vld [vmem:[%s8897_s22 + $0x12c0] ss:$40 sps:$4 sm:$0xff]  }
  0x84   : > { %5208 = vmatpush2.bf16.msra.mxu0 %v7405_v56  ;;  %v7504_v56 = vld [vmem:[%s8897_s22 + $0x1274] ss:$40 sps:$4 sm:$0xff]  }
  0x85   : > { %5209 = vmatprep.subr.bf16.mxu0 %v7409_v57  ;;  %5251 = vmatpush2.bf16.msra.mxu1 %v7408_v58  ;;  %v7499_v57 = vld [vmem:[%s8897_s22 + $0xd70] ss:$40 sps:$4 sm:$0xff]   ;;  %v7507_v58 = vld [vmem:[%s8897_s22 + $0xd24] ss:$40 sps:$4 sm:$0xff]  }
  0x86   : > { %5252 = vmatprep.subr.bf16.mxu1 %v7412_v59  ;;  %v7502_v59 = vld [vmem:[%s8897_s22 + $0x1270] ss:$40 sps:$4 sm:$0xff]  }
  0x88   : > { %5210 = vmatpush2.bf16.msra.mxu0 %v7411_v60  ;;  %v7510_v60 = vld [vmem:[%s8897_s22 + $0x1224] ss:$40 sps:$4 sm:$0xff]  }
  0x89   : > { %5211 = vmatprep.subr.bf16.mxu0 %v7415_v61  ;;  %5253 = vmatpush2.bf16.msra.mxu1 %v7414_v62  ;;  %v7505_v61 = vld [vmem:[%s8897_s22 + $0xd20] ss:$40 sps:$4 sm:$0xff]   ;;  %v7513_v62 = vld [vmem:[%s8897_s22 + $0xcd4] ss:$40 sps:$4 sm:$0xff]  }
  0x8a   : > { %5254 = vmatprep.subr.bf16.mxu1 %v7418_v63  ;;  %v7508_v63 = vld [vmem:[%s8897_s22 + $0x1220] ss:$40 sps:$4 sm:$0xff]  }
  0x8c   : > { %5212 = vmatpush2.bf16.msra.mxu0 %v7417_v0  ;;  %v7516_v0 = vld [vmem:[%s8897_s22 + $0x11d4] ss:$40 sps:$4 sm:$0xff]  }
  0x8d   : > { %5267 = vmatprep.subr.bf16.mxu0 %v7426_v1  ;;  %5255 = vmatpush2.bf16.msra.mxu1 %v7422_v2  ;;  %v7511_v1 = vld [vmem:[%s8897_s22 + $0xcd0] ss:$40 sps:$4 sm:$0xff]   ;;  %v7519_v2 = vld [vmem:[%s8897_s22 + $0xc84] ss:$40 sps:$4 sm:$0xff]  }
  0x8e   : > { %5310 = vmatprep.subr.bf16.mxu1 %v7432_v4  ;;  %v7514_v4 = vld [vmem:[%s8897_s22 + $0x11d0] ss:$40 sps:$4 sm:$0xff]  }
  0x8f   : > { %5214 = vmatmul.mubr.bf16.vlgmr.msra.gmra.mxu0 %v8971_v3 }
  0x90   : > { %5268 = vmatpush1.bf16.msra.mxu0 %v7424_v5  ;;  %5257 = vmatmul.mubr.bf16.vlgmr.msra.gmra.mxu1 %v7429_v6  ;;  %v7522_v5 = vld [vmem:[%s8897_s22 + $0x1184] ss:$40 sps:$4 sm:$0xff]   ;;  %v7517_v6 = vld [vmem:[%s8897_s22 + $0xc80] ss:$40 sps:$4 sm:$0xff]  }
  0x91   : > { %5269 = vmatprep.subr.bf16.mxu0 %v7435_v7  ;;  %5311 = vmatpush1.bf16.msra.mxu1 %v7430_v8  ;;  %v7528_v7 = vld [vmem:[%s8897_s22 + $0x1634] ss:$40 sps:$4 sm:$0xff]   ;;  %v7520_v8 = vld [vmem:[%s8897_s22 + $0x1180] ss:$40 sps:$4 sm:$0xff]  }
  0x92   : > { %5312 = vmatprep.subr.bf16.mxu1 %v7438_v9  ;;  %5299 = vmatprep.mubr.bf16.mxu0 %v9001_v32  ;;  %v9041_v9 = vld [vmem:[#allocation2 + $0x10] ss:$40 sps:$4 sm:$0xff]  }
  0x93   : > { %5342 = vmatprep.mubr.bf16.mxu1 %v7529_v36  ;;  %v7570_v36 = vld [vmem:[%s8897_s22 + $0x5c] ss:$40 sps:$4 sm:$0xff]  }
  0x94   : > { %5270 = vmatpush1.bf16.msra.mxu0 %v7433_v10  ;;  %v7534_v10 = vld [vmem:[%s8897_s22 + $0x23c] ss:$40 sps:$4 sm:$0xff]  }
  0x95   : > { %5271 = vmatprep.subr.bf16.mxu0 %v7441_v11  ;;  %5313 = vmatpush1.bf16.msra.mxu1 %v7436_v12  ;;  %v7526_v11 = vld [vmem:[%s8897_s22 + $0x1630] ss:$40 sps:$4 sm:$0xff]  }
  0x96   : > { %5314 = vmatprep.subr.bf16.mxu1 %v7444_v13  ;;  %v7531_v12 = vld [vmem:[#allocation2 + $0x18] ss:$40 sps:$4 sm:$0xff]   ;;  %v7537_v13 = vld [vmem:[%s8897_s22 + $0x15e4] ss:$40 sps:$4 sm:$0xff]  }
  0x98   : > { %5272 = vmatpush1.bf16.msra.mxu0 %v7439_v14  ;;  %v7532_v14 = vld [vmem:[%s8897_s22 + $0x238] ss:$40 sps:$4 sm:$0xff]  }
  0x99   : > { %5273 = vmatprep.subr.bf16.mxu0 %v7447_v15  ;;  %5315 = vmatpush1.bf16.msra.mxu1 %v7442_v16  ;;  %v7540_v15 = vld [vmem:[%s8897_s22 + $0x1ec] ss:$40 sps:$4 sm:$0xff]   ;;  %v7535_v16 = vld [vmem:[%s8897_s22 + $0x15e0] ss:$40 sps:$4 sm:$0xff]  }
  0x9a   : > { %5316 = vmatprep.subr.bf16.mxu1 %v7450_v17  ;;  %v7543_v17 = vld [vmem:[%s8897_s22 + $0x1594] ss:$40 sps:$4 sm:$0xff]  }
  0x9c   : > { %5274 = vmatpush1.bf16.msra.mxu0 %v7445_v18  ;;  %v7538_v18 = vld [vmem:[%s8897_s22 + $0x1e8] ss:$40 sps:$4 sm:$0xff]  }
  0x9d   : > { %5275 = vmatprep.subr.bf16.mxu0 %v7453_v19  ;;  %5317 = vmatpush1.bf16.msra.mxu1 %v7448_v20  ;;  %v7546_v19 = vld [vmem:[%s8897_s22 + $0x19c] ss:$40 sps:$4 sm:$0xff]  }
  0x9e   : > { %5318 = vmatprep.subr.bf16.mxu1 %v7456_v21  ;;  %v9054_v20 = vld [vmem:[#allocation2 + $0x24] ss:$40 sps:$4 sm:$0xff]   ;;  %v7541_v21 = vld [vmem:[%s8897_s22 + $0x1590] ss:$40 sps:$4 sm:$0xff]  }
  0xa0   : > { %5276 = vmatpush1.bf16.msra.mxu0 %v7451_v22  ;;  %v7549_v22 = vld [vmem:[%s8897_s22 + $0x1544] ss:$40 sps:$4 sm:$0xff]  }
  0xa1   : > { %5277 = vmatprep.subr.bf16.mxu0 %v7459_v23  ;;  %5319 = vmatpush1.bf16.msra.mxu1 %v7454_v24  ;;  %v7544_v23 = vld [vmem:[%s8897_s22 + $0x198] ss:$40 sps:$4 sm:$0xff]  }
  0xa2   : > { %5320 = vmatprep.subr.bf16.mxu1 %v7462_v25  ;;  %v7547_v24 = vld [vmem:[%s8897_s22 + $0x1540] ss:$40 sps:$4 sm:$0xff]   ;;  %v7555_v25 = vld [vmem:[%s8897_s22 + $0x14f4] ss:$40 sps:$4 sm:$0xff]  }
  0xa4   : > { %5278 = vmatpush1.bf16.msra.mxu0 %v7457_v26  ;;  %v7550_v26 = vld [vmem:[%s8897_s22 + $0x148] ss:$40 sps:$4 sm:$0xff]  }
  0xa5   : > { %5279 = vmatprep.subr.bf16.mxu0 %v7465_v27  ;;  %5321 = vmatpush1.bf16.msra.mxu1 %v7460_v28  ;;  %v7558_v27 = vld [vmem:[%s8897_s22 + $0xfc] ss:$40 sps:$4 sm:$0xff]   ;;  %v7553_v28 = vld [vmem:[%s8897_s22 + $0x14f0] ss:$40 sps:$4 sm:$0xff]  }
  0xa6   : > { %5322 = vmatprep.subr.bf16.mxu1 %v7468_v29  ;;  %v7561_v29 = vld [vmem:[%s8897_s22 + $0x14a4] ss:$40 sps:$4 sm:$0xff]  }
  0xa8   : > { %5280 = vmatpush1.bf16.msra.mxu0 %v7463_v30  ;;  %v7556_v30 = vld [vmem:[%s8897_s22 + $0xf8] ss:$40 sps:$4 sm:$0xff]  }
  0xa9   : > { %5281 = vmatprep.subr.bf16.mxu0 %v7471_v31  ;;  %5323 = vmatpush1.bf16.msra.mxu1 %v7466_v33  ;;  %v7564_v31 = vld [vmem:[%s8897_s22 + $0xac] ss:$40 sps:$4 sm:$0xff]   ;;  %v7559_v33 = vld [vmem:[%s8897_s22 + $0x14a0] ss:$40 sps:$4 sm:$0xff]  }
  0xaa   : > { %5324 = vmatprep.subr.bf16.mxu1 %v7474_v34  ;;  %v7567_v34 = vld [vmem:[%s8897_s22 + $0x1454] ss:$40 sps:$4 sm:$0xff]  }
  0xac   : > { %5282 = vmatpush1.bf16.msra.mxu0 %v7469_v35  ;;  %v7562_v35 = vld [vmem:[%s8897_s22 + $0xa8] ss:$40 sps:$4 sm:$0xff]  }
  0xad   : > { %5283 = vmatprep.subr.bf16.mxu0 %v7477_v37  ;;  %5325 = vmatpush1.bf16.msra.mxu1 %v7472_v38  ;;  %v7565_v37 = vld [vmem:[%s8897_s22 + $0x1450] ss:$40 sps:$4 sm:$0xff]   ;;  %v7573_v38 = vld [vmem:[%s8897_s22 + $0x1404] ss:$40 sps:$4 sm:$0xff]  }
  0xae   : > { %5326 = vmatprep.subr.bf16.mxu1 %v7480_v39  ;;  %v7568_v39 = vld [vmem:[%s8897_s22 + $0x58] ss:$40 sps:$4 sm:$0xff]  }
  0xb0   : > { %5284 = vmatpush2.bf16.msra.mxu0 %v7475_v40  ;;  %v7576_v40 = vld [vmem:[%s8897_s22 + $0xc] ss:$40 sps:$4 sm:$0xff]  }
  0xb1   : > { %5285 = vmatprep.subr.bf16.mxu0 %v7483_v41  ;;  %5327 = vmatpush2.bf16.msra.mxu1 %v7478_v42  ;;  %v7571_v41 = vld [vmem:[%s8897_s22 + $0x1400] ss:$40 sps:$4 sm:$0xff]   ;;  %v7579_v42 = vld [vmem:[%s8897_s22 + $0x18b4] ss:$40 sps:$4 sm:$0xff]  }
  0xb2   : > { %5328 = vmatprep.subr.bf16.mxu1 %v7486_v43  ;;  %v7574_v43 = vld [vmem:[%s8897_s22 + $0x8] ss:$40 sps:$4 sm:$0xff]  }
  0xb4   : > { %5286 = vmatpush2.bf16.msra.mxu0 %v7481_v44  ;;  %v7582_v44 = vld [vmem:[%s8897_s22 + $0x4bc] ss:$40 sps:$4 sm:$0xff]  }
  0xb5   : > { %5287 = vmatprep.subr.bf16.mxu0 %v7489_v45  ;;  %5329 = vmatpush2.bf16.msra.mxu1 %v7484_v46  ;;  %v7577_v45 = vld [vmem:[%s8897_s22 + $0x18b0] ss:$40 sps:$4 sm:$0xff]   ;;  %v7585_v46 = vld [vmem:[%s8897_s22 + $0x1864] ss:$40 sps:$4 sm:$0xff]  }
  0xb6   : > { %5330 = vmatprep.subr.bf16.mxu1 %v7492_v48  ;;  %v7580_v48 = vld [vmem:[%s8897_s22 + $0x4b8] ss:$40 sps:$4 sm:$0xff]  }
  0xb8   : > { %5288 = vmatpush2.bf16.msra.mxu0 %v7487_v49  ;;  %v7588_v49 = vld [vmem:[%s8897_s22 + $0x46c] ss:$40 sps:$4 sm:$0xff]  }
  0xb9   : > { %5289 = vmatprep.subr.bf16.mxu0 %v7495_v50  ;;  %5331 = vmatpush2.bf16.msra.mxu1 %v7490_v51  ;;  %v7583_v50 = vld [vmem:[%s8897_s22 + $0x1860] ss:$40 sps:$4 sm:$0xff]   ;;  %v7591_v51 = vld [vmem:[%s8897_s22 + $0x1814] ss:$40 sps:$4 sm:$0xff]  }
  0xba   : > { %5332 = vmatprep.subr.bf16.mxu1 %v7498_v52  ;;  %v7586_v52 = vld [vmem:[%s8897_s22 + $0x468] ss:$40 sps:$4 sm:$0xff]  }
  0xbc   : > { %5290 = vmatpush2.bf16.msra.mxu0 %v7493_v53  ;;  %v7594_v53 = vld [vmem:[%s8897_s22 + $0x41c] ss:$40 sps:$4 sm:$0xff]  }
  0xbd   : > { %5291 = vmatprep.subr.bf16.mxu0 %v7501_v54  ;;  %5333 = vmatpush2.bf16.msra.mxu1 %v7496_v55  ;;  %v7589_v54 = vld [vmem:[%s8897_s22 + $0x1810] ss:$40 sps:$4 sm:$0xff]   ;;  %v7597_v55 = vld [vmem:[%s8897_s22 + $0x17c4] ss:$40 sps:$4 sm:$0xff]  }
  0xbe   : > { %5334 = vmatprep.subr.bf16.mxu1 %v7504_v56  ;;  %v7592_v56 = vld [vmem:[%s8897_s22 + $0x418] ss:$40 sps:$4 sm:$0xff]  }
  0xc0   : > { %5292 = vmatpush2.bf16.msra.mxu0 %v7499_v57  ;;  %v7600_v57 = vld [vmem:[%s8897_s22 + $0x3cc] ss:$40 sps:$4 sm:$0xff]  }
  0xc1   : > { %5293 = vmatprep.subr.bf16.mxu0 %v7507_v58  ;;  %5335 = vmatpush2.bf16.msra.mxu1 %v7502_v59  ;;  %v7595_v58 = vld [vmem:[%s8897_s22 + $0x17c0] ss:$40 sps:$4 sm:$0xff]   ;;  %v7603_v59 = vld [vmem:[%s8897_s22 + $0x1774] ss:$40 sps:$4 sm:$0xff]  }
  0xc2   : > { %5336 = vmatprep.subr.bf16.mxu1 %v7510_v60  ;;  %v7598_v60 = vld [vmem:[%s8897_s22 + $0x3c8] ss:$40 sps:$4 sm:$0xff]  }
  0xc4   : > { %5294 = vmatpush2.bf16.msra.mxu0 %v7505_v61  ;;  %v7606_v61 = vld [vmem:[%s8897_s22 + $0x37c] ss:$40 sps:$4 sm:$0xff]  }
  0xc5   : > { %5295 = vmatprep.subr.bf16.mxu0 %v7513_v62  ;;  %5337 = vmatpush2.bf16.msra.mxu1 %v7508_v63  ;;  %v7601_v62 = vld [vmem:[%s8897_s22 + $0x1770] ss:$40 sps:$4 sm:$0xff]   ;;  %v7609_v63 = vld [vmem:[%s8897_s22 + $0x1724] ss:$40 sps:$4 sm:$0xff]  }
  0xc6   : > { %5338 = vmatprep.subr.bf16.mxu1 %v7516_v0  ;;  %v7604_v0 = vld [vmem:[%s8897_s22 + $0x378] ss:$40 sps:$4 sm:$0xff]  }
  0xc8   : > { %5296 = vmatpush2.bf16.msra.mxu0 %v7511_v1  ;;  %v7612_v1 = vld [vmem:[%s8897_s22 + $0x32c] ss:$40 sps:$4 sm:$0xff]  }
  0xc9   : > { %5297 = vmatprep.subr.bf16.mxu0 %v7519_v2  ;;  %5339 = vmatpush2.bf16.msra.mxu1 %v7514_v4  ;;  %v7607_v2 = vld [vmem:[%s8897_s22 + $0x1720] ss:$40 sps:$4 sm:$0xff]   ;;  %v7615_v4 = vld [vmem:[%s8897_s22 + $0x16d4] ss:$40 sps:$4 sm:$0xff]  }
  0xca   : > { %5340 = vmatprep.subr.bf16.mxu1 %v7522_v5  ;;  %v7610_v5 = vld [vmem:[%s8897_s22 + $0x328] ss:$40 sps:$4 sm:$0xff]  }
  0xcc   : > { %5298 = vmatpush2.bf16.msra.mxu0 %v7517_v6  ;;  %v7618_v6 = vld [vmem:[%s8897_s22 + $0x2dc] ss:$40 sps:$4 sm:$0xff]  }
  0xcd   : > { %5353 = vmatprep.subr.bf16.mxu0 %v7528_v7  ;;  %5341 = vmatpush2.bf16.msra.mxu1 %v7520_v8  ;;  %v7613_v7 = vld [vmem:[%s8897_s22 + $0x16d0] ss:$40 sps:$4 sm:$0xff]   ;;  %v7621_v8 = vld [vmem:[%s8897_s22 + $0x1684] ss:$40 sps:$4 sm:$0xff]  }
  0xce   : > { %5396 = vmatprep.subr.bf16.mxu1 %v7534_v10  ;;  %v7616_v10 = vld [vmem:[%s8897_s22 + $0x2d8] ss:$40 sps:$4 sm:$0xff]  }
  0xcf   : > { %5300 = vmatmul.mubr.bf16.vlgmr.msra.gmra.mxu0 %v9041_v9 }
  0xd0   : > { %5354 = vmatpush1.bf16.msra.mxu0 %v7526_v11  ;;  %5343 = vmatmul.mubr.bf16.vlgmr.msra.gmra.mxu1 %v7531_v12  ;;  %v7624_v11 = vld [vmem:[%s8897_s22 + $0x28c] ss:$40 sps:$4 sm:$0xff]   ;;  %v7619_v12 = vld [vmem:[%s8897_s22 + $0x1680] ss:$40 sps:$4 sm:$0xff]  }
  0xd1   : > { %5355 = vmatprep.subr.bf16.mxu0 %v7537_v13  ;;  %5397 = vmatpush1.bf16.msra.mxu1 %v7532_v14  ;;  %v7630_v13 = vld [vmem:[%s8897_s22 + $0x73c] ss:$40 sps:$4 sm:$0xff]   ;;  %v7622_v14 = vld [vmem:[%s8897_s22 + $0x288] ss:$40 sps:$4 sm:$0xff]  }
  0xd2   : > { %5428 = vmatprep.mubr.bf16.mxu1 %v8950_v47  ;;  %5398 = vmatprep.subr.bf16.mxu1 %v7540_v15  ;;  %v7552_v47 = vld [vmem:[%s8897_s22 + $0x14c] ss:$40 sps:$4 sm:$0xff]   ;;  %v9112_v15 = vld [vmem:[#allocation2 + $0x20] ss:$40 sps:$4 sm:$0xff]  }
  0xd3   : > { %5385 = vmatprep.mubr.bf16.mxu0 %v9054_v20 }
  0xd4   : > { %5356 = vmatpush1.bf16.msra.mxu0 %v7535_v16  ;;  %v7633_v16 = vld [vmem:[%s8897_s22 + $0xc3c] ss:$40 sps:$4 sm:$0xff]  }
  0xd5   : > { %5357 = vmatprep.subr.bf16.mxu0 %v7543_v17  ;;  %5399 = vmatpush1.bf16.msra.mxu1 %v7538_v18  ;;  %v7628_v17 = vld [vmem:[%s8897_s22 + $0x738] ss:$40 sps:$4 sm:$0xff]   ;;  %v7636_v18 = vld [vmem:[%s8897_s22 + $0x6ec] ss:$40 sps:$4 sm:$0xff]  }
  0xd6   : > { %5400 = vmatprep.subr.bf16.mxu1 %v7546_v19  ;;  %v7631_v19 = vld [vmem:[%s8897_s22 + $0xc38] ss:$40 sps:$4 sm:$0xff]  }
  0xd8   : > { %5358 = vmatpush1.bf16.msra.mxu0 %v7541_v21  ;;  %v7639_v21 = vld [vmem:[%s8897_s22 + $0xbec] ss:$40 sps:$4 sm:$0xff]  }
  0xd9   : > { %5359 = vmatprep.subr.bf16.mxu0 %v7549_v22  ;;  %5401 = vmatpush1.bf16.msra.mxu1 %v7544_v23  ;;  %v7634_v22 = vld [vmem:[%s8897_s22 + $0x6e8] ss:$40 sps:$4 sm:$0xff]   ;;  %v9121_v23 = vld [vmem:[#allocation2 + $0xc] ss:$40 sps:$4 sm:$0xff]  }
  0xda   : > { %5402 = vmatprep.subr.bf16.mxu1 %v7552_v47  ;;  %v7642_v47 = vld [vmem:[%s8897_s22 + $0x69c] ss:$40 sps:$4 sm:$0xff]  }
  0xdc   : > { %5360 = vmatpush1.bf16.msra.mxu0 %v7547_v24  ;;  %v7637_v24 = vld [vmem:[%s8897_s22 + $0xbe8] ss:$40 sps:$4 sm:$0xff]  }
  0xdd   : > { %5361 = vmatprep.subr.bf16.mxu0 %v7555_v25  ;;  %5403 = vmatpush1.bf16.msra.mxu1 %v7550_v26  ;;  %v7645_v25 = vld [vmem:[%s8897_s22 + $0xb9c] ss:$40 sps:$4 sm:$0xff]   ;;  %v7640_v26 = vld [vmem:[%s8897_s22 + $0x698] ss:$40 sps:$4 sm:$0xff]  }
  0xde   : > { %5404 = vmatprep.subr.bf16.mxu1 %v7558_v27  ;;  %v7648_v27 = vld [vmem:[%s8897_s22 + $0x64c] ss:$40 sps:$4 sm:$0xff]  }
  0xe0   : > { %5362 = vmatpush1.bf16.msra.mxu0 %v7553_v28  ;;  %v7651_v28 = vld [vmem:[%s8897_s22 + $0xb4c] ss:$40 sps:$4 sm:$0xff]  }
  0xe1   : > { %5363 = vmatprep.subr.bf16.mxu0 %v7561_v29  ;;  %5405 = vmatpush1.bf16.msra.mxu1 %v7556_v30  ;;  %v7646_v29 = vld [vmem:[%s8897_s22 + $0x648] ss:$40 sps:$4 sm:$0xff]  }
  0xe2   : > { %5406 = vmatprep.subr.bf16.mxu1 %v7564_v31  ;;  %v7649_v30 = vld [vmem:[%s8897_s22 + $0xb48] ss:$40 sps:$4 sm:$0xff]   ;;  %v7657_v31 = vld [vmem:[%s8897_s22 + $0xafc] ss:$40 sps:$4 sm:$0xff]  }
  0xe4   : > { %5364 = vmatpush1.bf16.msra.mxu0 %v7559_v33  ;;  %v7652_v33 = vld [vmem:[%s8897_s22 + $0x5f8] ss:$40 sps:$4 sm:$0xff]  }
  0xe5   : > { %5365 = vmatprep.subr.bf16.mxu0 %v7567_v34  ;;  %5407 = vmatpush1.bf16.msra.mxu1 %v7562_v35  ;;  %v7660_v34 = vld [vmem:[%s8897_s22 + $0x5ac] ss:$40 sps:$4 sm:$0xff]   ;;  %v7655_v35 = vld [vmem:[%s8897_s22 + $0xaf8] ss:$40 sps:$4 sm:$0xff]  }
  0xe6   : > { %5408 = vmatprep.subr.bf16.mxu1 %v7570_v36  ;;  %v7663_v36 = vld [vmem:[%s8897_s22 + $0xaac] ss:$40 sps:$4 sm:$0xff]  }
  0xe8   : > { %5366 = vmatpush1.bf16.msra.mxu0 %v7565_v37  ;;  %v7658_v37 = vld [vmem:[%s8897_s22 + $0x5a8] ss:$40 sps:$4 sm:$0xff]  }
  0xe9   : > { %5367 = vmatprep.subr.bf16.mxu0 %v7573_v38  ;;  %5409 = vmatpush1.bf16.msra.mxu1 %v7568_v39  ;;  %v7666_v38 = vld [vmem:[%s8897_s22 + $0x55c] ss:$40 sps:$4 sm:$0xff]   ;;  %v7661_v39 = vld [vmem:[%s8897_s22 + $0xaa8] ss:$40 sps:$4 sm:$0xff]  }
  0xea   : > { %5410 = vmatprep.subr.bf16.mxu1 %v7576_v40  ;;  %v7669_v40 = vld [vmem:[%s8897_s22 + $0xa5c] ss:$40 sps:$4 sm:$0xff]  }
  0xec   : > { %5368 = vmatpush1.bf16.msra.mxu0 %v7571_v41  ;;  %v7664_v41 = vld [vmem:[%s8897_s22 + $0x558] ss:$40 sps:$4 sm:$0xff]  }
  0xed   : > { %5369 = vmatprep.subr.bf16.mxu0 %v7579_v42  ;;  %5411 = vmatpush1.bf16.msra.mxu1 %v7574_v43  ;;  %v7672_v42 = vld [vmem:[%s8897_s22 + $0x50c] ss:$40 sps:$4 sm:$0xff]   ;;  %v7667_v43 = vld [vmem:[%s8897_s22 + $0xa58] ss:$40 sps:$4 sm:$0xff]  }
  0xee   : > { %5412 = vmatprep.subr.bf16.mxu1 %v7582_v44  ;;  %v7675_v44 = vld [vmem:[%s8897_s22 + $0xa0c] ss:$40 sps:$4 sm:$0xff]  }
  0xf0   : > { %5370 = vmatpush2.bf16.msra.mxu0 %v7577_v45  ;;  %v7670_v45 = vld [vmem:[%s8897_s22 + $0x508] ss:$40 sps:$4 sm:$0xff]  }
  0xf1   : > { %5371 = vmatprep.subr.bf16.mxu0 %v7585_v46  ;;  %5413 = vmatpush2.bf16.msra.mxu1 %v7580_v48  ;;  %v7678_v46 = vld [vmem:[%s8897_s22 + $0x9bc] ss:$40 sps:$4 sm:$0xff]   ;;  %v7673_v48 = vld [vmem:[%s8897_s22 + $0xa08] ss:$40 sps:$4 sm:$0xff]  }
  0xf2   : > { %5414 = vmatprep.subr.bf16.mxu1 %v7588_v49  ;;  %v7681_v49 = vld [vmem:[%s8897_s22 + $0xebc] ss:$40 sps:$4 sm:$0xff]  }
  0xf4   : > { %5372 = vmatpush2.bf16.msra.mxu0 %v7583_v50  ;;  %v7676_v50 = vld [vmem:[%s8897_s22 + $0x9b8] ss:$40 sps:$4 sm:$0xff]  }
  0xf5   : > { %5373 = vmatprep.subr.bf16.mxu0 %v7591_v51  ;;  %5415 = vmatpush2.bf16.msra.mxu1 %v7586_v52  ;;  %v7684_v51 = vld [vmem:[%s8897_s22 + $0x96c] ss:$40 sps:$4 sm:$0xff]   ;;  %v7679_v52 = vld [vmem:[%s8897_s22 + $0xeb8] ss:$40 sps:$4 sm:$0xff]  }
  0xf6   : > { %5416 = vmatprep.subr.bf16.mxu1 %v7594_v53  ;;  %v7687_v53 = vld [vmem:[%s8897_s22 + $0xe6c] ss:$40 sps:$4 sm:$0xff]  }
  0xf8   : > { %5374 = vmatpush2.bf16.msra.mxu0 %v7589_v54  ;;  %v7682_v54 = vld [vmem:[%s8897_s22 + $0x968] ss:$40 sps:$4 sm:$0xff]  }
  0xf9   : > { %5375 = vmatprep.subr.bf16.mxu0 %v7597_v55  ;;  %5417 = vmatpush2.bf16.msra.mxu1 %v7592_v56  ;;  %v7690_v55 = vld [vmem:[%s8897_s22 + $0x91c] ss:$40 sps:$4 sm:$0xff]   ;;  %v7685_v56 = vld [vmem:[%s8897_s22 + $0xe68] ss:$40 sps:$4 sm:$0xff]  }
  0xfa   : > { %5418 = vmatprep.subr.bf16.mxu1 %v7600_v57  ;;  %v7693_v57 = vld [vmem:[%s8897_s22 + $0xe1c] ss:$40 sps:$4 sm:$0xff]  }
  0xfc   : > { %5376 = vmatpush2.bf16.msra.mxu0 %v7595_v58  ;;  %v7688_v58 = vld [vmem:[%s8897_s22 + $0x918] ss:$40 sps:$4 sm:$0xff]  }
  0xfd   : > { %5377 = vmatprep.subr.bf16.mxu0 %v7603_v59  ;;  %5419 = vmatpush2.bf16.msra.mxu1 %v7598_v60  ;;  %v7696_v59 = vld [vmem:[%s8897_s22 + $0x8cc] ss:$40 sps:$4 sm:$0xff]   ;;  %v7691_v60 = vld [vmem:[%s8897_s22 + $0xe18] ss:$40 sps:$4 sm:$0xff]  }
  0xfe   : > { %5420 = vmatprep.subr.bf16.mxu1 %v7606_v61  ;;  %v7699_v61 = vld [vmem:[%s8897_s22 + $0xdcc] ss:$40 sps:$4 sm:$0xff]  }
 0x100   : > { %5378 = vmatpush2.bf16.msra.mxu0 %v7601_v62  ;;  %v7694_v62 = vld [vmem:[%s8897_s22 + $0x8c8] ss:$40 sps:$4 sm:$0xff]  }
 0x101   : > { %5379 = vmatprep.subr.bf16.mxu0 %v7609_v63  ;;  %5421 = vmatpush2.bf16.msra.mxu1 %v7604_v0  ;;  %v7702_v63 = vld [vmem:[%s8897_s22 + $0x87c] ss:$40 sps:$4 sm:$0xff]   ;;  %v7697_v0 = vld [vmem:[%s8897_s22 + $0xdc8] ss:$40 sps:$4 sm:$0xff]  }
 0x102   : > { %5422 = vmatprep.subr.bf16.mxu1 %v7612_v1  ;;  %v7705_v1 = vld [vmem:[%s8897_s22 + $0xd7c] ss:$40 sps:$4 sm:$0xff]  }
 0x104   : > { %5380 = vmatpush2.bf16.msra.mxu0 %v7607_v2  ;;  %v7700_v2 = vld [vmem:[%s8897_s22 + $0x878] ss:$40 sps:$4 sm:$0xff]  }
 0x105   : > { %5381 = vmatprep.subr.bf16.mxu0 %v7615_v4  ;;  %5423 = vmatpush2.bf16.msra.mxu1 %v7610_v5  ;;  %v7708_v4 = vld [vmem:[%s8897_s22 + $0x82c] ss:$40 sps:$4 sm:$0xff]   ;;  %v7703_v5 = vld [vmem:[%s8897_s22 + $0xd78] ss:$40 sps:$4 sm:$0xff]  }
 0x106   : > { %5424 = vmatprep.subr.bf16.mxu1 %v7618_v6  ;;  %v7711_v6 = vld [vmem:[%s8897_s22 + $0xd2c] ss:$40 sps:$4 sm:$0xff]  }
 0x108   : > { %5382 = vmatpush2.bf16.msra.mxu0 %v7613_v7  ;;  %v7706_v7 = vld [vmem:[%s8897_s22 + $0x828] ss:$40 sps:$4 sm:$0xff]  }
 0x109   : > { %5383 = vmatprep.subr.bf16.mxu0 %v7621_v8  ;;  %5425 = vmatpush2.bf16.msra.mxu1 %v7616_v10  ;;  %v7714_v8 = vld [vmem:[%s8897_s22 + $0x7dc] ss:$40 sps:$4 sm:$0xff]   ;;  %v7709_v10 = vld [vmem:[%s8897_s22 + $0xd28] ss:$40 sps:$4 sm:$0xff]  }
 0x10a   : > { %5426 = vmatprep.subr.bf16.mxu1 %v7624_v11  ;;  %v7717_v11 = vld [vmem:[%s8897_s22 + $0xcdc] ss:$40 sps:$4 sm:$0xff]  }
 0x10c   : > { %5384 = vmatpush2.bf16.msra.mxu0 %v7619_v12  ;;  %v7712_v12 = vld [vmem:[%s8897_s22 + $0x7d8] ss:$40 sps:$4 sm:$0xff]  }
 0x10d   : > { %5439 = vmatprep.subr.bf16.mxu0 %v7630_v13  ;;  %5427 = vmatpush2.bf16.msra.mxu1 %v7622_v14  ;;  %v7720_v13 = vld [vmem:[%s8897_s22 + $0x78c] ss:$40 sps:$4 sm:$0xff]   ;;  %v7715_v14 = vld [vmem:[%s8897_s22 + $0xcd8] ss:$40 sps:$4 sm:$0xff]  }
 0x10e   : > { %5482 = vmatprep.subr.bf16.mxu1 %v7633_v16  ;;  %v7723_v16 = vld [vmem:[%s8897_s22 + $0xc8c] ss:$40 sps:$4 sm:$0xff]  }
 0x10f   : > { %5386 = vmatmul.mubr.bf16.vlgmr.msra.gmra.mxu0 %v9112_v15 }
 0x110   : > { %5440 = vmatpush1.bf16.msra.mxu0 %v7628_v17  ;;  %5471 = vmatprep.mubr.bf16.mxu0 %v9121_v23  ;;  %v7718_v17 = vld [vmem:[%s8897_s22 + $0x788] ss:$40 sps:$4 sm:$0xff]  }
 0x111   : > { %5429 = vmatmul.mubr.bf16.vlgmr.msra.gmra.mxu1 %v8971_v3  ;;  %5441 = vmatprep.subr.bf16.mxu0 %v7636_v18  ;;  %v7643_v3 = vld [vmem:[%s8897_s22 + $0xb98] ss:$40 sps:$4 sm:$0xff]   ;;  %v7726_v18 = vld [vmem:[%s8897_s22 + $0x113c] ss:$40 sps:$4 sm:$0xff]  }
 0x112   : > { %5483 = vmatpush1.bf16.msra.mxu1 %v7631_v19  ;;  %5514 = vmatprep.mubr.bf16.mxu1 %v9001_v32  ;;  %v7654_v32 = vld [vmem:[%s8897_s22 + $0x5fc] ss:$40 sps:$4 sm:$0xff]   ;;  %v7721_v19 = vld [vmem:[%s8897_s22 + $0xc88] ss:$40 sps:$4 sm:$0xff]  }
 0x113   : > { %5484 = vmatprep.subr.bf16.mxu1 %v7639_v21  ;;  %v7729_v21 = vld [vmem:[%s8897_s22 + $0x163c] ss:$40 sps:$4 sm:$0xff]  }
 0x114   : > { %5442 = vmatpush1.bf16.msra.mxu0 %v7634_v22  ;;  %v7724_v22 = vld [vmem:[%s8897_s22 + $0x1138] ss:$40 sps:$4 sm:$0xff]  }
 0x115   : > { %5443 = vmatprep.subr.bf16.mxu0 %v7642_v47  ;;  %v7732_v47 = vld [vmem:[%s8897_s22 + $0x10ec] ss:$40 sps:$4 sm:$0xff]  }
 0x116   : > { %5485 = vmatpush1.bf16.msra.mxu1 %v7637_v24  ;;  %v7727_v24 = vld [vmem:[%s8897_s22 + $0x1638] ss:$40 sps:$4 sm:$0xff]  }
 0x117   : > { %5486 = vmatprep.subr.bf16.mxu1 %v7645_v25  ;;  %v8541_v25 = vld [vmem:[#allocation2 + $0x8] ss:$40 sps:$4 sm:$0xff]  }
 0x118   : > { %5444 = vmatpush1.bf16.msra.mxu0 %v7640_v26  ;;  %v7735_v26 = vld [vmem:[%s8897_s22 + $0x15ec] ss:$40 sps:$4 sm:$0xff]  }
 0x119   : > { %5445 = vmatprep.subr.bf16.mxu0 %v7648_v27  ;;  %v7730_v27 = vld [vmem:[%s8897_s22 + $0x10e8] ss:$40 sps:$4 sm:$0xff]  }
 0x11a   : > { %5487 = vmatpush1.bf16.msra.mxu1 %v7643_v3  ;;  %v8542_v3 = vld [vmem:[#allocation2 + $0x1c] ss:$40 sps:$4 sm:$0xff]  }
 0x11b   : > { %5488 = vmatprep.subr.bf16.mxu1 %v7651_v28  ;;  %v7738_v28 = vld [vmem:[%s8897_s22 + $0x109c] ss:$40 sps:$4 sm:$0xff]  }
 0x11c   : > { %5446 = vmatpush1.bf16.msra.mxu0 %v7646_v29  ;;  %v7733_v29 = vld [vmem:[%s8897_s22 + $0x15e8] ss:$40 sps:$4 sm:$0xff]  }
 0x11d   : > { %5447 = vmatprep.subr.bf16.mxu0 %v7654_v32  ;;  %v7741_v32 = vld [vmem:[%s8897_s22 + $0x159c] ss:$40 sps:$4 sm:$0xff]  }
 0x11e   : > { %5489 = vmatpush1.bf16.msra.mxu1 %v7649_v30  ;;  %v7736_v30 = vld [vmem:[%s8897_s22 + $0x1098] ss:$40 sps:$4 sm:$0xff]  }
 0x11f   : > { %5490 = vmatprep.subr.bf16.mxu1 %v7657_v31  ;;  %v7744_v31 = vld [vmem:[%s8897_s22 + $0x104c] ss:$40 sps:$4 sm:$0xff]  }
 0x120   : > { %5448 = vmatpush1.bf16.msra.mxu0 %v7652_v33  ;;  %v7747_v33 = vld [vmem:[%s8897_s22 + $0x154c] ss:$40 sps:$4 sm:$0xff]  }
 0x121   : > { %5449 = vmatprep.subr.bf16.mxu0 %v7660_v34  ;;  %v7742_v34 = vld [vmem:[%s8897_s22 + $0x1048] ss:$40 sps:$4 sm:$0xff]  }
 0x122   : > { %5491 = vmatpush1.bf16.msra.mxu1 %v7655_v35  ;;  %v7745_v35 = vld [vmem:[%s8897_s22 + $0x1548] ss:$40 sps:$4 sm:$0xff]  }
 0x123   : > { %5492 = vmatprep.subr.bf16.mxu1 %v7663_v36  ;;  %v7753_v36 = vld [vmem:[%s8897_s22 + $0x14fc] ss:$40 sps:$4 sm:$0xff]  }
 0x124   : > { %5450 = vmatpush1.bf16.msra.mxu0 %v7658_v37  ;;  %v7748_v37 = vld [vmem:[%s8897_s22 + $0xff8] ss:$40 sps:$4 sm:$0xff]  }
 0x125   : > { %5451 = vmatprep.subr.bf16.mxu0 %v7666_v38  ;;  %v7756_v38 = vld [vmem:[%s8897_s22 + $0xfac] ss:$40 sps:$4 sm:$0xff]  }
 0x126   : > { %5493 = vmatpush1.bf16.msra.mxu1 %v7661_v39  ;;  %v7751_v39 = vld [vmem:[%s8897_s22 + $0x14f8] ss:$40 sps:$4 sm:$0xff]  }
 0x127   : > { %5494 = vmatprep.subr.bf16.mxu1 %v7669_v40  ;;  %v7759_v40 = vld [vmem:[%s8897_s22 + $0x14ac] ss:$40 sps:$4 sm:$0xff]  }
 0x128   : > { %5452 = vmatpush1.bf16.msra.mxu0 %v7664_v41  ;;  %v7754_v41 = vld [vmem:[%s8897_s22 + $0xfa8] ss:$40 sps:$4 sm:$0xff]  }
 0x129   : > { %5453 = vmatprep.subr.bf16.mxu0 %v7672_v42  ;;  %v7762_v42 = vld [vmem:[%s8897_s22 + $0xf5c] ss:$40 sps:$4 sm:$0xff]  }
 0x12a   : > { %5495 = vmatpush1.bf16.msra.mxu1 %v7667_v43  ;;  %v7757_v43 = vld [vmem:[%s8897_s22 + $0x14a8] ss:$40 sps:$4 sm:$0xff]  }
 0x12b   : > { %5496 = vmatprep.subr.bf16.mxu1 %v7675_v44  ;;  %v7765_v44 = vld [vmem:[%s8897_s22 + $0x145c] ss:$40 sps:$4 sm:$0xff]  }
 0x12c   : > { %5454 = vmatpush1.bf16.msra.mxu0 %v7670_v45  ;;  %v7760_v45 = vld [vmem:[%s8897_s22 + $0xf58] ss:$40 sps:$4 sm:$0xff]  }
 0x12d   : > { %5455 = vmatprep.subr.bf16.mxu0 %v7678_v46  ;;  %v7768_v46 = vld [vmem:[%s8897_s22 + $0xf0c] ss:$40 sps:$4 sm:$0xff]  }
 0x12e   : > { %5497 = vmatpush1.bf16.msra.mxu1 %v7673_v48  ;;  %v7763_v48 = vld [vmem:[%s8897_s22 + $0x1458] ss:$40 sps:$4 sm:$0xff]  }
 0x12f   : > { %5498 = vmatprep.subr.bf16.mxu1 %v7681_v49  ;;  %v7771_v49 = vld [vmem:[%s8897_s22 + $0x140c] ss:$40 sps:$4 sm:$0xff]  }
 0x130   : > { %5456 = vmatpush2.bf16.msra.mxu0 %v7676_v50  ;;  %v7766_v50 = vld [vmem:[%s8897_s22 + $0xf08] ss:$40 sps:$4 sm:$0xff]  }
 0x131   : > { %5457 = vmatprep.subr.bf16.mxu0 %v7684_v51  ;;  %v7774_v51 = vld [vmem:[%s8897_s22 + $0x13bc] ss:$40 sps:$4 sm:$0xff]  }
 0x132   : > { %5499 = vmatpush2.bf16.msra.mxu1 %v7679_v52  ;;  %v7769_v52 = vld [vmem:[%s8897_s22 + $0x1408] ss:$40 sps:$4 sm:$0xff]  }
 0x133   : > { %5500 = vmatprep.subr.bf16.mxu1 %v7687_v53  ;;  %v7777_v53 = vld [vmem:[%s8897_s22 + $0x18bc] ss:$40 sps:$4 sm:$0xff]  }
 0x134   : > { %5458 = vmatpush2.bf16.msra.mxu0 %v7682_v54  ;;  %v7772_v54 = vld [vmem:[%s8897_s22 + $0x13b8] ss:$40 sps:$4 sm:$0xff]  }
 0x135   : > { %5459 = vmatprep.subr.bf16.mxu0 %v7690_v55  ;;  %v7780_v55 = vld [vmem:[%s8897_s22 + $0x136c] ss:$40 sps:$4 sm:$0xff]  }
 0x136   : > { %5501 = vmatpush2.bf16.msra.mxu1 %v7685_v56  ;;  %v7775_v56 = vld [vmem:[%s8897_s22 + $0x18b8] ss:$40 sps:$4 sm:$0xff]  }
 0x137   : > { %5502 = vmatprep.subr.bf16.mxu1 %v7693_v57  ;;  %v7783_v57 = vld [vmem:[%s8897_s22 + $0x186c] ss:$40 sps:$4 sm:$0xff]  }
 0x138   : > { %5460 = vmatpush2.bf16.msra.mxu0 %v7688_v58  ;;  %v7778_v58 = vld [vmem:[%s8897_s22 + $0x1368] ss:$40 sps:$4 sm:$0xff]  }
 0x139   : > { %5461 = vmatprep.subr.bf16.mxu0 %v7696_v59  ;;  %v7786_v59 = vld [vmem:[%s8897_s22 + $0x131c] ss:$40 sps:$4 sm:$0xff]  }
 0x13a   : > { %5503 = vmatpush2.bf16.msra.mxu1 %v7691_v60  ;;  %v7781_v60 = vld [vmem:[%s8897_s22 + $0x1868] ss:$40 sps:$4 sm:$0xff]  }
 0x13b   : > { %5504 = vmatprep.subr.bf16.mxu1 %v7699_v61  ;;  %v7789_v61 = vld [vmem:[%s8897_s22 + $0x181c] ss:$40 sps:$4 sm:$0xff]  }
 0x13c   : > { %5462 = vmatpush2.bf16.msra.mxu0 %v7694_v62  ;;  %v7784_v62 = vld [vmem:[%s8897_s22 + $0x1318] ss:$40 sps:$4 sm:$0xff]  }
 0x13d   : > { %5463 = vmatprep.subr.bf16.mxu0 %v7702_v63  ;;  %v7792_v63 = vld [vmem:[%s8897_s22 + $0x12cc] ss:$40 sps:$4 sm:$0xff]  }
 0x13e   : > { %5505 = vmatpush2.bf16.msra.mxu1 %v7697_v0  ;;  %v7787_v0 = vld [vmem:[%s8897_s22 + $0x1818] ss:$40 sps:$4 sm:$0xff]  }
 0x13f   : > { %5506 = vmatprep.subr.bf16.mxu1 %v7705_v1  ;;  %v7795_v1 = vld [vmem:[%s8897_s22 + $0x17cc] ss:$40 sps:$4 sm:$0xff]  }
 0x140   : > { %5464 = vmatpush2.bf16.msra.mxu0 %v7700_v2  ;;  %v7790_v2 = vld [vmem:[%s8897_s22 + $0x12c8] ss:$40 sps:$4 sm:$0xff]  }
 0x141   : > { %5465 = vmatprep.subr.bf16.mxu0 %v7708_v4  ;;  %v7798_v4 = vld [vmem:[%s8897_s22 + $0x127c] ss:$40 sps:$4 sm:$0xff]  }
 0x142   : > { %5507 = vmatpush2.bf16.msra.mxu1 %v7703_v5  ;;  %v7793_v5 = vld [vmem:[%s8897_s22 + $0x17c8] ss:$40 sps:$4 sm:$0xff]  }
 0x143   : > { %5508 = vmatprep.subr.bf16.mxu1 %v7711_v6  ;;  %v7801_v6 = vld [vmem:[%s8897_s22 + $0x177c] ss:$40 sps:$4 sm:$0xff]  }
 0x144   : > { %5466 = vmatpush2.bf16.msra.mxu0 %v7706_v7  ;;  %v7796_v7 = vld [vmem:[%s8897_s22 + $0x1278] ss:$40 sps:$4 sm:$0xff]  }
 0x145   : > { %5467 = vmatprep.subr.bf16.mxu0 %v7714_v8  ;;  %v7804_v8 = vld [vmem:[%s8897_s22 + $0x122c] ss:$40 sps:$4 sm:$0xff]  }
 0x146   : > { %5509 = vmatpush2.bf16.msra.mxu1 %v7709_v10  ;;  %v7799_v10 = vld [vmem:[%s8897_s22 + $0x1778] ss:$40 sps:$4 sm:$0xff]  }
 0x147   : > { %5510 = vmatprep.subr.bf16.mxu1 %v7717_v11  ;;  %v7807_v11 = vld [vmem:[%s8897_s22 + $0x172c] ss:$40 sps:$4 sm:$0xff]  }
 0x148   : > { %5468 = vmatpush2.bf16.msra.mxu0 %v7712_v12  ;;  %v7802_v12 = vld [vmem:[%s8897_s22 + $0x1228] ss:$40 sps:$4 sm:$0xff]  }
 0x149   : > { %5469 = vmatprep.subr.bf16.mxu0 %v7720_v13  ;;  %v7810_v13 = vld [vmem:[%s8897_s22 + $0x11dc] ss:$40 sps:$4 sm:$0xff]  }
 0x14a   : > { %5511 = vmatpush2.bf16.msra.mxu1 %v7715_v14  ;;  %v7805_v14 = vld [vmem:[%s8897_s22 + $0x1728] ss:$40 sps:$4 sm:$0xff]  }
 0x14b   : > { %5512 = vmatprep.subr.bf16.mxu1 %v7723_v16  ;;  %v7813_v16 = vld [vmem:[%s8897_s22 + $0x16dc] ss:$40 sps:$4 sm:$0xff]  }
 0x14c   : > { %5470 = vmatpush2.bf16.msra.mxu0 %v7718_v17  ;;  %v7808_v17 = vld [vmem:[%s8897_s22 + $0x11d8] ss:$40 sps:$4 sm:$0xff]  }
 0x14d   : > { %5525 = vmatprep.subr.bf16.mxu0 %v7726_v18  ;;  %v7816_v18 = vld [vmem:[%s8897_s22 + $0x118c] ss:$40 sps:$4 sm:$0xff]  }
 0x14e   : > { %5513 = vmatpush2.bf16.msra.mxu1 %v7721_v19  ;;  %v7811_v19 = vld [vmem:[%s8897_s22 + $0x16d8] ss:$40 sps:$4 sm:$0xff]  }
 0x14f   : > { %5472 = vmatmul.mubr.bf16.vlgmr.msra.gmra.mxu0 %v8541_v25  ;;  %5568 = vmatprep.subr.bf16.mxu1 %v7729_v21  ;;  %v7819_v21 = vld [vmem:[%s8897_s22 + $0x168c] ss:$40 sps:$4 sm:$0xff]  }
 0x150   : > { %5526 = vmatpush1.bf16.msra.mxu0 %v7724_v22  ;;  %5557 = vmatprep.mubr.bf16.mxu0 %v8542_v3  ;;  %v7814_v22 = vld [vmem:[%s8897_s22 + $0x1188] ss:$40 sps:$4 sm:$0xff]   ;;  %v7825_v25 = vld [vmem:[%s8897_s22 + $0x744] ss:$40 sps:$4 sm:$0xff]  }
 0x151   : > { %5515 = vmatmul.mubr.bf16.vlgmr.msra.gmra.mxu1 %v9041_v9  ;;  %5527 = vmatprep.subr.bf16.mxu0 %v7732_v47  ;;  %v7739_v9 = vld [vmem:[%s8897_s22 + $0x1598] ss:$40 sps:$4 sm:$0xff]   ;;  %v7822_v47 = vld [vmem:[%s8897_s22 + $0x244] ss:$40 sps:$4 sm:$0xff]  }
 0x152   : > { %5569 = vmatpush1.bf16.msra.mxu1 %v7727_v24  ;;  %5600 = vmatprep.mubr.bf16.mxu1 %v9054_v20  ;;  %v7750_v20 = vld [vmem:[%s8897_s22 + $0xffc] ss:$40 sps:$4 sm:$0xff]   ;;  %v7817_v24 = vld [vmem:[%s8897_s22 + $0x1688] ss:$40 sps:$4 sm:$0xff]  }
 0x153   : > { %5570 = vmatprep.subr.bf16.mxu1 %v7735_v26  ;;  %v7820_v26 = vld [vmem:[%s8897_s22 + $0x240] ss:$40 sps:$4 sm:$0xff]  }
 0x154   : > { %5528 = vmatpush1.bf16.msra.mxu0 %v7730_v27  ;;  %v7828_v27 = vld [vmem:[%s8897_s22 + $0x1f4] ss:$40 sps:$4 sm:$0xff]   ;;  %v7823_v3 = vld [vmem:[%s8897_s22 + $0x740] ss:$40 sps:$4 sm:$0xff]  }
 0x155   : > { %5529 = vmatprep.subr.bf16.mxu0 %v7738_v28  ;;  %v8543_v28 = vld [vmem:[#allocation2 + $0x18] ss:$40 sps:$4 sm:$0xff]  }
 0x156   : > { %5571 = vmatpush1.bf16.msra.mxu1 %v7733_v29  ;;  %v7831_v29 = vld [vmem:[%s8897_s22 + $0x6f4] ss:$40 sps:$4 sm:$0xff]  }
 0x157   : > { %5572 = vmatprep.subr.bf16.mxu1 %v7741_v32  ;;  %v7826_v32 = vld [vmem:[%s8897_s22 + $0x1f0] ss:$40 sps:$4 sm:$0xff]  }
 0x158   : > { %5530 = vmatpush1.bf16.msra.mxu0 %v7736_v30  ;;  %v8544_v30 = vld [vmem:[#allocation2 + $0x4] ss:$40 sps:$4 sm:$0xff]  }
 0x159   : > { %5531 = vmatprep.subr.bf16.mxu0 %v7744_v31  ;;  %v7834_v31 = vld [vmem:[%s8897_s22 + $0x1a4] ss:$40 sps:$4 sm:$0xff]  }
 0x15a   : > { %5573 = vmatpush1.bf16.msra.mxu1 %v7739_v9  ;;  %v7829_v9 = vld [vmem:[%s8897_s22 + $0x6f0] ss:$40 sps:$4 sm:$0xff]  }
 0x15b   : > { %5574 = vmatprep.subr.bf16.mxu1 %v7747_v33  ;;  %v7837_v33 = vld [vmem:[%s8897_s22 + $0x6a4] ss:$40 sps:$4 sm:$0xff]  }
 0x15c   : > { %5532 = vmatpush1.bf16.msra.mxu0 %v7742_v34  ;;  %v7832_v34 = vld [vmem:[%s8897_s22 + $0x1a0] ss:$40 sps:$4 sm:$0xff]  }
 0x15d   : > { %5533 = vmatprep.subr.bf16.mxu0 %v7750_v20  ;;  %v7840_v20 = vld [vmem:[%s8897_s22 + $0x154] ss:$40 sps:$4 sm:$0xff]  }
 0x15e   : > { %5575 = vmatpush1.bf16.msra.mxu1 %v7745_v35  ;;  %v7843_v35 = vld [vmem:[%s8897_s22 + $0x654] ss:$40 sps:$4 sm:$0xff]  }
 0x15f   : > { %5576 = vmatprep.subr.bf16.mxu1 %v7753_v36  ;;  %v7838_v36 = vld [vmem:[%s8897_s22 + $0x150] ss:$40 sps:$4 sm:$0xff]  }
 0x160   : > { %5534 = vmatpush1.bf16.msra.mxu0 %v7748_v37  ;;  %v7841_v37 = vld [vmem:[%s8897_s22 + $0x650] ss:$40 sps:$4 sm:$0xff]  }
 0x161   : > { %5535 = vmatprep.subr.bf16.mxu0 %v7756_v38  ;;  %v7849_v38 = vld [vmem:[%s8897_s22 + $0x604] ss:$40 sps:$4 sm:$0xff]  }
 0x162   : > { %5577 = vmatpush1.bf16.msra.mxu1 %v7751_v39  ;;  %v7844_v39 = vld [vmem:[%s8897_s22 + $0x100] ss:$40 sps:$4 sm:$0xff]  }
 0x163   : > { %5578 = vmatprep.subr.bf16.mxu1 %v7759_v40  ;;  %v7852_v40 = vld [vmem:[%s8897_s22 + $0xb4] ss:$40 sps:$4 sm:$0xff]  }
 0x164   : > { %5536 = vmatpush1.bf16.msra.mxu0 %v7754_v41  ;;  %v7847_v41 = vld [vmem:[%s8897_s22 + $0x600] ss:$40 sps:$4 sm:$0xff]  }
 0x165   : > { %5537 = vmatprep.subr.bf16.mxu0 %v7762_v42  ;;  %v7855_v42 = vld [vmem:[%s8897_s22 + $0x5b4] ss:$40 sps:$4 sm:$0xff]  }
 0x166   : > { %5579 = vmatpush1.bf16.msra.mxu1 %v7757_v43  ;;  %v7850_v43 = vld [vmem:[%s8897_s22 + $0xb0] ss:$40 sps:$4 sm:$0xff]  }
 0x167   : > { %5580 = vmatprep.subr.bf16.mxu1 %v7765_v44  ;;  %v7858_v44 = vld [vmem:[%s8897_s22 + $0x64] ss:$40 sps:$4 sm:$0xff]  }
 0x168   : > { %5538 = vmatpush1.bf16.msra.mxu0 %v7760_v45  ;;  %v7853_v45 = vld [vmem:[%s8897_s22 + $0x5b0] ss:$40 sps:$4 sm:$0xff]  }
 0x169   : > { %5539 = vmatprep.subr.bf16.mxu0 %v7768_v46  ;;  %v7861_v46 = vld [vmem:[%s8897_s22 + $0x564] ss:$40 sps:$4 sm:$0xff]  }
 0x16a   : > { %5581 = vmatpush1.bf16.msra.mxu1 %v7763_v48  ;;  %v7856_v48 = vld [vmem:[%s8897_s22 + $0x60] ss:$40 sps:$4 sm:$0xff]  }
 0x16b   : > { %5582 = vmatprep.subr.bf16.mxu1 %v7771_v49  ;;  %v7864_v49 = vld [vmem:[%s8897_s22 + $0x14] ss:$40 sps:$4 sm:$0xff]  }
 0x16c   : > { %5540 = vmatpush1.bf16.msra.mxu0 %v7766_v50  ;;  %v7859_v50 = vld [vmem:[%s8897_s22 + $0x560] ss:$40 sps:$4 sm:$0xff]  }
 0x16d   : > { %5541 = vmatprep.subr.bf16.mxu0 %v7774_v51  ;;  %v7867_v51 = vld [vmem:[%s8897_s22 + $0x514] ss:$40 sps:$4 sm:$0xff]  }
 0x16e   : > { %5583 = vmatpush1.bf16.msra.mxu1 %v7769_v52  ;;  %v7862_v52 = vld [vmem:[%s8897_s22 + $0x10] ss:$40 sps:$4 sm:$0xff]  }
 0x16f   : > { %5584 = vmatprep.subr.bf16.mxu1 %v7777_v53  ;;  %v7870_v53 = vld [vmem:[%s8897_s22 + $0x4c4] ss:$40 sps:$4 sm:$0xff]  }
 0x170   : > { %5542 = vmatpush2.bf16.msra.mxu0 %v7772_v54  ;;  %v7865_v54 = vld [vmem:[%s8897_s22 + $0x510] ss:$40 sps:$4 sm:$0xff]  }
 0x171   : > { %5543 = vmatprep.subr.bf16.mxu0 %v7780_v55  ;;  %v7873_v55 = vld [vmem:[%s8897_s22 + $0x9c4] ss:$40 sps:$4 sm:$0xff]  }
 0x172   : > { %5585 = vmatpush2.bf16.msra.mxu1 %v7775_v56  ;;  %v7868_v56 = vld [vmem:[%s8897_s22 + $0x4c0] ss:$40 sps:$4 sm:$0xff]  }
 0x173   : > { %5586 = vmatprep.subr.bf16.mxu1 %v7783_v57  ;;  %v7876_v57 = vld [vmem:[%s8897_s22 + $0x474] ss:$40 sps:$4 sm:$0xff]  }
 0x174   : > { %5544 = vmatpush2.bf16.msra.mxu0 %v7778_v58  ;;  %v7871_v58 = vld [vmem:[%s8897_s22 + $0x9c0] ss:$40 sps:$4 sm:$0xff]  }
 0x175   : > { %5545 = vmatprep.subr.bf16.mxu0 %v7786_v59  ;;  %v7879_v59 = vld [vmem:[%s8897_s22 + $0x974] ss:$40 sps:$4 sm:$0xff]  }
 0x176   : > { %5587 = vmatpush2.bf16.msra.mxu1 %v7781_v60  ;;  %v7874_v60 = vld [vmem:[%s8897_s22 + $0x470] ss:$40 sps:$4 sm:$0xff]  }
 0x177   : > { %5588 = vmatprep.subr.bf16.mxu1 %v7789_v61  ;;  %v7882_v61 = vld [vmem:[%s8897_s22 + $0x424] ss:$40 sps:$4 sm:$0xff]  }
 0x178   : > { %5546 = vmatpush2.bf16.msra.mxu0 %v7784_v62  ;;  %v7877_v62 = vld [vmem:[%s8897_s22 + $0x970] ss:$40 sps:$4 sm:$0xff]  }
 0x179   : > { %5547 = vmatprep.subr.bf16.mxu0 %v7792_v63  ;;  %v5215_v63 = vpop.f32.mrf.mxu0 }
 0x17a   : > { %5589 = vmatpush2.bf16.msra.mxu1 %v7787_v0  ;;  %v7885_v0 = vld [vmem:[%s8897_s22 + $0x924] ss:$40 sps:$4 sm:$0xff]  }
 0x17b   : > { %5590 = vmatprep.subr.bf16.mxu1 %v7795_v1  ;;  %v1081_v1 = vlaneseq }
 0x17c   : > { %5548 = vmatpush2.bf16.msra.mxu0 %v7790_v2  ;;  %v7880_v2 = vld [vmem:[%s8897_s22 + $0x420] ss:$40 sps:$4 sm:$0xff]  }
 0x17d   : > { %5549 = vmatprep.subr.bf16.mxu0 %v7798_v4  ;;  %v7888_v4 = vld [vmem:[%s8897_s22 + $0x3d4] ss:$40 sps:$4 sm:$0xff]  }
 0x17e   : > { %5591 = vmatpush2.bf16.msra.mxu1 %v7793_v5  ;;  %v7883_v5 = vld [vmem:[%s8897_s22 + $0x920] ss:$40 sps:$4 sm:$0xff]  }
 0x17f   : > { %5592 = vmatprep.subr.bf16.mxu1 %v7801_v6  ;;  %v5217_v6 = vpop.f32.mrf.mxu0 }
 0x180   : > { %5550 = vmatpush2.bf16.msra.mxu0 %v7796_v7  ;;  %v5258_v7 = vpop.f32.mrf.mxu1 }
 0x181   : > { %5551 = vmatprep.subr.bf16.mxu0 %v7804_v8  ;;  %v7891_v8 = vld [vmem:[%s8897_s22 + $0x8d4] ss:$40 sps:$4 sm:$0xff]  }
 0x182   : > { %5593 = vmatpush2.bf16.msra.mxu1 %v7799_v10  ;;  %v9298_v10 = vshrl.u32 %v1081_v1, 7 }
 0x183   : > { %5594 = vmatprep.subr.bf16.mxu1 %v7807_v11  ;;  %v7886_v11 = vld [vmem:[%s8897_s22 + $0x3d0] ss:$40 sps:$4 sm:$0xff]  }
 0x184   : > { %5552 = vmatpush2.bf16.msra.mxu0 %v7802_v12  ;;  %v7894_v12 = vld [vmem:[%s8897_s22 + $0x384] ss:$40 sps:$4 sm:$0xff]  }
 0x185   : > { %5553 = vmatprep.subr.bf16.mxu0 %v7810_v13  ;;  %v7889_v13 = vld [vmem:[%s8897_s22 + $0x8d0] ss:$40 sps:$4 sm:$0xff]  }
 0x186   : > { %5595 = vmatpush2.bf16.msra.mxu1 %v7805_v14  ;;  %v1077_v14 = vld [vmem:[%s9303_s20] sm:$0xff] }
 0x187   : > { %5596 = vmatprep.subr.bf16.mxu1 %v7813_v16  ;;  %v5219_v16 = vpop.f32.mrf.mxu0 }
 0x188   : > { %5554 = vmatpush2.bf16.msra.mxu0 %v7808_v17  ;;  %v5260_v17 = vpop.f32.mrf.mxu1 }
 0x189   : > { %5555 = vmatprep.subr.bf16.mxu0 %v7816_v18  ;;  %v7897_v18 = vld [vmem:[%s8897_s22 + $0x884] ss:$40 sps:$4 sm:$0xff]  }
 0x18a   : > { %5597 = vmatpush2.bf16.msra.mxu1 %v7811_v19  ;;  %v1083_v19 = vsub.s32 0, %v9298_v10 }
 0x18b   : > { %5598 = vmatprep.subr.bf16.mxu1 %v7819_v21  ;;  %v7892_v21 = vld [vmem:[%s8897_s22 + $0x380] ss:$40 sps:$4 sm:$0xff]  }
 0x18c   : > { %5556 = vmatpush2.bf16.msra.mxu0 %v7814_v22  ;;  %v7900_v22 = vld [vmem:[%s8897_s22 + $0x334] ss:$40 sps:$4 sm:$0xff]  }
 0x18d   : > { %5611 = vmatprep.subr.bf16.mxu0 %v7822_v47  ;;  %v1087_v47 = vsub.s32 1, %v9298_v10 }
 0x18e   : > { %5599 = vmatpush2.bf16.msra.mxu1 %v7817_v24  ;;  %v7895_v24 = vld [vmem:[%s8897_s22 + $0x880] ss:$40 sps:$4 sm:$0xff]  }
 0x18f   : > { %5558 = vmatmul.mubr.bf16.vlgmr.msra.gmra.mxu0 %v8543_v28  ;;  %5654 = vmatprep.subr.bf16.mxu1 %v7825_v25  ;;  %v5221_v25 = vpop.f32.mrf.mxu0  ;;  %v7898_v28 = vld [vmem:[%s8897_s22 + $0x330] ss:$40 sps:$4 sm:$0xff]  }
 0x190   : > { %5612 = vmatpush1.bf16.msra.mxu0 %v7820_v26  ;;  %5643 = vmatprep.mubr.bf16.mxu0 %v8544_v30  ;;  %v5262_v26 = vpop.f32.mrf.mxu1  ;;  %v1088_v30 = vrot.slane %v1077_v14, %v1087_v47 }
 0x191   : > { %5601 = vmatmul.mubr.bf16.vlgmr.msra.gmra.mxu1 %v9112_v15  ;;  %5613 = vmatprep.subr.bf16.mxu0 %v7828_v27  ;;  %v7835_v15 = vld [vmem:[%s8897_s22 + $0x6a0] ss:$40 sps:$4 sm:$0xff]   ;;  %v7903_v27 = vld [vmem:[%s8897_s22 + $0x834] ss:$40 sps:$4 sm:$0xff]  }
 0x192   : > { %5655 = vmatpush1.bf16.msra.mxu1 %v7823_v3  ;;  %5686 = vmatprep.mubr.bf16.mxu1 %v9121_v23  ;;  %v7846_v23 = vld [vmem:[%s8897_s22 + $0x104] ss:$40 sps:$4 sm:$0xff]   ;;  %v1084_v3 = vrot.slane %v1077_v14, %v1083_v19  ;;  %v7925_v14 = vld [vmem:[%s8897_s22 + $0x10f0] ss:$40 sps:$4 sm:$0xff]  }
 0x193   : > { %5656 = vmatprep.subr.bf16.mxu1 %v7831_v29  ;;  %v5301_v29 = vpop.f32.mrf.mxu0 }
 0x194   : > { %5614 = vmatpush1.bf16.msra.mxu0 %v7826_v32  ;;  %v7906_v32 = vld [vmem:[%s8897_s22 + $0x2e4] ss:$40 sps:$4 sm:$0xff]  }
 0x195   : > { %5615 = vmatprep.subr.bf16.mxu0 %v7834_v31  ;;  %v7901_v31 = vld [vmem:[%s8897_s22 + $0x830] ss:$40 sps:$4 sm:$0xff]  }
 0x196   : > { %5657 = vmatpush1.bf16.msra.mxu1 %v7829_v9  ;;  %v5264_v9 = vpop.f32.mrf.mxu1 }
 0x197   : > { %5658 = vmatprep.subr.bf16.mxu1 %v7837_v33  ;;  %v7909_v33 = vld [vmem:[%s8897_s22 + $0x7e4] ss:$40 sps:$4 sm:$0xff]  }
 0x198   : > { %5616 = vmatpush1.bf16.msra.mxu0 %v7832_v34  ;;  %v5216_v34 = vadd.f32 %v5215_v63, %v1084_v3  ;;  %v7927_v63 = vld [vmem:[%s8897_s22 + $0x10f4] ss:$40 sps:$4 sm:$0xff]  }
 0x199   : > { %5617 = vmatprep.subr.bf16.mxu0 %v7840_v20  ;;  %v7904_v20 = vld [vmem:[%s8897_s22 + $0x2e0] ss:$40 sps:$4 sm:$0xff]  }
 0x19a   : > { %5659 = vmatpush1.bf16.msra.mxu1 %v7835_v15  ;;  %v5303_v15 = vpop.f32.mrf.mxu0 }
 0x19b   : > { %5660 = vmatprep.subr.bf16.mxu1 %v7843_v35  ;;  %v5344_v35 = vpop.f32.mrf.mxu1 }
 0x19c   : > { %5618 = vmatpush1.bf16.msra.mxu0 %v7838_v36  ;;  %v7912_v36 = vld [vmem:[%s8897_s22 + $0x294] ss:$40 sps:$4 sm:$0xff]  }
 0x19d   : > { %5619 = vmatprep.subr.bf16.mxu0 %v7846_v23  ;;  %v5218_v23 = vadd.f32 %v5217_v6, %v1088_v30 }
 0x19e   : > { %5661 = vmatpush1.bf16.msra.mxu1 %v7841_v37  ;;  %v7907_v37 = vld [vmem:[%s8897_s22 + $0x7e0] ss:$40 sps:$4 sm:$0xff]  }
 0x19f   : > { %5662 = vmatprep.subr.bf16.mxu1 %v7849_v38  ;;  %v7915_v38 = vld [vmem:[%s8897_s22 + $0x794] ss:$40 sps:$4 sm:$0xff]  }
 0x1a0   : > { %5620 = vmatpush1.bf16.msra.mxu0 %v7844_v39  ;;  %v5259_v39 = vadd.f32 %v5258_v7, %v5216_v34  ;;  %v7943_v34 = vld [vmem:[%s8897_s22 + $0x1000] ss:$40 sps:$4 sm:$0xff]  }
 0x1a1   : > { %5621 = vmatprep.subr.bf16.mxu0 %v7852_v40  ;;  %v5220_v40 = vadd.f32 %v5219_v16, %v1084_v3  ;;  %v8548_v16 = vld [vmem:[#allocation2 + $0x1c] ss:$40 sps:$4 sm:$0xff]   ;;  %v7931_v3 = vld [vmem:[%s8897_s22 + $0x10a0] ss:$40 sps:$4 sm:$0xff]  }
 0x1a2   : > { %5663 = vmatpush1.bf16.msra.mxu1 %v7847_v41  ;;  %v7910_v41 = vld [vmem:[%s8897_s22 + $0x290] ss:$40 sps:$4 sm:$0xff]  }
 0x1a3   : > { %5664 = vmatprep.subr.bf16.mxu1 %v7855_v42  ;;  %v5305_v42 = vpop.f32.mrf.mxu0 }
 0x1a4   : > { %5622 = vmatpush1.bf16.msra.mxu0 %v7850_v43  ;;  %v5346_v43 = vpop.f32.mrf.mxu1 }
 0x1a5   : > { %5623 = vmatprep.subr.bf16.mxu0 %v7858_v44  ;;  %v7918_v44 = vld [vmem:[%s8897_s22 + $0xc44] ss:$40 sps:$4 sm:$0xff]  }
 0x1a6   : > { %5665 = vmatpush1.bf16.msra.mxu1 %v7853_v45  ;;  %v5261_v45 = vadd.f32 %v5260_v17, %v5218_v23  ;;  %v7957_v23 = vld [vmem:[%s8897_s22 + $0xf64] ss:$40 sps:$4 sm:$0xff]  }
 0x1a7   : > { %5666 = vmatprep.subr.bf16.mxu1 %v7861_v46  ;;  %v5222_v46 = vadd.f32 %v5221_v25, %v1088_v30  ;;  %v7937_v30 = vld [vmem:[%s8897_s22 + $0x1050] ss:$40 sps:$4 sm:$0xff]  }
 0x1a8   : > { %5624 = vmatpush1.bf16.msra.mxu0 %v7856_v48  ;;  %v5302_v48 = vadd.f32 %v5301_v29, %v5259_v39  ;;  %v7934_v29 = vld [vmem:[%s8897_s22 + $0xb50] ss:$40 sps:$4 sm:$0xff]   ;;  %v7955_v39 = vld [vmem:[%s8897_s22 + $0xf60] ss:$40 sps:$4 sm:$0xff]  }
 0x1a9   : > { %5625 = vmatprep.subr.bf16.mxu0 %v7864_v49  ;;  %v7913_v49 = vld [vmem:[%s8897_s22 + $0x790] ss:$40 sps:$4 sm:$0xff]  }
 0x1aa   : > { %5667 = vmatpush1.bf16.msra.mxu1 %v7859_v50  ;;  %v7921_v50 = vld [vmem:[%s8897_s22 + $0x1144] ss:$40 sps:$4 sm:$0xff]  }
 0x1ab   : > { %5668 = vmatprep.subr.bf16.mxu1 %v7867_v51  ;;  %v5263_v51 = vadd.f32 %v5262_v26, %v5220_v40  ;;  %v7936_v26 = vld [vmem:[%s8897_s22 + $0xb54] ss:$40 sps:$4 sm:$0xff]  }
 0x1ac   : > { %5626 = vmatpush1.bf16.msra.mxu0 %v7862_v52  ;;  %v5304_v52 = vadd.f32 %v5303_v15, %v5261_v45  ;;  %v7946_v15 = vld [vmem:[%s8897_s22 + $0xab0] ss:$40 sps:$4 sm:$0xff]   ;;  %v7963_v40 = vld [vmem:[%s8897_s22 + $0xf14] ss:$40 sps:$4 sm:$0xff]   ;;  %v7964_v45 = vld [vmem:[%s8897_s22 + $0xec0] ss:$40 sps:$4 sm:$0xff]  }
 0x1ad   : > { %5627 = vmatprep.subr.bf16.mxu0 %v7870_v53  ;;  %v7916_v53 = vld [vmem:[%s8897_s22 + $0xc40] ss:$40 sps:$4 sm:$0xff]  }
 0x1ae   : > { %5669 = vmatpush1.bf16.msra.mxu1 %v7865_v54  ;;  %v5307_v54 = vpop.f32.mrf.mxu0 }
 0x1af   : > { %5670 = vmatprep.subr.bf16.mxu1 %v7873_v55  ;;  %v5348_v55 = vpop.f32.mrf.mxu1 }
 0x1b0   : > { %5628 = vmatpush2.bf16.msra.mxu0 %v7868_v56  ;;  %v7924_v56 = vld [vmem:[%s8897_s22 + $0xbf4] ss:$40 sps:$4 sm:$0xff]  }
 0x1b1   : > { %5629 = vmatprep.subr.bf16.mxu0 %v7876_v57  ;;  %v5265_v57 = vadd.f32 %v5264_v9, %v5222_v46  ;;  %v5350_v6 = vpop.f32.mrf.mxu1  ;;  %v7940_v9 = vld [vmem:[%s8897_s22 + $0xb00] ss:$40 sps:$4 sm:$0xff]   ;;  %v7972_v46 = vld [vmem:[%s8897_s22 + $0xe74] ss:$40 sps:$4 sm:$0xff]  }
 0x1b2   : > { %5671 = vmatpush2.bf16.msra.mxu1 %v7871_v58  ;;  %v5345_v58 = vadd.f32 %v5344_v35, %v5302_v48  ;;  %v7954_v35 = vld [vmem:[%s8897_s22 + $0xa64] ss:$40 sps:$4 sm:$0xff]   ;;  %v7967_v48 = vld [vmem:[%s8897_s22 + $0x13c0] ss:$40 sps:$4 sm:$0xff]  }
 0x1b3   : > { %5672 = vmatprep.subr.bf16.mxu1 %v7879_v59  ;;  %v5306_v59 = vadd.f32 %v5305_v42, %v5263_v51  ;;  %v5308_v1 = vadd.f32 %v5307_v54, %v5265_v57  ;;  %v7966_v42 = vld [vmem:[%s8897_s22 + $0xec4] ss:$40 sps:$4 sm:$0xff]   ;;  %v7976_v54 = vld [vmem:[%s8897_s22 + $0xe20] ss:$40 sps:$4 sm:$0xff]   ;;  %v7987_v57 = vld [vmem:[%s8897_s22 + $0x12d4] ss:$40 sps:$4 sm:$0xff]  }
 0x1b4   : > { %5630 = vmatpush2.bf16.msra.mxu0 %v7874_v60  ;;  %v7919_v60 = vld [vmem:[%s8897_s22 + $0x1140] ss:$40 sps:$4 sm:$0xff]   ;;  %v7978_v51 = vld [vmem:[%s8897_s22 + $0xe24] ss:$40 sps:$4 sm:$0xff]  }
 0x1b5   : > { %5631 = vmatprep.subr.bf16.mxu0 %v7882_v61 }
 0x1b6   : > { %5673 = vmatpush2.bf16.msra.mxu1 %v7877_v62  ;;  %v9333_v62 = vld [vmem:[#allocation2] ss:$40 sps:$4 sm:$0xff]  }
 0x1b7   : > { %5674 = vmatprep.subr.bf16.mxu1 %v7885_v0  ;;  %v5347_v0 = vadd.f32 %v5346_v43, %v5304_v52  ;;  %v7961_v43 = vld [vmem:[%s8897_s22 + $0xf10] ss:$40 sps:$4 sm:$0xff]  }
 0x1b8   : > { %5632 = vmatpush2.bf16.msra.mxu0 %v7880_v2  ;;  %v7973_v52 = vld [vmem:[%s8897_s22 + $0x1370] ss:$40 sps:$4 sm:$0xff]  }
 0x1b9   : > { %5633 = vmatprep.subr.bf16.mxu0 %v7888_v4  ;;  %v7922_v4 = vld [vmem:[%s8897_s22 + $0xbf0] ss:$40 sps:$4 sm:$0xff]  }
 0x1ba   : > { %5675 = vmatpush2.bf16.msra.mxu1 %v7883_v5  ;;  %v9338_v5 = vld [vmem:[#allocation2 + $0x14] ss:$40 sps:$4 sm:$0xff]  }
 0x1bb   : > { %5676 = vmatprep.subr.bf16.mxu1 %v7891_v8  ;;  %v8547_v8 = vld [vmem:[#allocation2 + $0x8] ss:$40 sps:$4 sm:$0xff]  }
 0x1bc   : > { %5634 = vmatpush2.bf16.msra.mxu0 %v7886_v11  ;;  %v7930_v11 = vld [vmem:[%s8897_s22 + $0xba4] ss:$40 sps:$4 sm:$0xff]  }
 0x1bd   : > { %5635 = vmatprep.subr.bf16.mxu0 %v7894_v12  ;;  %v5349_v12 = vadd.f32 %v5348_v55, %v5306_v59  ;;  %v7984_v55 = vld [vmem:[%s8897_s22 + $0xdd4] ss:$40 sps:$4 sm:$0xff]   ;;  %v7990_v59 = vld [vmem:[%s8897_s22 + $0xd84] ss:$40 sps:$4 sm:$0xff]  }
 0x1be   : > { %5677 = vmatpush2.bf16.msra.mxu1 %v7889_v13 }
 0x1bf   : > { %5678 = vmatprep.subr.bf16.mxu1 %v7897_v18  ;;  %v7933_v18 = vld [vmem:[%s8897_s22 + $0x10a4] ss:$40 sps:$4 sm:$0xff]  }
 0x1c0   : > { %5636 = vmatpush2.bf16.msra.mxu0 %v7892_v21  ;;  %v5351_v21 = vadd.f32 %v5350_v6, %v5308_v1  ;;  %v7991_v1 = vld [vmem:[%s8897_s22 + $0x1280] ss:$40 sps:$4 sm:$0xff]   ;;  %v8002_v6 = vld [vmem:[%s8897_s22 + $0xce4] ss:$40 sps:$4 sm:$0xff]  }
 0x1c1   : > { %5637 = vmatprep.subr.bf16.mxu0 %v7900_v22 }
 0x1c2   : > { %5679 = vmatpush2.bf16.msra.mxu1 %v7895_v24  ;;  %v7928_v24 = vld [vmem:[%s8897_s22 + $0xba0] ss:$40 sps:$4 sm:$0xff]  }
 0x1c3   : > { %5680 = vmatprep.subr.bf16.mxu1 %v7903_v27 }
 0x1c4   : > { %5638 = vmatpush2.bf16.msra.mxu0 %v7898_v28  ;;  %v7939_v28 = vld [vmem:[%s8897_s22 + $0x1054] ss:$40 sps:$4 sm:$0xff]  }
 0x1c5   : > { %5639 = vmatprep.subr.bf16.mxu0 %v7906_v32  ;;  %v7942_v32 = vld [vmem:[%s8897_s22 + $0xb04] ss:$40 sps:$4 sm:$0xff]  }
 0x1c6   : > { %5681 = vmatpush2.bf16.msra.mxu1 %v7901_v31  ;;  %v7945_v31 = vld [vmem:[%s8897_s22 + $0x1004] ss:$40 sps:$4 sm:$0xff]  }
 0x1c7   : > { %5682 = vmatprep.subr.bf16.mxu1 %v7909_v33  ;;  %v7948_v33 = vld [vmem:[%s8897_s22 + $0xab4] ss:$40 sps:$4 sm:$0xff]  }
 0x1c8   : > { %5640 = vmatpush2.bf16.msra.mxu0 %v7904_v20  ;;  %v7951_v20 = vld [vmem:[%s8897_s22 + $0xfb4] ss:$40 sps:$4 sm:$0xff]  }
 0x1c9   : > { %5641 = vmatprep.subr.bf16.mxu0 %v7912_v36  ;;  %v7949_v36 = vld [vmem:[%s8897_s22 + $0xfb0] ss:$40 sps:$4 sm:$0xff]  }
 0x1ca   : > { %5683 = vmatpush2.bf16.msra.mxu1 %v7907_v37  ;;  %v7952_v37 = vld [vmem:[%s8897_s22 + $0xa60] ss:$40 sps:$4 sm:$0xff]  }
 0x1cb   : > { %5684 = vmatprep.subr.bf16.mxu1 %v7915_v38  ;;  %v7960_v38 = vld [vmem:[%s8897_s22 + $0xa14] ss:$40 sps:$4 sm:$0xff]  }
 0x1cc   : > { %5642 = vmatpush2.bf16.msra.mxu0 %v7910_v41  ;;  %v7958_v41 = vld [vmem:[%s8897_s22 + $0xa10] ss:$40 sps:$4 sm:$0xff]  }
 0x1cd   : > { %5697 = vmatprep.subr.bf16.mxu0 %v7918_v44  ;;  %v7969_v44 = vld [vmem:[%s8897_s22 + $0x13c4] ss:$40 sps:$4 sm:$0xff]  }
 0x1ce   : > { %5685 = vmatpush2.bf16.msra.mxu1 %v7913_v49  ;;  %v7975_v49 = vld [vmem:[%s8897_s22 + $0x1374] ss:$40 sps:$4 sm:$0xff]  }
 0x1cf   : > { %v5387_v61 = vpop.f32.mrf.mxu0  ;;  %5644 = vmatmul.mubr.bf16.vlgmr.msra.gmra.mxu0 %v9333_v62  ;;  %5740 = vmatprep.subr.bf16.mxu1 %v7921_v50  ;;  %v7970_v50 = vld [vmem:[%s8897_s22 + $0xe70] ss:$40 sps:$4 sm:$0xff]  }
 0x1d0   : > { %v5388_v2 = vadd.f32 %v5387_v61, %v5345_v58  ;;  %5698 = vmatpush1.bf16.msra.mxu0 %v7916_v53  ;;  %5729 = vmatprep.mubr.bf16.mxu0 %v9338_v5  ;;  %v7981_v53 = vld [vmem:[%s8897_s22 + $0x1324] ss:$40 sps:$4 sm:$0xff]   ;;  %v7982_v58 = vld [vmem:[%s8897_s22 + $0xdd0] ss:$40 sps:$4 sm:$0xff]  }
 0x1d1   : > { %v5389_v7 = vpop.f32.mrf.mxu0  ;;  %5687 = vmatmul.mubr.bf16.vlgmr.msra.gmra.mxu1 %v8547_v8  ;;  %5699 = vmatprep.subr.bf16.mxu0 %v7924_v56  ;;  %v7979_v56 = vld [vmem:[%s8897_s22 + $0x1320] ss:$40 sps:$4 sm:$0xff]   ;;  %v7993_v61 = vld [vmem:[%s8897_s22 + $0x1284] ss:$40 sps:$4 sm:$0xff]  }
 0x1d2   : > { %6256 = vst [vmem:[%s9344_s29] sm:$0xff] %v5388_v2  ;;  %v5390_v13 = vadd.f32 %v5389_v7, %v5347_v0  ;;  %5741 = vmatpush1.bf16.msra.mxu1 %v7919_v60  ;;  %5772 = vmatprep.mubr.bf16.mxu1 %v8548_v16  ;;  %v7985_v60 = vld [vmem:[%s8897_s22 + $0x12d0] ss:$40 sps:$4 sm:$0xff]   ;;  %v7996_v0 = vld [vmem:[%s8897_s22 + $0xd34] ss:$40 sps:$4 sm:$0xff]   ;;  %v8005_v8 = vld [vmem:[%s8897_s22 + $0x11e4] ss:$40 sps:$4 sm:$0xff]  }
 0x1d3   : > { %v5391_v17 = vpop.f32.mrf.mxu0  ;;  %5742 = vmatprep.subr.bf16.mxu1 %v7927_v63  ;;  %v7988_v63 = vld [vmem:[%s8897_s22 + $0xd80] ss:$40 sps:$4 sm:$0xff]   ;;  %v7999_v2 = vld [vmem:[%s8897_s22 + $0x1234] ss:$40 sps:$4 sm:$0xff]   ;;  %v7997_v7 = vld [vmem:[%s8897_s22 + $0x1230] ss:$40 sps:$4 sm:$0xff]  }
 0x1d4   : > { %6257 = vst [vmem:[%s9344_s29 + $0x8] sm:$0xff] %v5390_v13  ;;  %v5392_v22 = vadd.f32 %v5391_v17, %v5349_v12  ;;  %5700 = vmatpush1.bf16.msra.mxu0 %v7922_v4  ;;  %v7994_v4 = vld [vmem:[%s8897_s22 + $0xd30] ss:$40 sps:$4 sm:$0xff]   ;;  %v8008_v12 = vld [vmem:[%s8897_s22 + $0xc94] ss:$40 sps:$4 sm:$0xff]  }
 0x1d5   : > { %v5393_v25 = vpop.f32.mrf.mxu0  ;;  %5701 = vmatprep.subr.bf16.mxu0 %v7930_v11  ;;  %v8000_v11 = vld [vmem:[%s8897_s22 + $0xce0] ss:$40 sps:$4 sm:$0xff]   ;;  %v8006_v16 = vld [vmem:[%s8897_s22 + $0xc90] ss:$40 sps:$4 sm:$0xff]   ;;  %v8014_v17 = vld [vmem:[%s8897_s22 + $0x1644] ss:$40 sps:$4 sm:$0xff]  }
 0x1d6   : > { %6266 = vst [vmem:[%s9344_s29 + $0x50] sm:$0xff] %v5392_v22  ;;  %v5394_v27 = vadd.f32 %v5393_v25, %v5351_v21  ;;  %5743 = vmatpush1.bf16.msra.mxu1 %v7925_v14  ;;  %v8003_v13 = vld [vmem:[%s8897_s22 + $0x11e0] ss:$40 sps:$4 sm:$0xff]   ;;  %v8011_v14 = vld [vmem:[%s8897_s22 + $0x1194] ss:$40 sps:$4 sm:$0xff]  }
 0x1d7   : > { %5744 = vmatprep.subr.bf16.mxu1 %v7933_v18  ;;  %v8009_v18 = vld [vmem:[%s8897_s22 + $0x1190] ss:$40 sps:$4 sm:$0xff]   ;;  %v8017_v21 = vld [vmem:[%s8897_s22 + $0x24c] ss:$40 sps:$4 sm:$0xff]   ;;  %v8012_v22 = vld [vmem:[%s8897_s22 + $0x1640] ss:$40 sps:$4 sm:$0xff]  }
 0x1d8   : > { %6267 = vst [vmem:[%s9344_s29 + $0x58] sm:$0xff] %v5394_v27  ;;  %5702 = vmatpush1.bf16.msra.mxu0 %v7928_v24  ;;  %v8020_v24 = vld [vmem:[%s8897_s22 + $0x15f4] ss:$40 sps:$4 sm:$0xff]   ;;  %v8015_v25 = vld [vmem:[%s8897_s22 + $0x248] ss:$40 sps:$4 sm:$0xff]  }
 0x1d9   : > { %5703 = vmatprep.subr.bf16.mxu0 %v7936_v26  ;;  %v9411_v26 = vld [vmem:[#allocation2 + $0x10] ss:$40 sps:$4 sm:$0xff]   ;;  %v8023_v27 = vld [vmem:[%s8897_s22 + $0x1fc] ss:$40 sps:$4 sm:$0xff]  }
 0x1da   : > { %5745 = vmatpush1.bf16.msra.mxu1 %v7931_v3  ;;  %v8018_v3 = vld [vmem:[%s8897_s22 + $0x15f0] ss:$40 sps:$4 sm:$0xff]  }
 0x1db   : > { %5746 = vmatprep.subr.bf16.mxu1 %v7939_v28  ;;  %v9416_v28 = vld [vmem:[#allocation2 + $0x24] ss:$40 sps:$4 sm:$0xff]  }
 0x1dc   : > { %5704 = vmatpush1.bf16.msra.mxu0 %v7934_v29  ;;  %v9419_v29 = vld [vmem:[#allocation2 + $0x18] ss:$40 sps:$4 sm:$0xff]  }
 0x1dd   : > { %5705 = vmatprep.subr.bf16.mxu0 %v7942_v32  ;;  %v8026_v32 = vld [vmem:[%s8897_s22 + $0x15a4] ss:$40 sps:$4 sm:$0xff]  }
 0x1de   : > { %5747 = vmatpush1.bf16.msra.mxu1 %v7937_v30  ;;  %v8021_v30 = vld [vmem:[%s8897_s22 + $0x1f8] ss:$40 sps:$4 sm:$0xff]  }
 0x1df   : > { %5748 = vmatprep.subr.bf16.mxu1 %v7945_v31  ;;  %v9424_v31 = vld [vmem:[#allocation2 + $0x4] ss:$40 sps:$4 sm:$0xff]  }
 0x1e0   : > { %5706 = vmatpush1.bf16.msra.mxu0 %v7940_v9  ;;  %v8029_v9 = vld [vmem:[%s8897_s22 + $0x1ac] ss:$40 sps:$4 sm:$0xff]  }
 0x1e1   : > { %5707 = vmatprep.subr.bf16.mxu0 %v7948_v33  ;;  %v8024_v33 = vld [vmem:[%s8897_s22 + $0x15a0] ss:$40 sps:$4 sm:$0xff]  }
 0x1e2   : > { %5749 = vmatpush1.bf16.msra.mxu1 %v7943_v34  ;;  %v8032_v34 = vld [vmem:[%s8897_s22 + $0x1554] ss:$40 sps:$4 sm:$0xff]  }
 0x1e3   : > { %5750 = vmatprep.subr.bf16.mxu1 %v7951_v20  ;;  %v8027_v20 = vld [vmem:[%s8897_s22 + $0x1a8] ss:$40 sps:$4 sm:$0xff]  }
 0x1e4   : > { %5708 = vmatpush1.bf16.msra.mxu0 %v7946_v15  ;;  %v8035_v15 = vld [vmem:[%s8897_s22 + $0x15c] ss:$40 sps:$4 sm:$0xff]  }
 0x1e5   : > { %5709 = vmatprep.subr.bf16.mxu0 %v7954_v35  ;;  %v8030_v35 = vld [vmem:[%s8897_s22 + $0x1550] ss:$40 sps:$4 sm:$0xff]  }
 0x1e6   : > { %5751 = vmatpush1.bf16.msra.mxu1 %v7949_v36  ;;  %v8038_v36 = vld [vmem:[%s8897_s22 + $0x1504] ss:$40 sps:$4 sm:$0xff]  }
 0x1e7   : > { %5752 = vmatprep.subr.bf16.mxu1 %v7957_v23  ;;  %v8033_v23 = vld [vmem:[%s8897_s22 + $0x158] ss:$40 sps:$4 sm:$0xff]  }
 0x1e8   : > { %5710 = vmatpush1.bf16.msra.mxu0 %v7952_v37  ;;  %v8041_v37 = vld [vmem:[%s8897_s22 + $0x10c] ss:$40 sps:$4 sm:$0xff]  }
 0x1e9   : > { %5711 = vmatprep.subr.bf16.mxu0 %v7960_v38  ;;  %v8036_v38 = vld [vmem:[%s8897_s22 + $0x1500] ss:$40 sps:$4 sm:$0xff]  }
 0x1ea   : > { %5753 = vmatpush1.bf16.msra.mxu1 %v7955_v39  ;;  %v8044_v39 = vld [vmem:[%s8897_s22 + $0x14b4] ss:$40 sps:$4 sm:$0xff]  }
 0x1eb   : > { %5754 = vmatprep.subr.bf16.mxu1 %v7963_v40  ;;  %v8039_v40 = vld [vmem:[%s8897_s22 + $0x108] ss:$40 sps:$4 sm:$0xff]  }
 0x1ec   : > { %5712 = vmatpush1.bf16.msra.mxu0 %v7958_v41  ;;  %v8047_v41 = vld [vmem:[%s8897_s22 + $0xbc] ss:$40 sps:$4 sm:$0xff]  }
 0x1ed   : > { %5713 = vmatprep.subr.bf16.mxu0 %v7966_v42  ;;  %v8042_v42 = vld [vmem:[%s8897_s22 + $0x14b0] ss:$40 sps:$4 sm:$0xff]  }
 0x1ee   : > { %5755 = vmatpush1.bf16.msra.mxu1 %v7961_v43  ;;  %v8050_v43 = vld [vmem:[%s8897_s22 + $0x1464] ss:$40 sps:$4 sm:$0xff]  }
 0x1ef   : > { %5756 = vmatprep.subr.bf16.mxu1 %v7969_v44  ;;  %v8045_v44 = vld [vmem:[%s8897_s22 + $0xb8] ss:$40 sps:$4 sm:$0xff]  }
 0x1f0   : > { %5714 = vmatpush2.bf16.msra.mxu0 %v7964_v45  ;;  %v8053_v45 = vld [vmem:[%s8897_s22 + $0x6c] ss:$40 sps:$4 sm:$0xff]  }
 0x1f1   : > { %5715 = vmatprep.subr.bf16.mxu0 %v7972_v46  ;;  %v8048_v46 = vld [vmem:[%s8897_s22 + $0x1460] ss:$40 sps:$4 sm:$0xff]  }
 0x1f2   : > { %5757 = vmatpush2.bf16.msra.mxu1 %v7967_v48  ;;  %v8056_v48 = vld [vmem:[%s8897_s22 + $0x1414] ss:$40 sps:$4 sm:$0xff]  }
 0x1f3   : > { %5758 = vmatprep.subr.bf16.mxu1 %v7975_v49  ;;  %v8051_v49 = vld [vmem:[%s8897_s22 + $0x68] ss:$40 sps:$4 sm:$0xff]  }
 0x1f4   : > { %5716 = vmatpush2.bf16.msra.mxu0 %v7970_v50  ;;  %v8059_v50 = vld [vmem:[%s8897_s22 + $0x1c] ss:$40 sps:$4 sm:$0xff]  }
 0x1f5   : > { %5717 = vmatprep.subr.bf16.mxu0 %v7978_v51  ;;  %v8054_v51 = vld [vmem:[%s8897_s22 + $0x1410] ss:$40 sps:$4 sm:$0xff]  }
 0x1f6   : > { %5759 = vmatpush2.bf16.msra.mxu1 %v7973_v52  ;;  %v8062_v52 = vld [vmem:[%s8897_s22 + $0x18c4] ss:$40 sps:$4 sm:$0xff]  }
 0x1f7   : > { %5760 = vmatprep.subr.bf16.mxu1 %v7981_v53  ;;  %v8057_v53 = vld [vmem:[%s8897_s22 + $0x18] ss:$40 sps:$4 sm:$0xff]  }
 0x1f8   : > { %5718 = vmatpush2.bf16.msra.mxu0 %v7976_v54  ;;  %v8065_v54 = vld [vmem:[%s8897_s22 + $0x4cc] ss:$40 sps:$4 sm:$0xff]  }
 0x1f9   : > { %5719 = vmatprep.subr.bf16.mxu0 %v7984_v55  ;;  %v8060_v55 = vld [vmem:[%s8897_s22 + $0x18c0] ss:$40 sps:$4 sm:$0xff]  }
 0x1fa   : > { %5761 = vmatpush2.bf16.msra.mxu1 %v7979_v56  ;;  %v8068_v56 = vld [vmem:[%s8897_s22 + $0x1874] ss:$40 sps:$4 sm:$0xff]  }
 0x1fb   : > { %5762 = vmatprep.subr.bf16.mxu1 %v7987_v57  ;;  %v8063_v57 = vld [vmem:[%s8897_s22 + $0x4c8] ss:$40 sps:$4 sm:$0xff]  }
 0x1fc   : > { %5720 = vmatpush2.bf16.msra.mxu0 %v7982_v58  ;;  %v8071_v58 = vld [vmem:[%s8897_s22 + $0x47c] ss:$40 sps:$4 sm:$0xff]  }
 0x1fd   : > { %5721 = vmatprep.subr.bf16.mxu0 %v7990_v59  ;;  %v8066_v59 = vld [vmem:[%s8897_s22 + $0x1870] ss:$40 sps:$4 sm:$0xff]  }
 0x1fe   : > { %5763 = vmatpush2.bf16.msra.mxu1 %v7985_v60  ;;  %v8074_v60 = vld [vmem:[%s8897_s22 + $0x1824] ss:$40 sps:$4 sm:$0xff]  }
 0x1ff   : > { %5764 = vmatprep.subr.bf16.mxu1 %v7993_v61  ;;  %v8069_v61 = vld [vmem:[%s8897_s22 + $0x478] ss:$40 sps:$4 sm:$0xff]  }
 0x200   : > { %5722 = vmatpush2.bf16.msra.mxu0 %v7988_v63  ;;  %v5430_v63 = vpop.f32.mrf.mxu1 }
 0x201   : > { %5723 = vmatprep.subr.bf16.mxu0 %v7996_v0  ;;  %v8077_v0 = vld [vmem:[%s8897_s22 + $0x42c] ss:$40 sps:$4 sm:$0xff]  }
 0x202   : > { %5765 = vmatpush2.bf16.msra.mxu1 %v7991_v1  ;;  %v8072_v1 = vld [vmem:[%s8897_s22 + $0x1820] ss:$40 sps:$4 sm:$0xff]  }
 0x203   : > { %5766 = vmatprep.subr.bf16.mxu1 %v7999_v2  ;;  %v8080_v2 = vld [vmem:[%s8897_s22 + $0x17d4] ss:$40 sps:$4 sm:$0xff]  }
 0x204   : > { %5724 = vmatpush2.bf16.msra.mxu0 %v7994_v4  ;;  %v8075_v4 = vld [vmem:[%s8897_s22 + $0x428] ss:$40 sps:$4 sm:$0xff]  }
 0x205   : > { %5725 = vmatprep.subr.bf16.mxu0 %v8002_v6  ;;  %v5432_v6 = vpop.f32.mrf.mxu1 }
 0x206   : > { %5767 = vmatpush2.bf16.msra.mxu1 %v7997_v7  ;;  %v8083_v7 = vld [vmem:[%s8897_s22 + $0x3dc] ss:$40 sps:$4 sm:$0xff]  }
 0x207   : > { %5768 = vmatprep.subr.bf16.mxu1 %v8005_v8  ;;  %v8078_v8 = vld [vmem:[%s8897_s22 + $0x17d0] ss:$40 sps:$4 sm:$0xff]  }
 0x208   : > { %5726 = vmatpush2.bf16.msra.mxu0 %v8000_v11  ;;  %v8086_v11 = vld [vmem:[%s8897_s22 + $0x1784] ss:$40 sps:$4 sm:$0xff]  }
 0x209   : > { %5727 = vmatprep.subr.bf16.mxu0 %v8008_v12  ;;  %v8081_v12 = vld [vmem:[%s8897_s22 + $0x3d8] ss:$40 sps:$4 sm:$0xff]  }
 0x20a   : > { %5769 = vmatpush2.bf16.msra.mxu1 %v8003_v13  ;;  %v5434_v13 = vpop.f32.mrf.mxu1 }
 0x20b   : > { %5770 = vmatprep.subr.bf16.mxu1 %v8011_v14  ;;  %v8089_v14 = vld [vmem:[%s8897_s22 + $0x38c] ss:$40 sps:$4 sm:$0xff]  }
 0x20c   : > { %5728 = vmatpush2.bf16.msra.mxu0 %v8006_v16  ;;  %v8084_v16 = vld [vmem:[%s8897_s22 + $0x1780] ss:$40 sps:$4 sm:$0xff]  }
 0x20d   : > { %5783 = vmatprep.subr.bf16.mxu0 %v8014_v17  ;;  %v8092_v17 = vld [vmem:[%s8897_s22 + $0x1734] ss:$40 sps:$4 sm:$0xff]  }
 0x20e   : > { %5771 = vmatpush2.bf16.msra.mxu1 %v8009_v18  ;;  %v1091_v18 = vsub.s32 2, %v9298_v10 }
 0x20f   : > { %5730 = vmatmul.mubr.bf16.vlgmr.msra.gmra.mxu0 %v9411_v26  ;;  %5826 = vmatprep.subr.bf16.mxu1 %v8017_v21  ;;  %v8087_v21 = vld [vmem:[%s8897_s22 + $0x388] ss:$40 sps:$4 sm:$0xff]  }
 0x210   : > { %5784 = vmatpush1.bf16.msra.mxu0 %v8012_v22  ;;  %5815 = vmatprep.mubr.bf16.mxu0 %v9416_v28  ;;  %v5436_v22 = vpop.f32.mrf.mxu1 }
 0x211   : > { %5773 = vmatmul.mubr.bf16.vlgmr.msra.gmra.mxu1 %v9419_v29  ;;  %5785 = vmatprep.subr.bf16.mxu0 %v8020_v24  ;;  %v8095_v24 = vld [vmem:[%s8897_s22 + $0x33c] ss:$40 sps:$4 sm:$0xff]  }
 0x212   : > { %5827 = vmatpush1.bf16.msra.mxu1 %v8015_v25  ;;  %5858 = vmatprep.mubr.bf16.mxu1 %v9424_v31  ;;  %v1095_v25 = vsub.s32 3, %v9298_v10 }
 0x213   : > { %5828 = vmatprep.subr.bf16.mxu1 %v8023_v27  ;;  %v8090_v27 = vld [vmem:[%s8897_s22 + $0x1730] ss:$40 sps:$4 sm:$0xff]  }
 0x214   : > { %5786 = vmatpush1.bf16.msra.mxu0 %v8018_v3  ;;  %v5473_v3 = vpop.f32.mrf.mxu0 }
 0x215   : > { %5787 = vmatprep.subr.bf16.mxu0 %v8026_v32  ;;  %v8098_v32 = vld [vmem:[%s8897_s22 + $0x16e4] ss:$40 sps:$4 sm:$0xff]  }
 0x216   : > { %5829 = vmatpush1.bf16.msra.mxu1 %v8021_v30  ;;  %v9477_v30 = vld [vmem:[%s9303_s20] sm:$0xff] }
 0x217   : > { %5830 = vmatprep.subr.bf16.mxu1 %v8029_v9  ;;  %v1092_v9 = vrot.slane %v9477_v30, %v1091_v18 }
 0x218   : > { %5788 = vmatpush1.bf16.msra.mxu0 %v8024_v33  ;;  %v8093_v33 = vld [vmem:[%s8897_s22 + $0x338] ss:$40 sps:$4 sm:$0xff]  }
 0x219   : > { %5789 = vmatprep.subr.bf16.mxu0 %v8032_v34  ;;  %v5516_v34 = vpop.f32.mrf.mxu1 }
 0x21a   : > { %5831 = vmatpush1.bf16.msra.mxu1 %v8027_v20  ;;  %v8101_v20 = vld [vmem:[%s8897_s22 + $0x2ec] ss:$40 sps:$4 sm:$0xff]  }
 0x21b   : > { %5832 = vmatprep.subr.bf16.mxu1 %v8035_v15  ;;  %v1096_v15 = vrot.slane %v9477_v30, %v1095_v25  ;;  %v8120_v25 = vld [vmem:[%s8897_s22 + $0x6a8] ss:$40 sps:$4 sm:$0xff]  }
 0x21c   : > { %5790 = vmatpush1.bf16.msra.mxu0 %v8030_v35  ;;  %v8096_v35 = vld [vmem:[%s8897_s22 + $0x16e0] ss:$40 sps:$4 sm:$0xff]  }
 0x21d   : > { %5791 = vmatprep.subr.bf16.mxu0 %v8038_v36  ;;  %v5475_v36 = vpop.f32.mrf.mxu0 }
 0x21e   : > { %5833 = vmatpush1.bf16.msra.mxu1 %v8033_v23  ;;  %v8104_v23 = vld [vmem:[%s8897_s22 + $0x1694] ss:$40 sps:$4 sm:$0xff]  }
 0x21f   : > { %5834 = vmatprep.subr.bf16.mxu1 %v8041_v37  ;;  %v5431_v37 = vadd.f32 %v5430_v63, %v1092_v9  ;;  %v8119_v63 = vld [vmem:[%s8897_s22 + $0xbfc] ss:$40 sps:$4 sm:$0xff]  }
 0x220   : > { %5792 = vmatpush1.bf16.msra.mxu0 %v8036_v38  ;;  %v8099_v38 = vld [vmem:[%s8897_s22 + $0x2e8] ss:$40 sps:$4 sm:$0xff]  }
 0x221   : > { %5793 = vmatprep.subr.bf16.mxu0 %v8044_v39  ;;  %v5518_v39 = vpop.f32.mrf.mxu1 }
 0x222   : > { %5835 = vmatpush1.bf16.msra.mxu1 %v8039_v40  ;;  %v8107_v40 = vld [vmem:[%s8897_s22 + $0x29c] ss:$40 sps:$4 sm:$0xff]  }
 0x223   : > { %5836 = vmatprep.subr.bf16.mxu1 %v8047_v41  ;;  %v5433_v41 = vadd.f32 %v5432_v6, %v1096_v15  ;;  %v9499_v6 = vld [vmem:[#allocation2 + $0xc] ss:$40 sps:$4 sm:$0xff]  }
 0x224   : > { %5794 = vmatpush1.bf16.msra.mxu0 %v8042_v42  ;;  %v8102_v42 = vld [vmem:[%s8897_s22 + $0x1690] ss:$40 sps:$4 sm:$0xff]  }
 0x225   : > { %5795 = vmatprep.subr.bf16.mxu0 %v8050_v43  ;;  %v5477_v43 = vpop.f32.mrf.mxu0 }
 0x226   : > { %5837 = vmatpush1.bf16.msra.mxu1 %v8045_v44  ;;  %v8110_v44 = vld [vmem:[%s8897_s22 + $0x74c] ss:$40 sps:$4 sm:$0xff]  }
 0x227   : > { %5838 = vmatprep.subr.bf16.mxu1 %v8053_v45  ;;  %v5474_v45 = vadd.f32 %v5473_v3, %v5431_v37  ;;  %v8137_v37 = vld [vmem:[%s8897_s22 + $0xb0c] ss:$40 sps:$4 sm:$0xff]  }
 0x228   : > { %5796 = vmatpush1.bf16.msra.mxu0 %v8048_v46  ;;  %v8105_v46 = vld [vmem:[%s8897_s22 + $0x298] ss:$40 sps:$4 sm:$0xff]  }
 0x229   : > { %5797 = vmatprep.subr.bf16.mxu0 %v8056_v48  ;;  %v5520_v48 = vpop.f32.mrf.mxu1 }
 0x22a   : > { %5839 = vmatpush1.bf16.msra.mxu1 %v8051_v49  ;;  %v8113_v49 = vld [vmem:[%s8897_s22 + $0xc4c] ss:$40 sps:$4 sm:$0xff]  }
 0x22b   : > { %5840 = vmatprep.subr.bf16.mxu1 %v8059_v50  ;;  %v5435_v50 = vadd.f32 %v5434_v13, %v1092_v9 }
 0x22c   : > { %5798 = vmatpush1.bf16.msra.mxu0 %v8054_v51  ;;  %v5476_v51 = vadd.f32 %v5475_v36, %v5433_v41  ;;  %v8134_v36 = vld [vmem:[%s8897_s22 + $0x60c] ss:$40 sps:$4 sm:$0xff]   ;;  %v8143_v41 = vld [vmem:[%s8897_s22 + $0xabc] ss:$40 sps:$4 sm:$0xff]  }
 0x22d   : > { %5799 = vmatprep.subr.bf16.mxu0 %v8062_v52  ;;  %v8108_v52 = vld [vmem:[%s8897_s22 + $0x748] ss:$40 sps:$4 sm:$0xff]  }
 0x22e   : > { %5841 = vmatpush1.bf16.msra.mxu1 %v8057_v53  ;;  %v5479_v53 = vpop.f32.mrf.mxu0 }
 0x22f   : > { %5842 = vmatprep.subr.bf16.mxu1 %v8065_v54  ;;  %v8116_v54 = vld [vmem:[%s8897_s22 + $0x6fc] ss:$40 sps:$4 sm:$0xff]  }
 0x230   : > { %5800 = vmatpush2.bf16.msra.mxu0 %v8060_v55  ;;  %v5437_v55 = vadd.f32 %v5436_v22, %v1096_v15 }
 0x231   : > { %5801 = vmatprep.subr.bf16.mxu0 %v8068_v56  ;;  %v5517_v56 = vadd.f32 %v5516_v34, %v5474_v45  ;;  %v8149_v45 = vld [vmem:[%s8897_s22 + $0xa6c] ss:$40 sps:$4 sm:$0xff]  }
 0x232   : > { %5843 = vmatpush2.bf16.msra.mxu1 %v8063_v57  ;;  %v5478_v57 = vadd.f32 %v5477_v43, %v5435_v50  ;;  %v8146_v43 = vld [vmem:[%s8897_s22 + $0x56c] ss:$40 sps:$4 sm:$0xff]   ;;  %v8155_v50 = vld [vmem:[%s8897_s22 + $0xa1c] ss:$40 sps:$4 sm:$0xff]  }
 0x233   : > { %5844 = vmatprep.subr.bf16.mxu1 %v8071_v58  ;;  %v8111_v58 = vld [vmem:[%s8897_s22 + $0xc48] ss:$40 sps:$4 sm:$0xff]  }
 0x234   : > { %5802 = vmatpush2.bf16.msra.mxu0 %v8066_v59  ;;  %v5522_v59 = vpop.f32.mrf.mxu1 }
 0x235   : > { %5803 = vmatprep.subr.bf16.mxu0 %v8074_v60 }
 0x236   : > { %5845 = vmatpush2.bf16.msra.mxu1 %v8069_v61  ;;  %v9494_v61 = vld [vmem:[#allocation2 + $0x20] ss:$40 sps:$4 sm:$0xff]  }
 0x237   : > { %5846 = vmatprep.subr.bf16.mxu1 %v8077_v0  ;;  %v5519_v0 = vadd.f32 %v5518_v39, %v5476_v51  ;;  %v8140_v39 = vld [vmem:[%s8897_s22 + $0x5bc] ss:$40 sps:$4 sm:$0xff]   ;;  %v8150_v51 = vld [vmem:[%s8897_s22 + $0x518] ss:$40 sps:$4 sm:$0xff]  }
 0x238   : > { %5804 = vmatpush2.bf16.msra.mxu0 %v8072_v1  ;;  %v5480_v1 = vadd.f32 %v5479_v53, %v5437_v55  ;;  %v8153_v53 = vld [vmem:[%s8897_s22 + $0xa18] ss:$40 sps:$4 sm:$0xff]   ;;  %v8156_v55 = vld [vmem:[%s8897_s22 + $0x9c8] ss:$40 sps:$4 sm:$0xff]  }
 0x239   : > { %5805 = vmatprep.subr.bf16.mxu0 %v8080_v2 }
 0x23a   : > { %5847 = vmatpush2.bf16.msra.mxu1 %v8075_v4  ;;  %v8114_v4 = vld [vmem:[%s8897_s22 + $0x6f8] ss:$40 sps:$4 sm:$0xff]   ;;  %v5523_v22 = vadd.f32 %v5522_v59, %v5480_v1  ;;  %v8168_v1 = vld [vmem:[%s8897_s22 + $0x928] ss:$40 sps:$4 sm:$0xff]  }
 0x23b   : > { %5848 = vmatprep.subr.bf16.mxu1 %v8083_v7  ;;  %v8162_v59 = vld [vmem:[%s8897_s22 + $0x978] ss:$40 sps:$4 sm:$0xff]  }
 0x23c   : > { %5806 = vmatpush2.bf16.msra.mxu0 %v8078_v8 }
 0x23d   : > { %5807 = vmatprep.subr.bf16.mxu0 %v8086_v11  ;;  %v8122_v11 = vld [vmem:[%s8897_s22 + $0x6ac] ss:$40 sps:$4 sm:$0xff]  }
 0x23e   : > { %5849 = vmatpush2.bf16.msra.mxu1 %v8081_v12  ;;  %v5521_v12 = vadd.f32 %v5520_v48, %v5478_v57  ;;  %v8152_v48 = vld [vmem:[%s8897_s22 + $0x51c] ss:$40 sps:$4 sm:$0xff]   ;;  %v8159_v57 = vld [vmem:[%s8897_s22 + $0xec8] ss:$40 sps:$4 sm:$0xff]  }
 0x23f   : > { %5850 = vmatprep.subr.bf16.mxu1 %v8089_v14 }
 0x240   : > { %5808 = vmatpush2.bf16.msra.mxu0 %v8084_v16  ;;  %v8117_v16 = vld [vmem:[%s8897_s22 + $0xbf8] ss:$40 sps:$4 sm:$0xff]  }
 0x241   : > { %5809 = vmatprep.subr.bf16.mxu0 %v8092_v17 }
 0x242   : > { %5851 = vmatpush2.bf16.msra.mxu1 %v8087_v21  ;;  %v8125_v21 = vld [vmem:[%s8897_s22 + $0xbac] ss:$40 sps:$4 sm:$0xff]  }
 0x243   : > { %5852 = vmatprep.subr.bf16.mxu1 %v8095_v24 }
 0x244   : > { %5810 = vmatpush2.bf16.msra.mxu0 %v8090_v27 }
 0x245   : > { %5811 = vmatprep.subr.bf16.mxu0 %v8098_v32 }
 0x246   : > { %5853 = vmatpush2.bf16.msra.mxu1 %v8093_v33  ;;  %v8123_v33 = vld [vmem:[%s8897_s22 + $0xba8] ss:$40 sps:$4 sm:$0xff]  }
 0x247   : > { %5854 = vmatprep.subr.bf16.mxu1 %v8101_v20  ;;  %v8131_v20 = vld [vmem:[%s8897_s22 + $0xb5c] ss:$40 sps:$4 sm:$0xff]  }
 0x248   : > { %5812 = vmatpush2.bf16.msra.mxu0 %v8096_v35  ;;  %v8126_v35 = vld [vmem:[%s8897_s22 + $0x658] ss:$40 sps:$4 sm:$0xff]  }
 0x249   : > { %5813 = vmatprep.subr.bf16.mxu0 %v8104_v23  ;;  %v8129_v23 = vld [vmem:[%s8897_s22 + $0xb58] ss:$40 sps:$4 sm:$0xff]  }
 0x24a   : > { %5855 = vmatpush2.bf16.msra.mxu1 %v8099_v38  ;;  %v8132_v38 = vld [vmem:[%s8897_s22 + $0x608] ss:$40 sps:$4 sm:$0xff]  }
 0x24b   : > { %5856 = vmatprep.subr.bf16.mxu1 %v8107_v40  ;;  %v8135_v40 = vld [vmem:[%s8897_s22 + $0xb08] ss:$40 sps:$4 sm:$0xff]  }
 0x24c   : > { %5814 = vmatpush2.bf16.msra.mxu0 %v8102_v42  ;;  %v8138_v42 = vld [vmem:[%s8897_s22 + $0x5b8] ss:$40 sps:$4 sm:$0xff]  }
 0x24d   : > { %5869 = vmatprep.subr.bf16.mxu0 %v8110_v44  ;;  %v8141_v44 = vld [vmem:[%s8897_s22 + $0xab8] ss:$40 sps:$4 sm:$0xff]  }
 0x24e   : > { %5857 = vmatpush2.bf16.msra.mxu1 %v8105_v46  ;;  %v8144_v46 = vld [vmem:[%s8897_s22 + $0x568] ss:$40 sps:$4 sm:$0xff]  }
 0x24f   : > { %v5559_v60 = vpop.f32.mrf.mxu0  ;;  %5816 = vmatmul.mubr.bf16.vlgmr.msra.gmra.mxu0 %v9494_v61  ;;  %5912 = vmatprep.subr.bf16.mxu1 %v8113_v49  ;;  %v8147_v49 = vld [vmem:[%s8897_s22 + $0xa68] ss:$40 sps:$4 sm:$0xff]  }
 0x250   : > { %v5560_v2 = vadd.f32 %v5559_v60, %v5517_v56  ;;  %5870 = vmatpush1.bf16.msra.mxu0 %v8108_v52  ;;  %5901 = vmatprep.mubr.bf16.mxu0 %v9499_v6  ;;  %v8158_v52 = vld [vmem:[%s8897_s22 + $0x9cc] ss:$40 sps:$4 sm:$0xff]   ;;  %v8164_v56 = vld [vmem:[%s8897_s22 + $0x97c] ss:$40 sps:$4 sm:$0xff]  }
 0x251   : > { %v5561_v7 = vpop.f32.mrf.mxu0  ;;  %v5602_v8 = vpop.f32.mrf.mxu1  ;;  %5859 = vmatmul.mubr.bf16.vlgmr.msra.gmra.mxu1 %v9333_v62  ;;  %5871 = vmatprep.subr.bf16.mxu0 %v8116_v54  ;;  %v8161_v54 = vld [vmem:[%s8897_s22 + $0xecc] ss:$40 sps:$4 sm:$0xff]  }
 0x252   : > { %v5562_v13 = vadd.f32 %v5561_v7, %v5519_v0  ;;  %v5603_v14 = vadd.f32 %v5602_v8, %v5560_v2  ;;  %5913 = vmatpush1.bf16.msra.mxu1 %v8111_v58  ;;  %5944 = vmatprep.mubr.bf16.mxu1 %v9338_v5  ;;  %v8128_v5 = vld [vmem:[%s8897_s22 + $0x65c] ss:$40 sps:$4 sm:$0xff]   ;;  %v8170_v60 = vld [vmem:[%s8897_s22 + $0x92c] ss:$40 sps:$4 sm:$0xff]   ;;  %v8174_v8 = vld [vmem:[%s8897_s22 + $0x8d8] ss:$40 sps:$4 sm:$0xff]  }
 0x253   : > { %v5563_v17 = vpop.f32.mrf.mxu0  ;;  %v5604_v18 = vpop.f32.mrf.mxu1  ;;  %5914 = vmatprep.subr.bf16.mxu1 %v8119_v63  ;;  %v8167_v58 = vld [vmem:[%s8897_s22 + $0xe7c] ss:$40 sps:$4 sm:$0xff]   ;;  %v8165_v63 = vld [vmem:[%s8897_s22 + $0xe78] ss:$40 sps:$4 sm:$0xff]   ;;  %v8173_v0 = vld [vmem:[%s8897_s22 + $0xe2c] ss:$40 sps:$4 sm:$0xff]  }
 0x254   : > { %6258 = vst [vmem:[%s9344_s29 + $0x10] sm:$0xff] %v5603_v14  ;;  %v5564_v62 = vadd.f32 %v5563_v17, %v5521_v12  ;;  %v5605_v24 = vadd.f32 %v5604_v18, %v5562_v13  ;;  %5872 = vmatpush1.bf16.msra.mxu0 %v8114_v4  ;;  %v8176_v2 = vld [vmem:[%s8897_s22 + $0x8dc] ss:$40 sps:$4 sm:$0xff]   ;;  %v8171_v4 = vld [vmem:[%s8897_s22 + $0xe28] ss:$40 sps:$4 sm:$0xff]  }
 0x255   : > { %v5565_v27 = vpop.f32.mrf.mxu0  ;;  %v5606_v3 = vpop.f32.mrf.mxu1  ;;  %5873 = vmatprep.subr.bf16.mxu0 %v8122_v11  ;;  %v8179_v7 = vld [vmem:[%s8897_s22 + $0xddc] ss:$40 sps:$4 sm:$0xff]   ;;  %v8182_v11 = vld [vmem:[%s8897_s22 + $0x88c] ss:$40 sps:$4 sm:$0xff]   ;;  %v8177_v12 = vld [vmem:[%s8897_s22 + $0xdd8] ss:$40 sps:$4 sm:$0xff]  }
 0x256   : > { %6259 = vst [vmem:[%s9344_s29 + $0x18] sm:$0xff] %v5605_v24  ;;  %v5566_v32 = vadd.f32 %v5565_v27, %v5523_v22  ;;  %v5607_v9 = vadd.f32 %v5606_v3, %v5564_v62  ;;  %5915 = vmatpush1.bf16.msra.mxu1 %v8117_v16  ;;  %v8185_v13 = vld [vmem:[%s8897_s22 + $0xd8c] ss:$40 sps:$4 sm:$0xff]   ;;  %v8180_v14 = vld [vmem:[%s8897_s22 + $0x888] ss:$40 sps:$4 sm:$0xff]  }
 0x257   : > { %v5608_v34 = vpop.f32.mrf.mxu1  ;;  %5916 = vmatprep.subr.bf16.mxu1 %v8125_v21  ;;  %v8188_v16 = vld [vmem:[%s8897_s22 + $0x83c] ss:$40 sps:$4 sm:$0xff]   ;;  %v8183_v17 = vld [vmem:[%s8897_s22 + $0xd88] ss:$40 sps:$4 sm:$0xff]   ;;  %v8186_v21 = vld [vmem:[%s8897_s22 + $0x838] ss:$40 sps:$4 sm:$0xff]  }
 0x258   : > { %6268 = vst [vmem:[%s9344_s29 + $0x60] sm:$0xff] %v5607_v9  ;;  %v5609_v15 = vadd.f32 %v5608_v34, %v5566_v32  ;;  %5874 = vmatpush1.bf16.msra.mxu0 %v8120_v25  ;;  %v8191_v18 = vld [vmem:[%s8897_s22 + $0xd3c] ss:$40 sps:$4 sm:$0xff]   ;;  %v8194_v22 = vld [vmem:[%s8897_s22 + $0x7ec] ss:$40 sps:$4 sm:$0xff]  }
 0x259   : > { %5875 = vmatprep.subr.bf16.mxu0 %v8128_v5  ;;  %v8189_v62 = vld [vmem:[%s8897_s22 + $0xd38] ss:$40 sps:$4 sm:$0xff]   ;;  %v8197_v24 = vld [vmem:[%s8897_s22 + $0xcec] ss:$40 sps:$4 sm:$0xff]   ;;  %v8192_v25 = vld [vmem:[%s8897_s22 + $0x7e8] ss:$40 sps:$4 sm:$0xff]  }
 0x25a   : > { %6269 = vst [vmem:[%s9344_s29 + $0x68] sm:$0xff] %v5609_v15  ;;  %5917 = vmatpush1.bf16.msra.mxu1 %v8123_v33  ;;  %v8200_v27 = vld [vmem:[%s8897_s22 + $0x79c] ss:$40 sps:$4 sm:$0xff]   ;;  %v8195_v3 = vld [vmem:[%s8897_s22 + $0xce8] ss:$40 sps:$4 sm:$0xff]  }
 0x25b   : > { %5918 = vmatprep.subr.bf16.mxu1 %v8131_v20  ;;  %v8203_v5 = vld [vmem:[%s8897_s22 + $0xc9c] ss:$40 sps:$4 sm:$0xff]   ;;  %v8198_v32 = vld [vmem:[%s8897_s22 + $0x798] ss:$40 sps:$4 sm:$0xff]   ;;  %v8206_v9 = vld [vmem:[%s8897_s22 + $0x114c] ss:$40 sps:$4 sm:$0xff]  }
 0x25c   : > { %5876 = vmatpush1.bf16.msra.mxu0 %v8126_v35  ;;  %v8201_v33 = vld [vmem:[%s8897_s22 + $0xc98] ss:$40 sps:$4 sm:$0xff]   ;;  %v8209_v34 = vld [vmem:[%s8897_s22 + $0x164c] ss:$40 sps:$4 sm:$0xff]   ;;  %v8204_v20 = vld [vmem:[%s8897_s22 + $0x1148] ss:$40 sps:$4 sm:$0xff]  }
 0x25d   : > { %5877 = vmatprep.subr.bf16.mxu0 %v8134_v36  ;;  %v8212_v15 = vld [vmem:[%s8897_s22 + $0x10fc] ss:$40 sps:$4 sm:$0xff]   ;;  %v8207_v35 = vld [vmem:[%s8897_s22 + $0x1648] ss:$40 sps:$4 sm:$0xff]   ;;  %v9570_v36 = vld [vmem:[#allocation2 + $0x8] ss:$40 sps:$4 sm:$0xff]  }
 0x25e   : > { %5919 = vmatpush1.bf16.msra.mxu1 %v8129_v23  ;;  %v8215_v23 = vld [vmem:[%s8897_s22 + $0x15fc] ss:$40 sps:$4 sm:$0xff]  }
 0x25f   : > { %5920 = vmatprep.subr.bf16.mxu1 %v8137_v37  ;;  %v8210_v37 = vld [vmem:[%s8897_s22 + $0x10f8] ss:$40 sps:$4 sm:$0xff]  }
 0x260   : > { %5878 = vmatpush1.bf16.msra.mxu0 %v8132_v38  ;;  %v9575_v38 = vld [vmem:[#allocation2 + $0x1c] ss:$40 sps:$4 sm:$0xff]  }
 0x261   : > { %5879 = vmatprep.subr.bf16.mxu0 %v8140_v39  ;;  %v8218_v39 = vld [vmem:[%s8897_s22 + $0x10ac] ss:$40 sps:$4 sm:$0xff]  }
 0x262   : > { %5921 = vmatpush1.bf16.msra.mxu1 %v8135_v40  ;;  %v8213_v40 = vld [vmem:[%s8897_s22 + $0x15f8] ss:$40 sps:$4 sm:$0xff]  }
 0x263   : > { %5922 = vmatprep.subr.bf16.mxu1 %v8143_v41  ;;  %v8221_v41 = vld [vmem:[%s8897_s22 + $0x15ac] ss:$40 sps:$4 sm:$0xff]  }
 0x264   : > { %5880 = vmatpush1.bf16.msra.mxu0 %v8138_v42  ;;  %v8216_v42 = vld [vmem:[%s8897_s22 + $0x10a8] ss:$40 sps:$4 sm:$0xff]  }
 0x265   : > { %5881 = vmatprep.subr.bf16.mxu0 %v8146_v43  ;;  %v8224_v43 = vld [vmem:[%s8897_s22 + $0x105c] ss:$40 sps:$4 sm:$0xff]  }
 0x266   : > { %5923 = vmatpush1.bf16.msra.mxu1 %v8141_v44  ;;  %v8227_v44 = vld [vmem:[%s8897_s22 + $0x155c] ss:$40 sps:$4 sm:$0xff]  }
 0x267   : > { %5924 = vmatprep.subr.bf16.mxu1 %v8149_v45  ;;  %v8222_v45 = vld [vmem:[%s8897_s22 + $0x1058] ss:$40 sps:$4 sm:$0xff]  }
 0x268   : > { %5882 = vmatpush1.bf16.msra.mxu0 %v8144_v46  ;;  %v8225_v46 = vld [vmem:[%s8897_s22 + $0x1558] ss:$40 sps:$4 sm:$0xff]  }
 0x269   : > { %5883 = vmatprep.subr.bf16.mxu0 %v8152_v48  ;;  %v8233_v48 = vld [vmem:[%s8897_s22 + $0x150c] ss:$40 sps:$4 sm:$0xff]  }
 0x26a   : > { %5925 = vmatpush1.bf16.msra.mxu1 %v8147_v49  ;;  %v8228_v49 = vld [vmem:[%s8897_s22 + $0x1008] ss:$40 sps:$4 sm:$0xff]  }
 0x26b   : > { %5926 = vmatprep.subr.bf16.mxu1 %v8155_v50  ;;  %v8236_v50 = vld [vmem:[%s8897_s22 + $0xfbc] ss:$40 sps:$4 sm:$0xff]  }
 0x26c   : > { %5884 = vmatpush1.bf16.msra.mxu0 %v8150_v51  ;;  %v8231_v51 = vld [vmem:[%s8897_s22 + $0x1508] ss:$40 sps:$4 sm:$0xff]  }
 0x26d   : > { %5885 = vmatprep.subr.bf16.mxu0 %v8158_v52  ;;  %v8239_v52 = vld [vmem:[%s8897_s22 + $0x14bc] ss:$40 sps:$4 sm:$0xff]  }
 0x26e   : > { %5927 = vmatpush1.bf16.msra.mxu1 %v8153_v53  ;;  %v8234_v53 = vld [vmem:[%s8897_s22 + $0xfb8] ss:$40 sps:$4 sm:$0xff]  }
 0x26f   : > { %5928 = vmatprep.subr.bf16.mxu1 %v8161_v54  ;;  %v8242_v54 = vld [vmem:[%s8897_s22 + $0xf6c] ss:$40 sps:$4 sm:$0xff]  }
 0x270   : > { %5886 = vmatpush2.bf16.msra.mxu0 %v8156_v55  ;;  %v8237_v55 = vld [vmem:[%s8897_s22 + $0x14b8] ss:$40 sps:$4 sm:$0xff]  }
 0x271   : > { %5887 = vmatprep.subr.bf16.mxu0 %v8164_v56  ;;  %v8245_v56 = vld [vmem:[%s8897_s22 + $0x146c] ss:$40 sps:$4 sm:$0xff]  }
 0x272   : > { %5929 = vmatpush2.bf16.msra.mxu1 %v8159_v57  ;;  %v8240_v57 = vld [vmem:[%s8897_s22 + $0xf68] ss:$40 sps:$4 sm:$0xff]  }
 0x273   : > { %5930 = vmatprep.subr.bf16.mxu1 %v8167_v58  ;;  %v8248_v58 = vld [vmem:[%s8897_s22 + $0xf1c] ss:$40 sps:$4 sm:$0xff]  }
 0x274   : > { %5888 = vmatpush2.bf16.msra.mxu0 %v8162_v59  ;;  %v8243_v59 = vld [vmem:[%s8897_s22 + $0x1468] ss:$40 sps:$4 sm:$0xff]  }
 0x275   : > { %5889 = vmatprep.subr.bf16.mxu0 %v8170_v60  ;;  %v8251_v60 = vld [vmem:[%s8897_s22 + $0x141c] ss:$40 sps:$4 sm:$0xff]  }
 0x276   : > { %5931 = vmatpush2.bf16.msra.mxu1 %v8165_v63  ;;  %v8246_v63 = vld [vmem:[%s8897_s22 + $0xf18] ss:$40 sps:$4 sm:$0xff]  }
 0x277   : > { %5932 = vmatprep.subr.bf16.mxu1 %v8173_v0  ;;  %v8254_v0 = vld [vmem:[%s8897_s22 + $0x13cc] ss:$40 sps:$4 sm:$0xff]  }
 0x278   : > { %5890 = vmatpush2.bf16.msra.mxu0 %v8168_v1  ;;  %v8249_v1 = vld [vmem:[%s8897_s22 + $0x1418] ss:$40 sps:$4 sm:$0xff]  }
 0x279   : > { %5891 = vmatprep.subr.bf16.mxu0 %v8176_v2  ;;  %v8257_v2 = vld [vmem:[%s8897_s22 + $0x18cc] ss:$40 sps:$4 sm:$0xff]  }
 0x27a   : > { %5933 = vmatpush2.bf16.msra.mxu1 %v8171_v4  ;;  %v8252_v4 = vld [vmem:[%s8897_s22 + $0x13c8] ss:$40 sps:$4 sm:$0xff]  }
 0x27b   : > { %5934 = vmatprep.subr.bf16.mxu1 %v8179_v7  ;;  %v8260_v7 = vld [vmem:[%s8897_s22 + $0x137c] ss:$40 sps:$4 sm:$0xff]  }
 0x27c   : > { %5892 = vmatpush2.bf16.msra.mxu0 %v8174_v8  ;;  %v8255_v8 = vld [vmem:[%s8897_s22 + $0x18c8] ss:$40 sps:$4 sm:$0xff]  }
 0x27d   : > { %5893 = vmatprep.subr.bf16.mxu0 %v8182_v11  ;;  %v8263_v11 = vld [vmem:[%s8897_s22 + $0x187c] ss:$40 sps:$4 sm:$0xff]  }
 0x27e   : > { %5935 = vmatpush2.bf16.msra.mxu1 %v8177_v12  ;;  %v8258_v12 = vld [vmem:[%s8897_s22 + $0x1378] ss:$40 sps:$4 sm:$0xff]  }
 0x27f   : > { %5936 = vmatprep.subr.bf16.mxu1 %v8185_v13  ;;  %v8266_v13 = vld [vmem:[%s8897_s22 + $0x132c] ss:$40 sps:$4 sm:$0xff]  }
 0x280   : > { %5894 = vmatpush2.bf16.msra.mxu0 %v8180_v14  ;;  %v8261_v14 = vld [vmem:[%s8897_s22 + $0x1878] ss:$40 sps:$4 sm:$0xff]  }
 0x281   : > { %5895 = vmatprep.subr.bf16.mxu0 %v8188_v16  ;;  %v8269_v16 = vld [vmem:[%s8897_s22 + $0x182c] ss:$40 sps:$4 sm:$0xff]  }
 0x282   : > { %5937 = vmatpush2.bf16.msra.mxu1 %v8183_v17  ;;  %v8264_v17 = vld [vmem:[%s8897_s22 + $0x1328] ss:$40 sps:$4 sm:$0xff]  }
 0x283   : > { %5938 = vmatprep.subr.bf16.mxu1 %v8191_v18  ;;  %v8272_v18 = vld [vmem:[%s8897_s22 + $0x12dc] ss:$40 sps:$4 sm:$0xff]  }
 0x284   : > { %5896 = vmatpush2.bf16.msra.mxu0 %v8186_v21  ;;  %v8267_v21 = vld [vmem:[%s8897_s22 + $0x1828] ss:$40 sps:$4 sm:$0xff]  }
 0x285   : > { %5897 = vmatprep.subr.bf16.mxu0 %v8194_v22  ;;  %v8275_v22 = vld [vmem:[%s8897_s22 + $0x17dc] ss:$40 sps:$4 sm:$0xff]  }
 0x286   : > { %5939 = vmatpush2.bf16.msra.mxu1 %v8189_v62  ;;  %v8270_v62 = vld [vmem:[%s8897_s22 + $0x12d8] ss:$40 sps:$4 sm:$0xff]  }
 0x287   : > { %5940 = vmatprep.subr.bf16.mxu1 %v8197_v24  ;;  %v8278_v24 = vld [vmem:[%s8897_s22 + $0x128c] ss:$40 sps:$4 sm:$0xff]  }
 0x288   : > { %5898 = vmatpush2.bf16.msra.mxu0 %v8192_v25  ;;  %v8273_v25 = vld [vmem:[%s8897_s22 + $0x17d8] ss:$40 sps:$4 sm:$0xff]  }
 0x289   : > { %5899 = vmatprep.subr.bf16.mxu0 %v8200_v27  ;;  %v8281_v27 = vld [vmem:[%s8897_s22 + $0x178c] ss:$40 sps:$4 sm:$0xff]  }
 0x28a   : > { %5941 = vmatpush2.bf16.msra.mxu1 %v8195_v3  ;;  %v8276_v3 = vld [vmem:[%s8897_s22 + $0x1288] ss:$40 sps:$4 sm:$0xff]  }
 0x28b   : > { %5942 = vmatprep.subr.bf16.mxu1 %v8203_v5  ;;  %v8284_v5 = vld [vmem:[%s8897_s22 + $0x123c] ss:$40 sps:$4 sm:$0xff]  }
 0x28c   : > { %5900 = vmatpush2.bf16.msra.mxu0 %v8198_v32  ;;  %v8279_v32 = vld [vmem:[%s8897_s22 + $0x1788] ss:$40 sps:$4 sm:$0xff]  }
 0x28d   : > { %5955 = vmatprep.subr.bf16.mxu0 %v8206_v9  ;;  %v8287_v9 = vld [vmem:[%s8897_s22 + $0x173c] ss:$40 sps:$4 sm:$0xff]  }
 0x28e   : > { %5943 = vmatpush2.bf16.msra.mxu1 %v8201_v33  ;;  %v8282_v33 = vld [vmem:[%s8897_s22 + $0x1238] ss:$40 sps:$4 sm:$0xff]  }
 0x28f   : > { %5902 = vmatmul.mubr.bf16.vlgmr.msra.gmra.mxu0 %v9570_v36  ;;  %5998 = vmatprep.subr.bf16.mxu1 %v8209_v34  ;;  %v8290_v34 = vld [vmem:[%s8897_s22 + $0x11ec] ss:$40 sps:$4 sm:$0xff]  }
 0x290   : > { %5956 = vmatpush1.bf16.msra.mxu0 %v8204_v20  ;;  %5987 = vmatprep.mubr.bf16.mxu0 %v9575_v38  ;;  %v8285_v20 = vld [vmem:[%s8897_s22 + $0x1738] ss:$40 sps:$4 sm:$0xff]  }
 0x291   : > { %5945 = vmatmul.mubr.bf16.vlgmr.msra.gmra.mxu1 %v9411_v26  ;;  %5957 = vmatprep.subr.bf16.mxu0 %v8212_v15  ;;  %v8219_v26 = vld [vmem:[%s8897_s22 + $0x15a8] ss:$40 sps:$4 sm:$0xff]   ;;  %v8293_v15 = vld [vmem:[%s8897_s22 + $0x16ec] ss:$40 sps:$4 sm:$0xff]  }
 0x292   : > { %5999 = vmatpush1.bf16.msra.mxu1 %v8207_v35  ;;  %6030 = vmatprep.mubr.bf16.mxu1 %v9416_v28  ;;  %v8230_v28 = vld [vmem:[%s8897_s22 + $0x100c] ss:$40 sps:$4 sm:$0xff]   ;;  %v8288_v35 = vld [vmem:[%s8897_s22 + $0x11e8] ss:$40 sps:$4 sm:$0xff]  }
 0x293   : > { %6000 = vmatprep.subr.bf16.mxu1 %v8215_v23  ;;  %v8296_v23 = vld [vmem:[%s8897_s22 + $0x119c] ss:$40 sps:$4 sm:$0xff]  }
 0x294   : > { %5958 = vmatpush1.bf16.msra.mxu0 %v8210_v37  ;;  %v8291_v37 = vld [vmem:[%s8897_s22 + $0x16e8] ss:$40 sps:$4 sm:$0xff]  }
 0x295   : > { %5959 = vmatprep.subr.bf16.mxu0 %v8218_v39  ;;  %v8299_v39 = vld [vmem:[%s8897_s22 + $0x169c] ss:$40 sps:$4 sm:$0xff]  }
 0x296   : > { %6001 = vmatpush1.bf16.msra.mxu1 %v8213_v40  ;;  %v8294_v40 = vld [vmem:[%s8897_s22 + $0x1198] ss:$40 sps:$4 sm:$0xff]  }
 0x297   : > { %6002 = vmatprep.subr.bf16.mxu1 %v8221_v41  ;;  %v8302_v41 = vld [vmem:[%s8897_s22 + $0x254] ss:$40 sps:$4 sm:$0xff]  }
 0x298   : > { %5960 = vmatpush1.bf16.msra.mxu0 %v8216_v42  ;;  %v8297_v42 = vld [vmem:[%s8897_s22 + $0x1698] ss:$40 sps:$4 sm:$0xff]  }
 0x299   : > { %5961 = vmatprep.subr.bf16.mxu0 %v8224_v43  ;;  %v8305_v43 = vld [vmem:[%s8897_s22 + $0x754] ss:$40 sps:$4 sm:$0xff]  }
 0x29a   : > { %6003 = vmatpush1.bf16.msra.mxu1 %v8219_v26  ;;  %v8300_v26 = vld [vmem:[%s8897_s22 + $0x250] ss:$40 sps:$4 sm:$0xff]  }
 0x29b   : > { %6004 = vmatprep.subr.bf16.mxu1 %v8227_v44  ;;  %v8308_v44 = vld [vmem:[%s8897_s22 + $0x204] ss:$40 sps:$4 sm:$0xff]  }
 0x29c   : > { %5962 = vmatpush1.bf16.msra.mxu0 %v8222_v45  ;;  %v8303_v45 = vld [vmem:[%s8897_s22 + $0x750] ss:$40 sps:$4 sm:$0xff]  }
 0x29d   : > { %5963 = vmatprep.subr.bf16.mxu0 %v8230_v28  ;;  %v8311_v28 = vld [vmem:[%s8897_s22 + $0x704] ss:$40 sps:$4 sm:$0xff]  }
 0x29e   : > { %6005 = vmatpush1.bf16.msra.mxu1 %v8225_v46  ;;  %v8306_v46 = vld [vmem:[%s8897_s22 + $0x200] ss:$40 sps:$4 sm:$0xff]  }
 0x29f   : > { %6006 = vmatprep.subr.bf16.mxu1 %v8233_v48  ;;  %v8314_v48 = vld [vmem:[%s8897_s22 + $0x1b4] ss:$40 sps:$4 sm:$0xff]  }
 0x2a0   : > { %5964 = vmatpush1.bf16.msra.mxu0 %v8228_v49  ;;  %v8309_v49 = vld [vmem:[%s8897_s22 + $0x700] ss:$40 sps:$4 sm:$0xff]  }
 0x2a1   : > { %5965 = vmatprep.subr.bf16.mxu0 %v8236_v50  ;;  %v8312_v50 = vld [vmem:[%s8897_s22 + $0x1b0] ss:$40 sps:$4 sm:$0xff]  }
 0x2a2   : > { %6007 = vmatpush1.bf16.msra.mxu1 %v8231_v51  ;;  %v8323_v51 = vld [vmem:[%s8897_s22 + $0x664] ss:$40 sps:$4 sm:$0xff]  }
 0x2a3   : > { %6008 = vmatprep.subr.bf16.mxu1 %v8239_v52  ;;  %v8318_v52 = vld [vmem:[%s8897_s22 + $0x160] ss:$40 sps:$4 sm:$0xff]  }
 0x2a4   : > { %5966 = vmatpush1.bf16.msra.mxu0 %v8234_v53  ;;  %v8321_v53 = vld [vmem:[%s8897_s22 + $0x660] ss:$40 sps:$4 sm:$0xff]  }
 0x2a5   : > { %5967 = vmatprep.subr.bf16.mxu0 %v8242_v54  ;;  %v8329_v54 = vld [vmem:[%s8897_s22 + $0x614] ss:$40 sps:$4 sm:$0xff]  }
 0x2a6   : > { %6009 = vmatpush1.bf16.msra.mxu1 %v8237_v55  ;;  %v8324_v55 = vld [vmem:[%s8897_s22 + $0x110] ss:$40 sps:$4 sm:$0xff]  }
 0x2a7   : > { %6010 = vmatprep.subr.bf16.mxu1 %v8245_v56  ;;  %v8332_v56 = vld [vmem:[%s8897_s22 + $0xc4] ss:$40 sps:$4 sm:$0xff]  }
 0x2a8   : > { %5968 = vmatpush1.bf16.msra.mxu0 %v8240_v57  ;;  %v8327_v57 = vld [vmem:[%s8897_s22 + $0x610] ss:$40 sps:$4 sm:$0xff]  }
 0x2a9   : > { %5969 = vmatprep.subr.bf16.mxu0 %v8248_v58  ;;  %v8335_v58 = vld [vmem:[%s8897_s22 + $0x5c4] ss:$40 sps:$4 sm:$0xff]  }
 0x2aa   : > { %6011 = vmatpush1.bf16.msra.mxu1 %v8243_v59  ;;  %v8330_v59 = vld [vmem:[%s8897_s22 + $0xc0] ss:$40 sps:$4 sm:$0xff]  }
 0x2ab   : > { %6012 = vmatprep.subr.bf16.mxu1 %v8251_v60  ;;  %v8338_v60 = vld [vmem:[%s8897_s22 + $0x74] ss:$40 sps:$4 sm:$0xff]  }
 0x2ac   : > { %5970 = vmatpush1.bf16.msra.mxu0 %v8246_v63  ;;  %v8333_v63 = vld [vmem:[%s8897_s22 + $0x5c0] ss:$40 sps:$4 sm:$0xff]  }
 0x2ad   : > { %5971 = vmatprep.subr.bf16.mxu0 %v8254_v0  ;;  %v8341_v0 = vld [vmem:[%s8897_s22 + $0x574] ss:$40 sps:$4 sm:$0xff]  }
 0x2ae   : > { %6013 = vmatpush1.bf16.msra.mxu1 %v8249_v1  ;;  %v8336_v1 = vld [vmem:[%s8897_s22 + $0x70] ss:$40 sps:$4 sm:$0xff]  }
 0x2af   : > { %6014 = vmatprep.subr.bf16.mxu1 %v8257_v2  ;;  %v8344_v2 = vld [vmem:[%s8897_s22 + $0x24] ss:$40 sps:$4 sm:$0xff]  }
 0x2b0   : > { %5972 = vmatpush2.bf16.msra.mxu0 %v8252_v4  ;;  %v8339_v4 = vld [vmem:[%s8897_s22 + $0x570] ss:$40 sps:$4 sm:$0xff]  }
 0x2b1   : > { %5973 = vmatprep.subr.bf16.mxu0 %v8260_v7  ;;  %v8347_v7 = vld [vmem:[%s8897_s22 + $0x524] ss:$40 sps:$4 sm:$0xff]  }
 0x2b2   : > { %6015 = vmatpush2.bf16.msra.mxu1 %v8255_v8  ;;  %v8342_v8 = vld [vmem:[%s8897_s22 + $0x20] ss:$40 sps:$4 sm:$0xff]  }
 0x2b3   : > { %6016 = vmatprep.subr.bf16.mxu1 %v8263_v11  ;;  %v8350_v11 = vld [vmem:[%s8897_s22 + $0x4d4] ss:$40 sps:$4 sm:$0xff]  }
 0x2b4   : > { %5974 = vmatpush2.bf16.msra.mxu0 %v8258_v12  ;;  %v8345_v12 = vld [vmem:[%s8897_s22 + $0x520] ss:$40 sps:$4 sm:$0xff]  }
 0x2b5   : > { %5975 = vmatprep.subr.bf16.mxu0 %v8266_v13  ;;  %v8353_v13 = vld [vmem:[%s8897_s22 + $0x9d4] ss:$40 sps:$4 sm:$0xff]  }
 0x2b6   : > { %6017 = vmatpush2.bf16.msra.mxu1 %v8261_v14  ;;  %v8348_v14 = vld [vmem:[%s8897_s22 + $0x4d0] ss:$40 sps:$4 sm:$0xff]  }
 0x2b7   : > { %6018 = vmatprep.subr.bf16.mxu1 %v8269_v16  ;;  %v8356_v16 = vld [vmem:[%s8897_s22 + $0x484] ss:$40 sps:$4 sm:$0xff]  }
 0x2b8   : > { %5976 = vmatpush2.bf16.msra.mxu0 %v8264_v17  ;;  %v8351_v17 = vld [vmem:[%s8897_s22 + $0x9d0] ss:$40 sps:$4 sm:$0xff]  }
 0x2b9   : > { %5977 = vmatprep.subr.bf16.mxu0 %v8272_v18  ;;  %v8359_v18 = vld [vmem:[%s8897_s22 + $0x984] ss:$40 sps:$4 sm:$0xff]  }
 0x2ba   : > { %6019 = vmatpush2.bf16.msra.mxu1 %v8267_v21  ;;  %v8354_v21 = vld [vmem:[%s8897_s22 + $0x480] ss:$40 sps:$4 sm:$0xff]  }
 0x2bb   : > { %6020 = vmatprep.subr.bf16.mxu1 %v8275_v22  ;;  %v8362_v22 = vld [vmem:[%s8897_s22 + $0x434] ss:$40 sps:$4 sm:$0xff]  }
 0x2bc   : > { %5978 = vmatpush2.bf16.msra.mxu0 %v8270_v62  ;;  %v8357_v62 = vld [vmem:[%s8897_s22 + $0x980] ss:$40 sps:$4 sm:$0xff]  }
 0x2bd   : > { %5979 = vmatprep.subr.bf16.mxu0 %v8278_v24  ;;  %v5645_v24 = vpop.f32.mrf.mxu0 }
 0x2be   : > { %6021 = vmatpush2.bf16.msra.mxu1 %v8273_v25  ;;  %v8365_v25 = vld [vmem:[%s8897_s22 + $0x934] ss:$40 sps:$4 sm:$0xff]  }
 0x2bf   : > { %6022 = vmatprep.subr.bf16.mxu1 %v8281_v27  ;;  %v8360_v27 = vld [vmem:[%s8897_s22 + $0x430] ss:$40 sps:$4 sm:$0xff]  }
 0x2c0   : > { %5980 = vmatpush2.bf16.msra.mxu0 %v8276_v3  ;;  %v8368_v3 = vld [vmem:[%s8897_s22 + $0x3e4] ss:$40 sps:$4 sm:$0xff]  }
 0x2c1   : > { %5981 = vmatprep.subr.bf16.mxu0 %v8284_v5  ;;  %v8363_v5 = vld [vmem:[%s8897_s22 + $0x930] ss:$40 sps:$4 sm:$0xff]  }
 0x2c2   : > { %6023 = vmatpush2.bf16.msra.mxu1 %v8279_v32  ;;  %v5647_v32 = vpop.f32.mrf.mxu0 }
 0x2c3   : > { %6024 = vmatprep.subr.bf16.mxu1 %v8287_v9  ;;  %v5688_v9 = vpop.f32.mrf.mxu1 }
 0x2c4   : > { %5982 = vmatpush2.bf16.msra.mxu0 %v8282_v33  ;;  %v8371_v33 = vld [vmem:[%s8897_s22 + $0x8e4] ss:$40 sps:$4 sm:$0xff]  }
 0x2c5   : > { %5983 = vmatprep.subr.bf16.mxu0 %v8290_v34  ;;  %v8366_v34 = vld [vmem:[%s8897_s22 + $0x3e0] ss:$40 sps:$4 sm:$0xff]  }
 0x2c6   : > { %6025 = vmatpush2.bf16.msra.mxu1 %v8285_v20  ;;  %v8374_v20 = vld [vmem:[%s8897_s22 + $0x394] ss:$40 sps:$4 sm:$0xff]  }
 0x2c7   : > { %6026 = vmatprep.subr.bf16.mxu1 %v8293_v15  ;;  %v8369_v15 = vld [vmem:[%s8897_s22 + $0x8e0] ss:$40 sps:$4 sm:$0xff]  }
 0x2c8   : > { %5984 = vmatpush2.bf16.msra.mxu0 %v8288_v35  ;;  %v5649_v35 = vpop.f32.mrf.mxu0 }
 0x2c9   : > { %5985 = vmatprep.subr.bf16.mxu0 %v8296_v23  ;;  %v5690_v23 = vpop.f32.mrf.mxu1 }
 0x2ca   : > { %6027 = vmatpush2.bf16.msra.mxu1 %v8291_v37  ;;  %v8377_v37 = vld [vmem:[%s8897_s22 + $0x894] ss:$40 sps:$4 sm:$0xff]  }
 0x2cb   : > { %6028 = vmatprep.subr.bf16.mxu1 %v8299_v39  ;;  %v1099_v39 = vsub.s32 4, %v9298_v10 }
 0x2cc   : > { %5986 = vmatpush2.bf16.msra.mxu0 %v8294_v40  ;;  %v8372_v40 = vld [vmem:[%s8897_s22 + $0x390] ss:$40 sps:$4 sm:$0xff]  }
 0x2cd   : > { %6041 = vmatprep.subr.bf16.mxu0 %v8302_v41  ;;  %v8380_v41 = vld [vmem:[%s8897_s22 + $0x344] ss:$40 sps:$4 sm:$0xff]  }
 0x2ce   : > { %6029 = vmatpush2.bf16.msra.mxu1 %v8297_v42  ;;  %v1103_v42 = vsub.s32 5, %v9298_v10 }
 0x2cf   : > { %5988 = vmatmul.mubr.bf16.vlgmr.msra.gmra.mxu0 %v9419_v29  ;;  %6084 = vmatprep.subr.bf16.mxu1 %v8305_v43  ;;  %v8317_v29 = vld [vmem:[%s8897_s22 + $0x6b4] ss:$40 sps:$4 sm:$0xff]   ;;  %v8375_v43 = vld [vmem:[%s8897_s22 + $0x890] ss:$40 sps:$4 sm:$0xff]  }
 0x2d0   : > { %6042 = vmatpush1.bf16.msra.mxu0 %v8300_v26  ;;  %6073 = vmatprep.mubr.bf16.mxu0 %v9424_v31  ;;  %v8320_v31 = vld [vmem:[%s8897_s22 + $0x164] ss:$40 sps:$4 sm:$0xff]   ;;  %v5651_v26 = vpop.f32.mrf.mxu0 }
 0x2d1   : > { %6031 = vmatmul.mubr.bf16.vlgmr.msra.gmra.mxu1 %v9494_v61  ;;  %6043 = vmatprep.subr.bf16.mxu0 %v8308_v44  ;;  %v8315_v61 = vld [vmem:[%s8897_s22 + $0x6b0] ss:$40 sps:$4 sm:$0xff]   ;;  %v5692_v44 = vpop.f32.mrf.mxu1 }
 0x2d2   : > { %6085 = vmatpush1.bf16.msra.mxu1 %v8303_v45  ;;  %6116 = vmatprep.mubr.bf16.mxu1 %v9499_v6  ;;  %v8326_v6 = vld [vmem:[%s8897_s22 + $0x114] ss:$40 sps:$4 sm:$0xff]   ;;  %v8383_v45 = vld [vmem:[%s8897_s22 + $0x844] ss:$40 sps:$4 sm:$0xff]  }
 0x2d3   : > { %6086 = vmatprep.subr.bf16.mxu1 %v8311_v28  ;;  %v1100_v28 = vrot.slane %v9477_v30, %v1099_v39 }
 0x2d4   : > { %6044 = vmatpush1.bf16.msra.mxu0 %v8306_v46  ;;  %v8378_v46 = vld [vmem:[%s8897_s22 + $0x340] ss:$40 sps:$4 sm:$0xff]  }
 0x2d5   : > { %6045 = vmatprep.subr.bf16.mxu0 %v8314_v48  ;;  %v5731_v48 = vpop.f32.mrf.mxu0 }
 0x2d6   : > { %6087 = vmatpush1.bf16.msra.mxu1 %v8309_v49  ;;  %v8386_v49 = vld [vmem:[%s8897_s22 + $0x2f4] ss:$40 sps:$4 sm:$0xff]  }
 0x2d7   : > { %6088 = vmatprep.subr.bf16.mxu1 %v8317_v29  ;;  %v1104_v29 = vrot.slane %v9477_v30, %v1103_v42  ;;  %v8395_v30 = vld [vmem:[%s8897_s22 + $0x7a4] ss:$40 sps:$4 sm:$0xff]   ;;  %v8408_v42 = vld [vmem:[%s8897_s22 + $0xbb0] ss:$40 sps:$4 sm:$0xff]  }
 0x2d8   : > { %6046 = vmatpush1.bf16.msra.mxu0 %v8312_v50  ;;  %v8381_v50 = vld [vmem:[%s8897_s22 + $0x840] ss:$40 sps:$4 sm:$0xff]  }
 0x2d9   : > { %6047 = vmatprep.subr.bf16.mxu0 %v8320_v31  ;;  %v5694_v31 = vpop.f32.mrf.mxu1 }
 0x2da   : > { %6089 = vmatpush1.bf16.msra.mxu1 %v8315_v61  ;;  %v8389_v61 = vld [vmem:[%s8897_s22 + $0x7f4] ss:$40 sps:$4 sm:$0xff]  }
 0x2db   : > { %6090 = vmatprep.subr.bf16.mxu1 %v8323_v51  ;;  %v5646_v51 = vadd.f32 %v5645_v24, %v1100_v28 }
 0x2dc   : > { %6048 = vmatpush1.bf16.msra.mxu0 %v8318_v52  ;;  %v8384_v52 = vld [vmem:[%s8897_s22 + $0x2f0] ss:$40 sps:$4 sm:$0xff]  }
 0x2dd   : > { %6049 = vmatprep.subr.bf16.mxu0 %v8326_v6  ;;  %v5733_v6 = vpop.f32.mrf.mxu0 }
 0x2de   : > { %6091 = vmatpush1.bf16.msra.mxu1 %v8321_v53  ;;  %v5774_v53 = vpop.f32.mrf.mxu1 }
 0x2df   : > { %6092 = vmatprep.subr.bf16.mxu1 %v8329_v54  ;;  %v8392_v54 = vld [vmem:[%s8897_s22 + $0x2a4] ss:$40 sps:$4 sm:$0xff]  }
 0x2e0   : > { %6050 = vmatpush1.bf16.msra.mxu0 %v8324_v55  ;;  %v5648_v55 = vadd.f32 %v5647_v32, %v1104_v29 }
 0x2e1   : > { %6051 = vmatprep.subr.bf16.mxu0 %v8332_v56  ;;  %v8387_v56 = vld [vmem:[%s8897_s22 + $0x7f0] ss:$40 sps:$4 sm:$0xff]  }
 0x2e2   : > { %6093 = vmatpush1.bf16.msra.mxu1 %v8327_v57  ;;  %v5689_v57 = vadd.f32 %v5688_v9, %v5646_v51  ;;  %v8402_v9 = vld [vmem:[%s8897_s22 + $0xc00] ss:$40 sps:$4 sm:$0xff]  }
 0x2e3   : > { %6094 = vmatprep.subr.bf16.mxu1 %v8335_v58  ;;  %v5650_v58 = vadd.f32 %v5649_v35, %v1100_v28  ;;  %v8414_v28 = vld [vmem:[%s8897_s22 + $0xb60] ss:$40 sps:$4 sm:$0xff]  }
 0x2e4   : > { %6052 = vmatpush1.bf16.msra.mxu0 %v8330_v59  ;;  %v8390_v59 = vld [vmem:[%s8897_s22 + $0x2a0] ss:$40 sps:$4 sm:$0xff]  }
 0x2e5   : > { %6053 = vmatprep.subr.bf16.mxu0 %v8338_v60  ;;  %v5735_v60 = vpop.f32.mrf.mxu0  ;;  %v8426_v51 = vld [vmem:[%s8897_s22 + $0xac0] ss:$40 sps:$4 sm:$0xff]  }
 0x2e6   : > { %6095 = vmatpush1.bf16.msra.mxu1 %v8333_v63  ;;  %v5776_v63 = vpop.f32.mrf.mxu1 }
 0x2e7   : > { %6096 = vmatprep.subr.bf16.mxu1 %v8341_v0  ;;  %v8398_v0 = vld [vmem:[%s8897_s22 + $0xc54] ss:$40 sps:$4 sm:$0xff]  }
 0x2e8   : > { %6054 = vmatpush1.bf16.msra.mxu0 %v8336_v1  ;;  %v5691_v1 = vadd.f32 %v5690_v23, %v5648_v55  ;;  %v8440_v55 = vld [vmem:[%s8897_s22 + $0xa24] ss:$40 sps:$4 sm:$0xff]  }
 0x2e9   : > { %6055 = vmatprep.subr.bf16.mxu0 %v8344_v2  ;;  %v5652_v2 = vadd.f32 %v5651_v26, %v1104_v29  ;;  %v8416_v26 = vld [vmem:[%s8897_s22 + $0xb64] ss:$40 sps:$4 sm:$0xff]   ;;  %v8420_v29 = vld [vmem:[%s8897_s22 + $0xb10] ss:$40 sps:$4 sm:$0xff]  }
 0x2ea   : > { %6097 = vmatpush1.bf16.msra.mxu1 %v8339_v4  ;;  %v5732_v4 = vadd.f32 %v5731_v48, %v5689_v57  ;;  %v8417_v48 = vld [vmem:[%s8897_s22 + $0x1060] ss:$40 sps:$4 sm:$0xff]  }
 0x2eb   : > { %6098 = vmatprep.subr.bf16.mxu1 %v8347_v7  ;;  %v8393_v7 = vld [vmem:[%s8897_s22 + $0x7a0] ss:$40 sps:$4 sm:$0xff]  }
 0x2ec   : > { %6056 = vmatpush1.bf16.msra.mxu0 %v8342_v8  ;;  %v8401_v8 = vld [vmem:[%s8897_s22 + $0x1154] ss:$40 sps:$4 sm:$0xff]   ;;  %v8438_v57 = vld [vmem:[%s8897_s22 + $0xa20] ss:$40 sps:$4 sm:$0xff]  }
 0x2ed   : > { %6057 = vmatprep.subr.bf16.mxu0 %v8350_v11  ;;  %v5693_v11 = vadd.f32 %v5692_v44, %v5650_v58  ;;  %v8411_v44 = vld [vmem:[%s8897_s22 + $0x10b0] ss:$40 sps:$4 sm:$0xff]   ;;  %v8446_v58 = vld [vmem:[%s8897_s22 + $0xed4] ss:$40 sps:$4 sm:$0xff]  }
 0x2ee   : > { %6099 = vmatpush1.bf16.msra.mxu1 %v8345_v12  ;;  %v5734_v12 = vadd.f32 %v5733_v6, %v5691_v1  ;;  %v8429_v6 = vld [vmem:[%s8897_s22 + $0xfc0] ss:$40 sps:$4 sm:$0xff]   ;;  %v8447_v1 = vld [vmem:[%s8897_s22 + $0x13d0] ss:$40 sps:$4 sm:$0xff]  }
 0x2ef   : > { %6100 = vmatprep.subr.bf16.mxu1 %v8353_v13  ;;  %v8396_v13 = vld [vmem:[%s8897_s22 + $0xc50] ss:$40 sps:$4 sm:$0xff]  }
 0x2f0   : > { %6058 = vmatpush2.bf16.msra.mxu0 %v8348_v14  ;;  %v5737_v14 = vpop.f32.mrf.mxu0 }
 0x2f1   : > { %6059 = vmatprep.subr.bf16.mxu0 %v8356_v16  ;;  %v5778_v16 = vpop.f32.mrf.mxu1 }
 0x2f2   : > { %6101 = vmatpush2.bf16.msra.mxu1 %v8351_v17  ;;  %v8404_v17 = vld [vmem:[%s8897_s22 + $0xc04] ss:$40 sps:$4 sm:$0xff]  }
 0x2f3   : > { %6102 = vmatprep.subr.bf16.mxu1 %v8359_v18  ;;  %v5695_v18 = vadd.f32 %v5694_v31, %v5652_v2  ;;  %v8423_v31 = vld [vmem:[%s8897_s22 + $0x1010] ss:$40 sps:$4 sm:$0xff]   ;;  %v8455_v2 = vld [vmem:[%s8897_s22 + $0x1384] ss:$40 sps:$4 sm:$0xff]  }
 0x2f4   : > { %6060 = vmatpush2.bf16.msra.mxu0 %v8354_v21  ;;  %v5775_v21 = vadd.f32 %v5774_v53, %v5732_v4  ;;  %v8437_v53 = vld [vmem:[%s8897_s22 + $0xf74] ss:$40 sps:$4 sm:$0xff]   ;;  %v8450_v4 = vld [vmem:[%s8897_s22 + $0xe80] ss:$40 sps:$4 sm:$0xff]  }
 0x2f5   : > { %6061 = vmatprep.subr.bf16.mxu0 %v8362_v22  ;;  %v5736_v22 = vadd.f32 %v5735_v60, %v5693_v11  ;;  %v8449_v60 = vld [vmem:[%s8897_s22 + $0x13d4] ss:$40 sps:$4 sm:$0xff]  }
 0x2f6   : > { %6103 = vmatpush2.bf16.msra.mxu1 %v8357_v62  ;;  %v8399_v62 = vld [vmem:[%s8897_s22 + $0x1150] ss:$40 sps:$4 sm:$0xff]   ;;  %v8461_v11 = vld [vmem:[%s8897_s22 + $0x1334] ss:$40 sps:$4 sm:$0xff]  }
 0x2f7   : > { %6104 = vmatprep.subr.bf16.mxu1 %v8365_v25  ;;  %v8558_v25 = vld [vmem:[#allocation2] ss:$40 sps:$4 sm:$0xff]   ;;  %v5779_v35 = vadd.f32 %v5778_v16, %v5736_v22  ;;  %v8467_v16 = vld [vmem:[%s8897_s22 + $0x12e4] ss:$40 sps:$4 sm:$0xff]   ;;  %v8473_v22 = vld [vmem:[%s8897_s22 + $0x1294] ss:$40 sps:$4 sm:$0xff]  }
 0x2f8   : > { %6062 = vmatpush2.bf16.msra.mxu0 %v8360_v27  ;;  %v8407_v27 = vld [vmem:[%s8897_s22 + $0x1104] ss:$40 sps:$4 sm:$0xff]  }
 0x2f9   : > { %6063 = vmatprep.subr.bf16.mxu0 %v8368_v3  ;;  %v5777_v3 = vadd.f32 %v5776_v63, %v5734_v12  ;;  %v8444_v63 = vld [vmem:[%s8897_s22 + $0xed0] ss:$40 sps:$4 sm:$0xff]  }
 0x2fa   : > { %6105 = vmatpush2.bf16.msra.mxu1 %v8363_v5  ;;  %v5738_v5 = vadd.f32 %v5737_v14, %v5695_v18  ;;  %v8456_v12 = vld [vmem:[%s8897_s22 + $0xe30] ss:$40 sps:$4 sm:$0xff]   ;;  %v8470_v18 = vld [vmem:[%s8897_s22 + $0xd94] ss:$40 sps:$4 sm:$0xff]  }
 0x2fb   : > { %6106 = vmatprep.subr.bf16.mxu1 %v8371_v33  ;;  %v8559_v33 = vld [vmem:[#allocation2 + $0x14] ss:$40 sps:$4 sm:$0xff]   ;;  %v8459_v14 = vld [vmem:[%s8897_s22 + $0x1330] ss:$40 sps:$4 sm:$0xff]  }
 0x2fc   : > { %6064 = vmatpush2.bf16.msra.mxu0 %v8366_v34  ;;  %v5780_v34 = vpop.f32.mrf.mxu1 }
 0x2fd   : > { %6065 = vmatprep.subr.bf16.mxu0 %v8374_v20 }
 0x2fe   : > { %6107 = vmatpush2.bf16.msra.mxu1 %v8369_v15  ;;  %v8410_v15 = vld [vmem:[%s8897_s22 + $0xbb4] ss:$40 sps:$4 sm:$0xff]  }
 0x2ff   : > { %6108 = vmatprep.subr.bf16.mxu1 %v8377_v37  ;;  %v8405_v37 = vld [vmem:[%s8897_s22 + $0x1100] ss:$40 sps:$4 sm:$0xff]  }
 0x300   : > { %6066 = vmatpush2.bf16.msra.mxu0 %v8372_v40  ;;  %v8413_v40 = vld [vmem:[%s8897_s22 + $0x10b4] ss:$40 sps:$4 sm:$0xff]  }
 0x301   : > { %6067 = vmatprep.subr.bf16.mxu0 %v8380_v41  ;;  %v5781_v41 = vadd.f32 %v5780_v34, %v5738_v5  ;;  %v8482_v5 = vld [vmem:[%s8897_s22 + $0xcf4] ss:$40 sps:$4 sm:$0xff]   ;;  %v8488_v34 = vld [vmem:[%s8897_s22 + $0xca4] ss:$40 sps:$4 sm:$0xff]  }
 0x302   : > { %6109 = vmatpush2.bf16.msra.mxu1 %v8375_v43 }
 0x303   : > { %6110 = vmatprep.subr.bf16.mxu1 %v8383_v45  ;;  %v8419_v45 = vld [vmem:[%s8897_s22 + $0x1064] ss:$40 sps:$4 sm:$0xff]  }
 0x304   : > { %6068 = vmatpush2.bf16.msra.mxu0 %v8378_v46  ;;  %v8422_v46 = vld [vmem:[%s8897_s22 + $0xb14] ss:$40 sps:$4 sm:$0xff]  }
 0x305   : > { %6069 = vmatprep.subr.bf16.mxu0 %v8386_v49  ;;  %v8425_v49 = vld [vmem:[%s8897_s22 + $0x1014] ss:$40 sps:$4 sm:$0xff]  }
 0x306   : > { %6111 = vmatpush2.bf16.msra.mxu1 %v8381_v50  ;;  %v8428_v50 = vld [vmem:[%s8897_s22 + $0xac4] ss:$40 sps:$4 sm:$0xff]  }
 0x307   : > { %6112 = vmatprep.subr.bf16.mxu1 %v8389_v61  ;;  %v8431_v61 = vld [vmem:[%s8897_s22 + $0xfc4] ss:$40 sps:$4 sm:$0xff]  }
 0x308   : > { %6070 = vmatpush2.bf16.msra.mxu0 %v8384_v52  ;;  %v8434_v52 = vld [vmem:[%s8897_s22 + $0xa74] ss:$40 sps:$4 sm:$0xff]  }
 0x309   : > { %6071 = vmatprep.subr.bf16.mxu0 %v8392_v54  ;;  %v8432_v54 = vld [vmem:[%s8897_s22 + $0xa70] ss:$40 sps:$4 sm:$0xff]  }
 0x30a   : > { %6113 = vmatpush2.bf16.msra.mxu1 %v8387_v56  ;;  %v8435_v56 = vld [vmem:[%s8897_s22 + $0xf70] ss:$40 sps:$4 sm:$0xff]  }
 0x30b   : > { %6114 = vmatprep.subr.bf16.mxu1 %v8395_v30  ;;  %v8443_v30 = vld [vmem:[%s8897_s22 + $0xf24] ss:$40 sps:$4 sm:$0xff]  }
 0x30c   : > { %6072 = vmatpush2.bf16.msra.mxu0 %v8390_v59  ;;  %v8441_v59 = vld [vmem:[%s8897_s22 + $0xf20] ss:$40 sps:$4 sm:$0xff]  }
 0x30d   : > { %6127 = vmatprep.subr.bf16.mxu0 %v8398_v0  ;;  %v8452_v0 = vld [vmem:[%s8897_s22 + $0xe84] ss:$40 sps:$4 sm:$0xff]  }
 0x30e   : > { %6115 = vmatpush2.bf16.msra.mxu1 %v8393_v7  ;;  %v8458_v7 = vld [vmem:[%s8897_s22 + $0xe34] ss:$40 sps:$4 sm:$0xff]  }
 0x30f   : > { %v5817_v24 = vpop.f32.mrf.mxu0  ;;  %6074 = vmatmul.mubr.bf16.vlgmr.msra.gmra.mxu0 %v8558_v25  ;;  %6170 = vmatprep.subr.bf16.mxu1 %v8401_v8  ;;  %v8453_v8 = vld [vmem:[%s8897_s22 + $0x1380] ss:$40 sps:$4 sm:$0xff]   ;;  %v8471_v25 = vld [vmem:[%s8897_s22 + $0x1290] ss:$40 sps:$4 sm:$0xff]  }
 0x310   : > { %v5818_v32 = vadd.f32 %v5817_v24, %v5775_v21  ;;  %6128 = vmatpush1.bf16.msra.mxu0 %v8396_v13  ;;  %6159 = vmatprep.mubr.bf16.mxu0 %v8559_v33  ;;  %v8464_v13 = vld [vmem:[%s8897_s22 + $0xde4] ss:$40 sps:$4 sm:$0xff]   ;;  %v8465_v21 = vld [vmem:[%s8897_s22 + $0x12e0] ss:$40 sps:$4 sm:$0xff]   ;;  %v8480_v33 = vld [vmem:[%s8897_s22 + $0xcf0] ss:$40 sps:$4 sm:$0xff]  }
 0x311   : > { %v5819_v20 = vpop.f32.mrf.mxu0  ;;  %6117 = vmatmul.mubr.bf16.vlgmr.msra.gmra.mxu1 %v9570_v36  ;;  %6129 = vmatprep.subr.bf16.mxu0 %v8404_v17  ;;  %v8462_v17 = vld [vmem:[%s8897_s22 + $0xde0] ss:$40 sps:$4 sm:$0xff]   ;;  %v8476_v24 = vld [vmem:[%s8897_s22 + $0xd44] ss:$40 sps:$4 sm:$0xff]  }
 0x312   : > { %6260 = vst [vmem:[%s9344_s29 + $0x20] sm:$0xff] %v5818_v32  ;;  %v5820_v23 = vadd.f32 %v5819_v20, %v5777_v3  ;;  %6171 = vmatpush1.bf16.msra.mxu1 %v8399_v62  ;;  %6202 = vmatprep.mubr.bf16.mxu1 %v9575_v38  ;;  %v8468_v62 = vld [vmem:[%s8897_s22 + $0xd90] ss:$40 sps:$4 sm:$0xff]   ;;  %v8474_v3 = vld [vmem:[%s8897_s22 + $0xd40] ss:$40 sps:$4 sm:$0xff]  }
 0x313   : > { %v5821_v39 = vpop.f32.mrf.mxu0  ;;  %6172 = vmatprep.subr.bf16.mxu1 %v8407_v27  ;;  %v8479_v27 = vld [vmem:[%s8897_s22 + $0x1244] ss:$40 sps:$4 sm:$0xff]   ;;  %v8477_v32 = vld [vmem:[%s8897_s22 + $0x1240] ss:$40 sps:$4 sm:$0xff]   ;;  %v8483_v20 = vld [vmem:[%s8897_s22 + $0x11f0] ss:$40 sps:$4 sm:$0xff]  }
 0x314   : > { %6261 = vst [vmem:[%s9344_s29 + $0x28] sm:$0xff] %v5820_v23  ;;  %v5822_v36 = vadd.f32 %v5821_v39, %v5779_v35  ;;  %6130 = vmatpush1.bf16.msra.mxu0 %v8402_v9  ;;  %v8485_v9 = vld [vmem:[%s8897_s22 + $0x11f4] ss:$40 sps:$4 sm:$0xff]   ;;  %v8486_v35 = vld [vmem:[%s8897_s22 + $0xca0] ss:$40 sps:$4 sm:$0xff]  }
 0x315   : > { %v5823_v43 = vpop.f32.mrf.mxu0  ;;  %6131 = vmatprep.subr.bf16.mxu0 %v8410_v15  ;;  %v8491_v15 = vld [vmem:[%s8897_s22 + $0x11a4] ss:$40 sps:$4 sm:$0xff]   ;;  %v8494_v23 = vld [vmem:[%s8897_s22 + $0x1654] ss:$40 sps:$4 sm:$0xff]   ;;  %v8492_v39 = vld [vmem:[%s8897_s22 + $0x1650] ss:$40 sps:$4 sm:$0xff]  }
 0x316   : > { %6270 = vst [vmem:[%s9344_s29 + $0x70] sm:$0xff] %v5822_v36  ;;  %v5824_v38 = vadd.f32 %v5823_v43, %v5781_v41  ;;  %6173 = vmatpush1.bf16.msra.mxu1 %v8405_v37  ;;  %v8489_v37 = vld [vmem:[%s8897_s22 + $0x11a0] ss:$40 sps:$4 sm:$0xff]  }
 0x317   : > { %6174 = vmatprep.subr.bf16.mxu1 %v8413_v40  ;;  %v8497_v40 = vld [vmem:[%s8897_s22 + $0x1604] ss:$40 sps:$4 sm:$0xff]   ;;  %v8560_v41 = vld [vmem:[#allocation2 + $0x10] ss:$40 sps:$4 sm:$0xff]  }
 0x318   : > { %6271 = vst [vmem:[%s9344_s29 + $0x78] sm:$0xff] %v5824_v38  ;;  %6132 = vmatpush1.bf16.msra.mxu0 %v8408_v42  ;;  %v8495_v36 = vld [vmem:[%s8897_s22 + $0x1600] ss:$40 sps:$4 sm:$0xff]   ;;  %v8561_v42 = vld [vmem:[#allocation2 + $0x24] ss:$40 sps:$4 sm:$0xff]  }
 0x319   : > { %6133 = vmatprep.subr.bf16.mxu0 %v8416_v26  ;;  %v8562_v43 = vld [vmem:[#allocation2 + $0x18] ss:$40 sps:$4 sm:$0xff]   ;;  %v8500_v26 = vld [vmem:[%s8897_s22 + $0x15b4] ss:$40 sps:$4 sm:$0xff]  }
 0x31a   : > { %6175 = vmatpush1.bf16.msra.mxu1 %v8411_v44  ;;  %v8498_v38 = vld [vmem:[%s8897_s22 + $0x15b0] ss:$40 sps:$4 sm:$0xff]   ;;  %v8503_v44 = vld [vmem:[%s8897_s22 + $0x1564] ss:$40 sps:$4 sm:$0xff]  }
 0x31b   : > { %6176 = vmatprep.subr.bf16.mxu1 %v8419_v45  ;;  %v8501_v45 = vld [vmem:[%s8897_s22 + $0x1560] ss:$40 sps:$4 sm:$0xff]  }
 0x31c   : > { %6134 = vmatpush1.bf16.msra.mxu0 %v8414_v28  ;;  %v8506_v28 = vld [vmem:[%s8897_s22 + $0x1514] ss:$40 sps:$4 sm:$0xff]  }
 0x31d   : > { %6135 = vmatprep.subr.bf16.mxu0 %v8422_v46  ;;  %v8504_v46 = vld [vmem:[%s8897_s22 + $0x1510] ss:$40 sps:$4 sm:$0xff]  }
 0x31e   : > { %6177 = vmatpush1.bf16.msra.mxu1 %v8417_v48  ;;  %v8509_v48 = vld [vmem:[%s8897_s22 + $0x14c4] ss:$40 sps:$4 sm:$0xff]  }
 0x31f   : > { %6178 = vmatprep.subr.bf16.mxu1 %v8425_v49  ;;  %v8507_v49 = vld [vmem:[%s8897_s22 + $0x14c0] ss:$40 sps:$4 sm:$0xff]  }
 0x320   : > { %6136 = vmatpush1.bf16.msra.mxu0 %v8420_v29  ;;  %v8512_v29 = vld [vmem:[%s8897_s22 + $0x1474] ss:$40 sps:$4 sm:$0xff]  }
 0x321   : > { %6137 = vmatprep.subr.bf16.mxu0 %v8428_v50  ;;  %v8510_v50 = vld [vmem:[%s8897_s22 + $0x1470] ss:$40 sps:$4 sm:$0xff]  }
 0x322   : > { %6179 = vmatpush1.bf16.msra.mxu1 %v8423_v31  ;;  %v8515_v31 = vld [vmem:[%s8897_s22 + $0x1424] ss:$40 sps:$4 sm:$0xff]  }
 0x323   : > { %6180 = vmatprep.subr.bf16.mxu1 %v8431_v61  ;;  %v8513_v61 = vld [vmem:[%s8897_s22 + $0x1420] ss:$40 sps:$4 sm:$0xff]  }
 0x324   : > { %6138 = vmatpush1.bf16.msra.mxu0 %v8426_v51  ;;  %v8518_v51 = vld [vmem:[%s8897_s22 + $0x18d4] ss:$40 sps:$4 sm:$0xff]  }
 0x325   : > { %6139 = vmatprep.subr.bf16.mxu0 %v8434_v52  ;;  %v8516_v52 = vld [vmem:[%s8897_s22 + $0x18d0] ss:$40 sps:$4 sm:$0xff]  }
 0x326   : > { %6181 = vmatpush1.bf16.msra.mxu1 %v8429_v6  ;;  %v8521_v6 = vld [vmem:[%s8897_s22 + $0x1884] ss:$40 sps:$4 sm:$0xff]  }
 0x327   : > { %6182 = vmatprep.subr.bf16.mxu1 %v8437_v53  ;;  %v8519_v53 = vld [vmem:[%s8897_s22 + $0x1880] ss:$40 sps:$4 sm:$0xff]  }
 0x328   : > { %6140 = vmatpush1.bf16.msra.mxu0 %v8432_v54  ;;  %v8524_v54 = vld [vmem:[%s8897_s22 + $0x1834] ss:$40 sps:$4 sm:$0xff]  }
 0x329   : > { %6141 = vmatprep.subr.bf16.mxu0 %v8440_v55  ;;  %v5860_v55 = vpop.f32.mrf.mxu1 }
 0x32a   : > { %6183 = vmatpush1.bf16.msra.mxu1 %v8435_v56  ;;  %v8522_v56 = vld [vmem:[%s8897_s22 + $0x1830] ss:$40 sps:$4 sm:$0xff]  }
 0x32b   : > { %6184 = vmatprep.subr.bf16.mxu1 %v8443_v30  ;;  %v8527_v30 = vld [vmem:[%s8897_s22 + $0x17e4] ss:$40 sps:$4 sm:$0xff]  }
 0x32c   : > { %6142 = vmatpush1.bf16.msra.mxu0 %v8438_v57  ;;  %v5862_v57 = vpop.f32.mrf.mxu1 }
 0x32d   : > { %6143 = vmatprep.subr.bf16.mxu0 %v8446_v58  ;;  %v8525_v58 = vld [vmem:[%s8897_s22 + $0x17e0] ss:$40 sps:$4 sm:$0xff]  }
 0x32e   : > { %6185 = vmatpush1.bf16.msra.mxu1 %v8441_v59  ;;  %v8530_v59 = vld [vmem:[%s8897_s22 + $0x1794] ss:$40 sps:$4 sm:$0xff]  }
 0x32f   : > { %6186 = vmatprep.subr.bf16.mxu1 %v8449_v60  ;;  %v5864_v60 = vpop.f32.mrf.mxu1 }
 0x330   : > { %6144 = vmatpush2.bf16.msra.mxu0 %v8444_v63  ;;  %v8528_v63 = vld [vmem:[%s8897_s22 + $0x1790] ss:$40 sps:$4 sm:$0xff]  }
 0x331   : > { %6145 = vmatprep.subr.bf16.mxu0 %v8452_v0  ;;  %v8533_v0 = vld [vmem:[%s8897_s22 + $0x1744] ss:$40 sps:$4 sm:$0xff]  }
 0x332   : > { %6187 = vmatpush2.bf16.msra.mxu1 %v8447_v1  ;;  %v1107_v1 = vsub.s32 6, %v9298_v10 }
 0x333   : > { %6188 = vmatprep.subr.bf16.mxu1 %v8455_v2  ;;  %v5866_v2 = vpop.f32.mrf.mxu1 }
 0x334   : > { %6146 = vmatpush2.bf16.msra.mxu0 %v8450_v4  ;;  %v1111_v4 = vsub.s32 7, %v9298_v10 }
 0x335   : > { %6147 = vmatprep.subr.bf16.mxu0 %v8458_v7  ;;  %v8531_v7 = vld [vmem:[%s8897_s22 + $0x1740] ss:$40 sps:$4 sm:$0xff]  }
 0x336   : > { %6189 = vmatpush2.bf16.msra.mxu1 %v8453_v8 }
 0x337   : > { %6190 = vmatprep.subr.bf16.mxu1 %v8461_v11  ;;  %v8536_v11 = vld [vmem:[%s8897_s22 + $0x16f4] ss:$40 sps:$4 sm:$0xff]  }
 0x338   : > { %6148 = vmatpush2.bf16.msra.mxu0 %v8456_v12  ;;  %v8563_v12 = vld [vmem:[%s9303_s20] sm:$0xff] }
 0x339   : > { %6149 = vmatprep.subr.bf16.mxu0 %v8464_v13  ;;  %v1108_v13 = vrot.slane %v8563_v12, %v1107_v1 }
 0x33a   : > { %6191 = vmatpush2.bf16.msra.mxu1 %v8459_v14 }
 0x33b   : > { %6192 = vmatprep.subr.bf16.mxu1 %v8467_v16  ;;  %v1112_v16 = vrot.slane %v8563_v12, %v1111_v4 }
 0x33c   : > { %6150 = vmatpush2.bf16.msra.mxu0 %v8462_v17  ;;  %v8534_v17 = vld [vmem:[%s8897_s22 + $0x16f0] ss:$40 sps:$4 sm:$0xff]  }
 0x33d   : > { %6151 = vmatprep.subr.bf16.mxu0 %v8470_v18 }
 0x33e   : > { %6193 = vmatpush2.bf16.msra.mxu1 %v8465_v21  ;;  %v8539_v21 = vld [vmem:[%s8897_s22 + $0x16a4] ss:$40 sps:$4 sm:$0xff]  }
 0x33f   : > { %6194 = vmatprep.subr.bf16.mxu1 %v8473_v22  ;;  %v5861_v22 = vadd.f32 %v5860_v55, %v1108_v13 }
 0x340   : > { %6152 = vmatpush2.bf16.msra.mxu0 %v8468_v62 }
 0x341   : > { %6153 = vmatprep.subr.bf16.mxu0 %v8476_v24  ;;  %v5863_v24 = vadd.f32 %v5862_v57, %v1112_v16 }
 0x342   : > { %6195 = vmatpush2.bf16.msra.mxu1 %v8471_v25  ;;  %v8537_v25 = vld [vmem:[%s8897_s22 + $0x16a0] ss:$40 sps:$4 sm:$0xff]  }
 0x343   : > { %6196 = vmatprep.subr.bf16.mxu1 %v8479_v27 }
 0x344   : > { %6154 = vmatpush2.bf16.msra.mxu0 %v8474_v3 }
 0x345   : > { %6155 = vmatprep.subr.bf16.mxu0 %v8482_v5 }
 0x346   : > { %6197 = vmatpush2.bf16.msra.mxu1 %v8477_v32  ;;  %v5865_v32 = vadd.f32 %v5864_v60, %v1108_v13 }
 0x347   : > { %6198 = vmatprep.subr.bf16.mxu1 %v8485_v9 }
 0x348   : > { %6156 = vmatpush2.bf16.msra.mxu0 %v8480_v33 }
 0x349   : > { %6157 = vmatprep.subr.bf16.mxu0 %v8488_v34  ;;  %v5867_v34 = vadd.f32 %v5866_v2, %v1112_v16 }
 0x34a   : > { %6199 = vmatpush2.bf16.msra.mxu1 %v8483_v20 }
 0x34b   : > { %6200 = vmatprep.subr.bf16.mxu1 %v8491_v15 }
 0x34c   : > { %6158 = vmatpush2.bf16.msra.mxu0 %v8486_v35 }
 0x34d   : > { %6213 = vmatprep.subr.bf16.mxu0 %v8494_v23 }
 0x34e   : > { %6201 = vmatpush2.bf16.msra.mxu1 %v8489_v37  ;;  %v8564_v37 = vld [vmem:[#allocation2 + $0x20] ss:$40 sps:$4 sm:$0xff]  }
 0x34f   : > { %6160 = vmatmul.mubr.bf16.vlgmr.msra.gmra.mxu0 %v8560_v41  ;;  %v5903_v8 = vpop.f32.mrf.mxu0 }
 0x350   : > { %6214 = vmatpush1.bf16.msra.mxu0 %v8492_v39  ;;  %6245 = vmatprep.mubr.bf16.mxu0 %v8561_v42  ;;  %v5904_v3 = vadd.f32 %v5903_v8, %v5861_v22 }
 0x351   : > { %6203 = vmatmul.mubr.bf16.vlgmr.msra.gmra.mxu1 %v8562_v43  ;;  %6215 = vmatprep.subr.bf16.mxu0 %v8497_v40  ;;  %v5946_v14 = vpop.f32.mrf.mxu1  ;;  %v5905_v18 = vpop.f32.mrf.mxu0 }
 0x352   : > { %v5906_v9 = vadd.f32 %v5905_v18, %v5863_v24  ;;  %v5947_v20 = vadd.f32 %v5946_v14, %v5904_v3 }
 0x353   : > { %v5948_v62 = vpop.f32.mrf.mxu1  ;;  %v5907_v27 = vpop.f32.mrf.mxu0 }
 0x354   : > { %6216 = vmatpush1.bf16.msra.mxu0 %v8495_v36  ;;  %v5908_v15 = vadd.f32 %v5907_v27, %v5865_v32  ;;  %v5949_v39 = vadd.f32 %v5948_v62, %v5906_v9 }
 0x355   : > { %6217 = vmatprep.subr.bf16.mxu0 %v8500_v26  ;;  %v5950_v5 = vpop.f32.mrf.mxu1  ;;  %v5909_v33 = vpop.f32.mrf.mxu0 }
 0x356   : > { %v5910_v40 = vadd.f32 %v5909_v33, %v5867_v34  ;;  %v5951_v43 = vadd.f32 %v5950_v5, %v5908_v15 }
 0x357   : > { %v5952_v35 = vpop.f32.mrf.mxu1 }
 0x358   : > { %6218 = vmatpush1.bf16.msra.mxu0 %v8498_v38 }
 0x359   : > { %6219 = vmatprep.subr.bf16.mxu0 %v8503_v44 }
 0x35c   : > { %6220 = vmatpush1.bf16.msra.mxu0 %v8501_v45 }
 0x35d   : > { %6221 = vmatprep.subr.bf16.mxu0 %v8506_v28  ;;  %v5953_v28 = vadd.f32 %v5952_v35, %v5910_v40 }
 0x360   : > { %6222 = vmatpush1.bf16.msra.mxu0 %v8504_v46 }
 0x361   : > { %6223 = vmatprep.subr.bf16.mxu0 %v8509_v48 }
 0x364   : > { %6224 = vmatpush1.bf16.msra.mxu0 %v8507_v49 }
 0x365   : > { %6225 = vmatprep.subr.bf16.mxu0 %v8512_v29 }
 0x368   : > { %6226 = vmatpush1.bf16.msra.mxu0 %v8510_v50 }
 0x369   : > { %6227 = vmatprep.subr.bf16.mxu0 %v8515_v31 }
 0x36c   : > { %6228 = vmatpush1.bf16.msra.mxu0 %v8513_v61 }
 0x36d   : > { %6229 = vmatprep.subr.bf16.mxu0 %v8518_v51 }
 0x370   : > { %6230 = vmatpush2.bf16.msra.mxu0 %v8516_v52 }
 0x371   : > { %6231 = vmatprep.subr.bf16.mxu0 %v8521_v6 }
 0x374   : > { %6232 = vmatpush2.bf16.msra.mxu0 %v8519_v53 }
 0x375   : > { %6233 = vmatprep.subr.bf16.mxu0 %v8524_v54 }
 0x378   : > { %6234 = vmatpush2.bf16.msra.mxu0 %v8522_v56  ;;  %v1078_v56 = vld [vmem:[%s9303_s20 + $0x8] sm:$0x3] }
 0x379   : > { %6235 = vmatprep.subr.bf16.mxu0 %v8527_v30  ;;  %v1120_v60 = vrot.slane %v1078_v56, %v1087_v47 }
 0x37c   : > { %6236 = vmatpush2.bf16.msra.mxu0 %v8525_v58  ;;  %v1116_v58 = vrot.slane %v1078_v56, %v1083_v19 }
 0x37d   : > { %6237 = vmatprep.subr.bf16.mxu0 %v8530_v59 }
 0x380   : > { %6238 = vmatpush2.bf16.msra.mxu0 %v8528_v63 }
 0x381   : > { %6239 = vmatprep.subr.bf16.mxu0 %v8533_v0 }
 0x384   : > { %6240 = vmatpush2.bf16.msra.mxu0 %v8531_v7 }
 0x385   : > { %6241 = vmatprep.subr.bf16.mxu0 %v8536_v11 }
 0x388   : > { %6242 = vmatpush2.bf16.msra.mxu0 %v8534_v17 }
 0x389   : > { %6243 = vmatprep.subr.bf16.mxu0 %v8539_v21 }
 0x38c   : > { %6244 = vmatpush2.bf16.msra.mxu0 %v8537_v25 }
 0x38f   : > { %v5989_v23 = vpop.f32.mrf.mxu0  ;;  %6246 = vmatmul.mubr.bf16.vlgmr.msra.gmra.mxu0 %v8564_v37 }
 0x390   : > { %v5990_v41 = vadd.f32 %v5989_v23, %v5947_v20 }
 0x391   : > { %v5991_v36 = vpop.f32.mrf.mxu0  ;;  %v6032_v42 = vpop.f32.mrf.mxu1 }
 0x392   : > { %v5992_v26 = vadd.f32 %v5991_v36, %v5949_v39  ;;  %v6033_v38 = vadd.f32 %v6032_v42, %v5990_v41 }
 0x393   : > { %v5993_v44 = vpop.f32.mrf.mxu0  ;;  %v6034_v45 = vpop.f32.mrf.mxu1 }
 0x394   : > { %6262 = vst [vmem:[%s9344_s29 + $0x30] sm:$0xff] %v6033_v38  ;;  %v5994_v46 = vadd.f32 %v5993_v44, %v5951_v43  ;;  %v6035_v48 = vadd.f32 %v6034_v45, %v5992_v26 }
 0x395   : > { %v5995_v49 = vpop.f32.mrf.mxu0  ;;  %v6036_v29 = vpop.f32.mrf.mxu1 }
 0x396   : > { %6263 = vst [vmem:[%s9344_s29 + $0x38] sm:$0xff] %v6035_v48  ;;  %v5996_v50 = vadd.f32 %v5995_v49, %v5953_v28  ;;  %v6037_v31 = vadd.f32 %v6036_v29, %v5994_v46 }
 0x397   : > { %v6038_v61 = vpop.f32.mrf.mxu1 }
 0x398   : > { %6272 = vst [vmem:[%s9344_s29 + $0x80] sm:$0xff] %v6037_v31  ;;  %v6039_v51 = vadd.f32 %v6038_v61, %v5996_v50 }
 0x39a   : > { %6273 = vst [vmem:[%s9344_s29 + $0x88] sm:$0xff] %v6039_v51 }
 0x3cf   : > { %v6075_v52 = vpop.f32.mrf.mxu0 }
 0x3d0   : > { %v6076_v0 = vadd.f32 %v6075_v52, %v1116_v58 }
 0x3d1   : > { %v6077_v6 = vpop.f32.mrf.mxu0  ;;  %v6118_v53 = vpop.f32.mrf.mxu1 }
 0x3d2   : > { %v6078_v4 = vadd.f32 %v6077_v6, %v1120_v60  ;;  %v6119_v7 = vadd.f32 %v6118_v53, %v6076_v0 }
 0x3d3   : > { %v6079_v54 = vpop.f32.mrf.mxu0  ;;  %v6120_v55 = vpop.f32.mrf.mxu1 }
 0x3d4   : > { %v6080_v8 = vadd.f32 %v6079_v54, %v1116_v58  ;;  %v6121_v13 = vadd.f32 %v6120_v55, %v6078_v4 }
 0x3d5   : > { %v6081_v30 = vpop.f32.mrf.mxu0  ;;  %v6122_v57 = vpop.f32.mrf.mxu1 }
 0x3d6   : > { %v6082_v14 = vadd.f32 %v6081_v30, %v1120_v60  ;;  %v6123_v17 = vadd.f32 %v6122_v57, %v6080_v8 }
 0x3d7   : > { %v6124_v63 = vpop.f32.mrf.mxu1 }
 0x3d8   : > { %v6125_v47 = vadd.f32 %v6124_v63, %v6082_v14 }
 0x40f   : > { %v6161_v59 = vpop.f32.mrf.mxu0 }
 0x410   : > { %v6162_v16 = vadd.f32 %v6161_v59, %v6119_v7 }
 0x411   : > { %v6163_v1 = vpop.f32.mrf.mxu0  ;;  %v6204_v2 = vpop.f32.mrf.mxu1 }
 0x412   : > { %v6164_v19 = vadd.f32 %v6163_v1, %v6121_v13  ;;  %v6205_v21 = vadd.f32 %v6204_v2, %v6162_v16 }
 0x413   : > { %v6165_v11 = vpop.f32.mrf.mxu0  ;;  %v6206_v12 = vpop.f32.mrf.mxu1 }
 0x414   : > { %v6166_v22 = vadd.f32 %v6165_v11, %v6123_v17  ;;  %v6207_v24 = vadd.f32 %v6206_v12, %v6164_v19 }
 0x415   : > { %v6167_v18 = vpop.f32.mrf.mxu0  ;;  %v6208_v10 = vpop.f32.mrf.mxu1 }
 0x416   : > { %v6168_v25 = vadd.f32 %v6167_v18, %v6125_v47  ;;  %v6209_v32 = vadd.f32 %v6208_v10, %v6166_v22 }
 0x417   : > { %v6210_v3 = vpop.f32.mrf.mxu1 }
 0x418   : > { %v6211_v34 = vadd.f32 %v6210_v3, %v6168_v25 }
 0x44f   : > { %v6247_v62 = vpop.f32.mrf.mxu0 }
 0x450   : > { %v6248_v27 = vadd.f32 %v6247_v62, %v6205_v21 }
 0x451   : > { %v6249_v5 = vpop.f32.mrf.mxu0 }
 0x452   : > { %6264 = vst [vmem:[%s9344_s29 + $0x40] sm:$0xff] %v6248_v27  ;;  %v6250_v9 = vadd.f32 %v6249_v5, %v6207_v24 }
 0x453   : > { %v6251_v33 = vpop.f32.mrf.mxu0 }
 0x454   : > { %6265 = vst [vmem:[%s9344_s29 + $0x48] sm:$0xff] %v6250_v9  ;;  %v6252_v20 = vadd.f32 %v6251_v33, %v6209_v32 }
 0x455   : > { %v6253_v15 = vpop.f32.mrf.mxu0 }
 0x456   : > { %6274 = vst [vmem:[%s9344_s29 + $0x90] sm:$0xff] %v6252_v20  ;;  %v6254_v35 = vadd.f32 %v6253_v15, %v6211_v34 }
 0x458   : > { %6275 = vst [vmem:[%s9344_s29 + $0x98] sm:$0xff] %v6254_v35 }
 0x459   : > { %8660 = shalt.err (!%p8657_p7)
}
 0x45a   : > { %s8661_s4 = scalar_lea.hbm %s9830_s6, 2560  ;;  %s8665_s5 = scalar_lea.hbm %s9884_s3, 10240 }
 0x45b   : > { %p8662_p10 = scmp.ne.s32.totalorder %s9830_s6, %s8661_s4  ;;  %p8666_p1 = scmp.lt.s32.totalorder %s9830_s6, %s9884_s3 }
 0x45c   : > { %p8667_p3 = scmp.lt.s32.totalorder %s8665_s5, %s8661_s4 }
 0x45d   : > { %p8663_p11 = pnand %p8662_p10, %p9898_p13 }
 0x45e   : > { %p8668_p6 = por %p8667_p3, %p8666_p1 }
 0x45f   : > { %p8664_p4 = pneg %p8663_p11 }
 0x461   : > { %p8669_p8 = pnand %p8668_p6, %p8664_p4 }
 0x463   : > { %8672 = shalt.err (!%p8669_p8)
}
 0x464   : > { %s8740_s29 = smov 1280   ;;  %s8741_s8 = smov 5120  }
 0x465   : > { %s8742_s28 = smov 80  }
 0x466   : > { %7249 = dma.vmem_to_hbm [thread:$0]  (%p9898_p13), %s9832_s21, 2560, %s9830_s6, %s6277_s15, %s8740_s29, %s8741_s8, %s8742_s28  }
 0x467 PF: > { %p7269_p5 = scmp.ge.s32.totalorder %s8731_s17, 2  ;;  %s6308_s30 = sand.u32 1, %s8711_s12  }
 0x468   : > { %p9899_p9 = scmp.ne.s32.totalorder %s9892_s27, 0  ;;  %s6309_s7 = scalar_lea.sflag [#allocation4], %s6308_s30 }
 0x46a   : > { %p7263_p12 = pnand %p7269_p5, %p9899_p9 }
 0x46c   : > { %p7264_p0 = pneg %p7263_p12 }
 0x46e   : > { %8706 = dma.done.wait (%p7264_p0), %s6309_s7, 2560  }
 0x46f   : > { %8708 = vsyncadd (%p7264_p0), %s6309_s7, 4294964736  ;;  %s20_s17 = sadd.s32 1, %s8731_s17   ;;  %s9900_s12 = smov %s8715_s13 }
 0x470   : > { %p17_p2 = scmp.ge.s32.totalorder %s20_s17, 6   ;;  %s9901_s13 = smov %s8719_s14 }
 0x471   : > { %s9902_s14 = smov %s8809_s23  ;;  %s9903_s15 = smov %s8727_s16 }
 0x472   : > { %s9904_s16 = smov %s9906_s18  ;;  %19 = sbr.rel (!%p17_p2) target bundleno = 7 (0x7), region = 94 }
 0x477   :  { %6314 = vsyncpa [#allocation3], 1 }
 0x478   :  { %6316 = vsyncpa [#allocation3 + $0x1], 1 }
 0x479   :  { %6317 = vsyncpa [#allocation6], 1 }
 0x47a   :  { %6319 = vsyncpa [#allocation6 + $0x1], 1 }
 0x47b   :  { %6320 = vsyncpa [#allocation4], 1 }
 0x47c   :  { %6322 = vsyncpa [#allocation4 + $0x1], 1 }

</bundles_post_ra>
